<compile_context>
chip_gen: v7x
topology: tpu7x:2x2x1
jax: 0.10.0
libtpu: 0.0.40
codegen_flags: <defaults>
</compile_context>

<pallas_src>
import jax
import jax.numpy as jnp
from jax.experimental import pallas as pl
from jax.experimental.pallas import tpu as pltpu


def _vmem_spec():
    return pl.BlockSpec(memory_space=pltpu.MemorySpace.VMEM)


def _round_up(x, m):
    return (x + m - 1) // m * m


# ---------------- Pallas kernels (hot path) ----------------

def conv_relu_pool_kernel(p_ref, w_ref, b_ref, o_ref):
    # p_ref: (4, TILE_M, K) bf16 im2col patches (4 = the 2x2 pooling taps)
    # w_ref: (K, Cout) bf16   b_ref: (1, Cout) f32   o_ref: (TILE_M, Cout) f32
    t, tm, k = p_ref.shape
    # single MXU push: fold tap axis into rows (layout-free: tm is a multiple of 16)
    acc = jnp.dot(p_ref[...].reshape(t * tm, k), w_ref[...],
                  preferred_element_type=jnp.float32)          # (4*tm, Cout) f32
    acc = acc.reshape(t, tm, acc.shape[-1])                    # (4, tm, Cout)
    # max-pool(2x2) == max over the 4 taps; bias + ReLU hoisted AFTER the max
    mx = jnp.max(acc, axis=0)                                  # (tm, Cout)
    o_ref[...] = jnp.maximum(mx + b_ref[...], 0.0)


def linear_kernel(x_ref, w_ref, b_ref, o_ref):
    # x_ref: (B, F) bf16  w_ref: (F, Out) bf16  b_ref: (1, Out) f32  o_ref: (B, Out) f32
    o_ref[...] = jnp.dot(x_ref[...], w_ref[...],
                         preferred_element_type=jnp.float32) + b_ref[...]


# ---------------- JAX glue (im2col / padding / param plumbing) ----------------

def _im2col_pooled(x_nhwc):
    """(B, H, W, Cin) -> (4, B*(H//2)*(W//2), 9*Cin) with pad=1, 3x3 taps (bf16)."""
    B, H, W, Cin = x_nhwc.shape
    xp = jnp.pad(x_nhwc, ((0, 0), (1, 1), (1, 1), (0, 0)))
    taps = [xp[:, ky:ky + H, kx:kx + W, :] for ky in range(3) for kx in range(3)]
    cols = jnp.stack(taps, axis=3)                       # (B, H, W, 9, Cin)
    K = 9 * Cin
    cols = cols.reshape(B, H, W, K)
    Hh, Wh = H // 2, W // 2
    cols = cols.reshape(B, Hh, 2, Wh, 2, K)
    cols = jnp.transpose(cols, (2, 4, 0, 1, 3, 5))       # (2, 2, B, Hh, Wh, K)
    return cols.reshape(4, B * Hh * Wh, K)


def conv_relu_pool(x_nhwc, wmat, b, tile_m=512):
    """x_nhwc bf16, wmat (K, Cout) bf16, b (1, Cout) f32 -> (B, H/2, W/2, Cout) f32."""
    B, H, W, Cin = x_nhwc.shape
    K, Cout = wmat.shape
    Hh, Wh = H // 2, W // 2
    M = B * Hh * Wh
    patches = _im2col_pooled(x_nhwc)                     # (4, M, K) bf16

    tm = min(tile_m, _round_up(M, 16))                   # multiple of 16 (bf16 sublane tile)
    Mpad = _round_up(M, tm)
    if Mpad != M:
        patches = jnp.pad(patches, ((0, 0), (0, Mpad - M), (0, 0)))

    out = pl.pallas_call(
        conv_relu_pool_kernel,
        out_shape=jax.ShapeDtypeStruct((Mpad, Cout), jnp.float32),
        grid_spec=pltpu.PrefetchScalarGridSpec(
            num_scalar_prefetch=0,
            grid=(Mpad // tm,),
            in_specs=[
                pl.BlockSpec((4, tm, K), lambda i: (0, i, 0)),   # streamed patch tiles
                pl.BlockSpec((K, Cout), lambda i: (0, 0)),       # VMEM-resident weights
                pl.BlockSpec((1, Cout), lambda i: (0, 0)),       # VMEM-resident bias
            ],
            out_specs=pl.BlockSpec((tm, Cout), lambda i: (i, 0)),
        ),
        compiler_params=pltpu.CompilerParams(
            dimension_semantics=("parallel",)),
    )(patches, wmat, b)
    return out[:M].reshape(B, Hh, Wh, Cout)


def linear(x_bf16, w_fo, b):
    B, F = x_bf16.shape
    Out = w_fo.shape[1]
    return pl.pallas_call(
        linear_kernel,
        out_shape=jax.ShapeDtypeStruct((B, Out), jnp.float32),
        in_specs=[_vmem_spec(), _vmem_spec(), _vmem_spec()],
        out_specs=_vmem_spec(),
    )(x_bf16, w_fo, b)


def prepare_params(params):
    """One-time (outside jit) conversion of torch-layout params to kernel layout."""
    def conv_mat(w_oihw):
        Cout, Cin = w_oihw.shape[0], w_oihw.shape[1]
        return (jnp.transpose(w_oihw, (2, 3, 1, 0))
                .reshape(9 * Cin, Cout).astype(jnp.bfloat16))

    fc_w = params["fc_w"]                                  # (10, C*H*W), torch (C,H,W) order
    C2 = params["conv2_w"].shape[0]
    hw = fc_w.shape[1] // C2
    side = int(round(hw ** 0.5))
    # permute FC columns once to (H, W, C) order so NHWC flatten feeds it directly
    fc_w_hwc = (fc_w.reshape(-1, C2, side, side)
                .transpose(0, 2, 3, 1)
                .reshape(fc_w.shape[0], -1))
    return dict(
        conv1_w=conv_mat(params["conv1_w"]),
        conv1_b=params["conv1_b"].reshape(1, -1).astype(jnp.float32),
        conv2_w=conv_mat(params["conv2_w"]),
        conv2_b=params["conv2_b"].reshape(1, -1).astype(jnp.float32),
        fc_w=fc_w_hwc.T.astype(jnp.bfloat16),              # (F, 10)
        fc_b=params["fc_b"].reshape(1, -1).astype(jnp.float32),
    )


def cnn_forward(x_nchw, kp):
    x = jnp.transpose(x_nchw, (0, 2, 3, 1)).astype(jnp.bfloat16)      # NCHW -> NHWC bf16
    x = conv_relu_pool(x, kp["conv1_w"], kp["conv1_b"])               # (B,14,14,32) f32
    x = conv_relu_pool(x.astype(jnp.bfloat16),
                       kp["conv2_w"], kp["conv2_b"])                  # (B, 7, 7,64) f32
    B = x.shape[0]
    x = x.reshape(B, -1).astype(jnp.bfloat16)                         # NHWC flatten (pre-permuted fc_w)
    return linear(x, kp["fc_w"], kp["fc_b"])                          # (B, 10) f32


# ---------------- pure-JAX reference for verification ----------------

def cnn_reference(x_nchw, params):
    def conv_block(x, w, b):
        y = jax.lax.conv_general_dilated(
            x, w, (1, 1), ((1, 1), (1, 1)),
            dimension_numbers=("NCHW", "OIHW", "NCHW"),
            precision=jax.lax.Precision.HIGHEST)
        y = jnp.maximum(y + b[None, :, None, None], 0.0)
        return jax.lax.reduce_window(y, -jnp.inf, jax.lax.max,
                                     (1, 1, 2, 2), (1, 1, 2, 2), "VALID")
    y = conv_block(x_nchw, params["conv1_w"], params["conv1_b"])
    y = conv_block(y, params["conv2_w"], params["conv2_b"])
    y = y.reshape(y.shape[0], -1)
    return y @ params["fc_w"].T + params["fc_b"]


if __name__ == "__main__":
    key = jax.random.PRNGKey(0)
    keys = jax.random.split(key, 7)

    def u(k, shape, bound):
        return jax.random.uniform(k, shape, jnp.float32, -bound, bound)

    k1 = 1.0 / (1 * 3 * 3) ** 0.5
    k2 = 1.0 / (32 * 3 * 3) ** 0.5
    fan_in = 7 * 7 * 64
    xavier = (6.0 / (fan_in + 10)) ** 0.5
    params = dict(
        conv1_w=u(keys[0], (32, 1, 3, 3), k1),
        conv1_b=u(keys[1], (32,), k1),
        conv2_w=u(keys[2], (64, 32, 3, 3), k2),
        conv2_b=u(keys[3], (64,), k2),
        fc_w=u(keys[4], (10, fan_in), xavier),      # xavier_uniform, torch (out, in)
        fc_b=u(keys[5], (10,), 1.0 / fan_in ** 0.5),
    )

    # 28x28 single-channel is implied by fc = Linear(7*7*64, 10); small batch.
    x = jax.random.normal(keys[6], (2, 1, 28, 28), jnp.float32)

    kparams = prepare_params(params)                # one-time layout/dtype conversion
    out = jax.jit(cnn_forward)(x, kparams)
    out = jax.block_until_ready(out)
    assert out.shape == (2, 10)

    ref = cnn_reference(x, params)
    err = float(jnp.max(jnp.abs(out - ref)))
    if err > 5e-2:
        raise AssertionError(f"mismatch vs reference: max abs err {err}")

    print("KERNEL_OK")
</pallas_src>

<mosaic_0001>
module attributes {stable_mosaic.version = 11 : i64} {
  func.func @conv_relu_pool_kernel(%arg0: i32, %arg1: memref<4x400x9xbf16, #tpu.memory_space<vmem>>, %arg2: memref<9x32xbf16, #tpu.memory_space<vmem>>, %arg3: memref<1x32xf32, #tpu.memory_space<vmem>>, %arg4: memref<400x32xf32, #tpu.memory_space<vmem>>) attributes {dimension_semantics = [#tpu.dimension_semantics<parallel>], iteration_bounds = array<i64: 1>, scalar_prefetch = 0 : i64, scratch_operands = 0 : i64, tpu.core_type = #tpu.core_type<tc>, window_params = [{transform_indices = @transform_0, window_bounds = array<i64: 4, 400, 9>}, {pipeline_mode = #tpu.pipeline_mode<synchronous>, transform_indices = @transform_1, window_bounds = array<i64: 9, 32>}, {pipeline_mode = #tpu.pipeline_mode<synchronous>, transform_indices = @transform_2, window_bounds = array<i64: 1, 32>}, {transform_indices = @transform_3, window_bounds = array<i64: 400, 32>}]} {
    %c0 = arith.constant 0 : index
    %c0_0 = arith.constant 0 : index
    %c0_1 = arith.constant 0 : index
    %0 = vector.load %arg1[%c0, %c0_0, %c0_1] : memref<4x400x9xbf16, #tpu.memory_space<vmem>>, vector<4x400x9xbf16>
    %1 = vector.shape_cast %0 : vector<4x400x9xbf16> to vector<1600x9xbf16>
    %c0_2 = arith.constant 0 : index
    %c0_3 = arith.constant 0 : index
    %2 = vector.load %arg2[%c0_2, %c0_3] : memref<9x32xbf16, #tpu.memory_space<vmem>>, vector<9x32xbf16>
    %cst = arith.constant dense<0.000000e+00> : vector<1600x32xf32>
    %3 = tpu.matmul %1, %2, %cst {dimension_numbers = #tpu.dot_dimension_numbers<[1], [0], [0], [1], [0, 0, 1, 1], [], []>} : vector<1600x9xbf16>, vector<9x32xbf16>, vector<1600x32xf32> -> vector<1600x32xf32>
    %4 = vector.shape_cast %3 : vector<1600x32xf32> to vector<4x400x32xf32>
    %cst_4 = arith.constant dense<0xFF800000> : vector<400x32xf32>
    %5 = vector.multi_reduction <maximumf>, %4, %cst_4 [0] : vector<4x400x32xf32> to vector<400x32xf32>
    %c0_5 = arith.constant 0 : index
    %c0_6 = arith.constant 0 : index
    %6 = vector.load %arg3[%c0_5, %c0_6] : memref<1x32xf32, #tpu.memory_space<vmem>>, vector<1x32xf32>
    %7 = vector.broadcast %6 : vector<1x32xf32> to vector<400x32xf32>
    %8 = arith.addf %5, %7 : vector<400x32xf32>
    %cst_7 = arith.constant 0.000000e+00 : f32
    %9 = vector.broadcast %cst_7 : f32 to vector<400x32xf32>
    %10 = arith.maximumf %8, %9 : vector<400x32xf32>
    %c0_8 = arith.constant 0 : index
    %c0_9 = arith.constant 0 : index
    %11 = vector.load %arg4[%c0_8, %c0_9] : memref<400x32xf32, #tpu.memory_space<vmem>>, vector<400x32xf32>
    tpu.vector_store %arg4[%c0_8, %c0_9], %10 {strides = array<i32>} : memref<400x32xf32, #tpu.memory_space<vmem>>, vector<400x32xf32>,
    return
  }
  func.func @transform_0(%arg0: i32) -> (i32, i32, i32) {
    %c0_i32 = arith.constant 0 : i32
    %c0_i32_0 = arith.constant 0 : i32
    %c0_i32_1 = arith.constant 0 : i32
    return %c0_i32, %arg0, %c0_i32_0 : i32, i32, i32
  }
  func.func @transform_1(%arg0: i32) -> (i32, i32) {
    %c0_i32 = arith.constant 0 : i32
    %c0_i32_0 = arith.constant 0 : i32
    %c0_i32_1 = arith.constant 0 : i32
    return %c0_i32, %c0_i32_0 : i32, i32
  }
  func.func @transform_2(%arg0: i32) -> (i32, i32) {
    %c0_i32 = arith.constant 0 : i32
    %c0_i32_0 = arith.constant 0 : i32
    %c0_i32_1 = arith.constant 0 : i32
    return %c0_i32, %c0_i32_0 : i32, i32
  }
  func.func @transform_3(%arg0: i32) -> (i32, i32) {
    %c0_i32 = arith.constant 0 : i32
    %c0_i32_0 = arith.constant 0 : i32
    return %arg0, %c0_i32 : i32, i32
  }
}

module attributes {stable_mosaic.version = 11 : i64} {
  func.func @conv_relu_pool_kernel(%arg0: i32, %arg1: memref<4x112x288xbf16, #tpu.memory_space<vmem>>, %arg2: memref<288x64xbf16, #tpu.memory_space<vmem>>, %arg3: memref<1x64xf32, #tpu.memory_space<vmem>>, %arg4: memref<112x64xf32, #tpu.memory_space<vmem>>) attributes {dimension_semantics = [#tpu.dimension_semantics<parallel>], iteration_bounds = array<i64: 1>, scalar_prefetch = 0 : i64, scratch_operands = 0 : i64, tpu.core_type = #tpu.core_type<tc>, window_params = [{transform_indices = @transform_0, window_bounds = array<i64: 4, 112, 288>}, {pipeline_mode = #tpu.pipeline_mode<synchronous>, transform_indices = @transform_1, window_bounds = array<i64: 288, 64>}, {pipeline_mode = #tpu.pipeline_mode<synchronous>, transform_indices = @transform_2, window_bounds = array<i64: 1, 64>}, {transform_indices = @transform_3, window_bounds = array<i64: 112, 64>}]} {
    %c0 = arith.constant 0 : index
    %c0_0 = arith.constant 0 : index
    %c0_1 = arith.constant 0 : index
    %0 = vector.load %arg1[%c0, %c0_0, %c0_1] : memref<4x112x288xbf16, #tpu.memory_space<vmem>>, vector<4x112x288xbf16>
    %1 = vector.shape_cast %0 : vector<4x112x288xbf16> to vector<448x288xbf16>
    %c0_2 = arith.constant 0 : index
    %c0_3 = arith.constant 0 : index
    %2 = vector.load %arg2[%c0_2, %c0_3] : memref<288x64xbf16, #tpu.memory_space<vmem>>, vector<288x64xbf16>
    %cst = arith.constant dense<0.000000e+00> : vector<448x64xf32>
    %3 = tpu.matmul %1, %2, %cst {dimension_numbers = #tpu.dot_dimension_numbers<[1], [0], [0], [1], [0, 0, 1, 1], [], []>} : vector<448x288xbf16>, vector<288x64xbf16>, vector<448x64xf32> -> vector<448x64xf32>
    %4 = vector.shape_cast %3 : vector<448x64xf32> to vector<4x112x64xf32>
    %cst_4 = arith.constant dense<0xFF800000> : vector<112x64xf32>
    %5 = vector.multi_reduction <maximumf>, %4, %cst_4 [0] : vector<4x112x64xf32> to vector<112x64xf32>
    %c0_5 = arith.constant 0 : index
    %c0_6 = arith.constant 0 : index
    %6 = vector.load %arg3[%c0_5, %c0_6] : memref<1x64xf32, #tpu.memory_space<vmem>>, vector<1x64xf32>
    %7 = vector.broadcast %6 : vector<1x64xf32> to vector<112x64xf32>
    %8 = arith.addf %5, %7 : vector<112x64xf32>
    %cst_7 = arith.constant 0.000000e+00 : f32
    %9 = vector.broadcast %cst_7 : f32 to vector<112x64xf32>
    %10 = arith.maximumf %8, %9 : vector<112x64xf32>
    %c0_8 = arith.constant 0 : index
    %c0_9 = arith.constant 0 : index
    %11 = vector.load %arg4[%c0_8, %c0_9] : memref<112x64xf32, #tpu.memory_space<vmem>>, vector<112x64xf32>
    tpu.vector_store %arg4[%c0_8, %c0_9], %10 {strides = array<i32>} : memref<112x64xf32, #tpu.memory_space<vmem>>, vector<112x64xf32>,
    return
  }
  func.func @transform_0(%arg0: i32) -> (i32, i32, i32) {
    %c0_i32 = arith.constant 0 : i32
    %c0_i32_0 = arith.constant 0 : i32
    %c0_i32_1 = arith.constant 0 : i32
    return %c0_i32, %arg0, %c0_i32_0 : i32, i32, i32
  }
  func.func @transform_1(%arg0: i32) -> (i32, i32) {
    %c0_i32 = arith.constant 0 : i32
    %c0_i32_0 = arith.constant 0 : i32
    %c0_i32_1 = arith.constant 0 : i32
    return %c0_i32, %c0_i32_0 : i32, i32
  }
  func.func @transform_2(%arg0: i32) -> (i32, i32) {
    %c0_i32 = arith.constant 0 : i32
    %c0_i32_0 = arith.constant 0 : i32
    %c0_i32_1 = arith.constant 0 : i32
    return %c0_i32, %c0_i32_0 : i32, i32
  }
  func.func @transform_3(%arg0: i32) -> (i32, i32) {
    %c0_i32 = arith.constant 0 : i32
    %c0_i32_0 = arith.constant 0 : i32
    return %arg0, %c0_i32 : i32, i32
  }
}

module attributes {stable_mosaic.version = 11 : i64} {
  func.func @linear_kernel(%arg0: memref<2x3136xbf16, #tpu.memory_space<vmem>>, %arg1: memref<3136x10xbf16, #tpu.memory_space<vmem>>, %arg2: memref<1x10xf32, #tpu.memory_space<vmem>>, %arg3: memref<2x10xf32, #tpu.memory_space<vmem>>) attributes {dimension_semantics = [], scalar_prefetch = 0 : i64, scratch_operands = 0 : i64, tpu.core_type = #tpu.core_type<tc>} {
    %c0 = arith.constant 0 : index
    %c0_0 = arith.constant 0 : index
    %0 = vector.load %arg0[%c0, %c0_0] : memref<2x3136xbf16, #tpu.memory_space<vmem>>, vector<2x3136xbf16>
    %c0_1 = arith.constant 0 : index
    %c0_2 = arith.constant 0 : index
    %1 = vector.load %arg1[%c0_1, %c0_2] : memref<3136x10xbf16, #tpu.memory_space<vmem>>, vector<3136x10xbf16>
    %cst = arith.constant dense<0.000000e+00> : vector<2x10xf32>
    %2 = tpu.matmul %0, %1, %cst {dimension_numbers = #tpu.dot_dimension_numbers<[1], [0], [0], [1], [0, 0, 1, 1], [], []>} : vector<2x3136xbf16>, vector<3136x10xbf16>, vector<2x10xf32> -> vector<2x10xf32>
    %c0_3 = arith.constant 0 : index
    %c0_4 = arith.constant 0 : index
    %3 = vector.load %arg2[%c0_3, %c0_4] : memref<1x10xf32, #tpu.memory_space<vmem>>, vector<1x10xf32>
    %4 = vector.broadcast %3 : vector<1x10xf32> to vector<2x10xf32>
    %5 = arith.addf %2, %4 : vector<2x10xf32>
    %c0_5 = arith.constant 0 : index
    %c0_6 = arith.constant 0 : index
    %6 = vector.load %arg3[%c0_5, %c0_6] : memref<2x10xf32, #tpu.memory_space<vmem>>, vector<2x10xf32>
    tpu.vector_store %arg3[%c0_5, %c0_6], %5 {strides = array<i32>} : memref<2x10xf32, #tpu.memory_space<vmem>>, vector<2x10xf32>,
    return
  }
}

</mosaic_0001>

<bundles_post_ra>
// kernel: cnn_forward.3
= control target key start
LH: loop header
LB: loop body
LE: loop exit
PB: predicated region body
PF: predicated region fallthrough
CT: control target
= control target key end

     0   :  { %vm1023_vm0 = vcmask 1043456   ;;  %vm1024_vm1 = vcmask 1044480   ;;  %vm722_vm2 = vcmask 72704   ;;  %v2985_v1 = vmov 65535   ;;  %s4423_s1 = inlined_call_operand.vmem [shape: bf16[9,32], index: 1, kind: input, shape index: {}]   ;;  %s4424_s0 = inlined_call_operand.vmem [shape: bf16[4,400,9], index: 0, kind: input, shape index: {}]   ;;  %s4425_s2 = inlined_call_operand.vmem [shape: f32[1,32], index: 2, kind: input, shape index: {}]   ;;  %s4426_s3 = inlined_call_operand.vmem [shape: f32[400,32], index: 3, kind: output, shape index: {}]  }
   0x1   :  { %v2883_v0 = vld [vmem:[%s4423_s1] sm:$0x1f]   ;;  %v1025_v2 = vsel %vm1023_vm0, 4294967295, %v2985_v1  ;;  %v2886_v6 = vld [vmem:[%s4424_s0 + $0x190] sm:$0xff]   ;;  %v2885_v7 = vld [vmem:[%s4424_s0 + $0x8] sm:$0xff]   ;;  %vm1863_vm3 = vcmask 261120  }
   0x2   :  { %v2884_v3 = vld [vmem:[%s4424_s0] sm:$0xff]   ;;  %v1026_v4 = vsel %vm1024_vm1, %v1025_v2, 0  ;;  %v2887_v8 = vld [vmem:[%s4424_s0 + $0x198] sm:$0xff]   ;;  %v2888_v9 = vld [vmem:[%s4424_s0 + $0x10] sm:$0xff]   ;;  %2780 = vmatprep.mubr.msk.bf16.mxu1 %vm722_vm2, %v2886_v6 }
   0x3   :  { %v1028_v5 = vand.u32 %v2883_v0, %v1026_v4  ;;  %2680 = vmatprep.mubr.msk.bf16.mxu0 %vm722_vm2, %v2884_v3  ;;  %v2890_v10 = vld [vmem:[%s4424_s0 + $0x1a0] sm:$0xff]   ;;  %v2889_v11 = vld [vmem:[%s4424_s0 + $0x18] sm:$0xff]   ;;  %v2891_v12 = vld [vmem:[%s4424_s0 + $0x1a8] sm:$0xff]  }
   0x4   :  { %v2892_v13 = vld [vmem:[%s4424_s0 + $0x20] sm:$0xff]   ;;  %v2894_v14 = vld [vmem:[%s4424_s0 + $0x1b0] sm:$0xff]   ;;  %v2893_v15 = vld [vmem:[%s4424_s0 + $0x28] sm:$0xff]  }
   0x5   :  { %2678 = vmatprep.subr.bf16.mxu0 %v1028_v5  ;;  %2880 = vmatprep.subr.bf16.mxu1 %v1028_v5  ;;  %v2895_v16 = vld [vmem:[%s4424_s0 + $0x1b8] sm:$0xff]   ;;  %v2896_v17 = vld [vmem:[%s4424_s0 + $0x30] sm:$0xff]   ;;  %v2898_v18 = vld [vmem:[%s4424_s0 + $0x1c0] sm:$0xff]  }
   0x6   :  { %2679 = vmatpush3.bf16.msra.mxu0 %v1028_v5  ;;  %2881 = vmatpush3.bf16.msra.mxu1 %v1028_v5  ;;  %v2897_v19 = vld [vmem:[%s4424_s0 + $0x38] sm:$0xff]   ;;  %v2899_v20 = vld [vmem:[%s4424_s0 + $0x1c8] sm:$0xff]   ;;  %v2900_v21 = vld [vmem:[%s4424_s0 + $0x40] sm:$0xff]  }
   0x7   :  { %v2902_v22 = vld [vmem:[%s4424_s0 + $0x1d0] sm:$0xff]   ;;  %v2901_v23 = vld [vmem:[%s4424_s0 + $0x48] sm:$0xff]   ;;  %v2903_v24 = vld [vmem:[%s4424_s0 + $0x1d8] sm:$0xff]  }
   0x8   :  { %v2904_v25 = vld [vmem:[%s4424_s0 + $0x50] sm:$0xff]   ;;  %v2906_v26 = vld [vmem:[%s4424_s0 + $0x1e0] sm:$0xff]   ;;  %v2905_v27 = vld [vmem:[%s4424_s0 + $0x58] sm:$0xff]  }
   0x9   :  { %2681 = vmatmul.mubr.msk.bf16.vlgmr.msra.gmra.mrb[0].mxu0 %vm722_vm2, %v2885_v7  ;;  %2781 = vmatmul.mubr.msk.bf16.vlgmr.msra.gmra.mrb[0].mxu1 %vm722_vm2, %v2887_v8  ;;  %v2907_v28 = vld [vmem:[%s4424_s0 + $0x1e8] sm:$0xff]   ;;  %v2908_v29 = vld [vmem:[%s4424_s0 + $0x60] sm:$0xff]   ;;  %v2910_v30 = vld [vmem:[%s4424_s0 + $0x1f0] sm:$0xff]  }
   0xa   :  { %2684 = vmatprep.mubr.msk.bf16.mxu0 %vm722_vm2, %v2888_v9  ;;  %2784 = vmatprep.mubr.msk.bf16.mxu1 %vm722_vm2, %v2890_v10  ;;  %v2909_v31 = vld [vmem:[%s4424_s0 + $0x68] sm:$0xff]   ;;  %v2911_v32 = vld [vmem:[%s4424_s0 + $0x1f8] sm:$0xff]   ;;  %v2912_v33 = vld [vmem:[%s4424_s0 + $0x70] sm:$0xff]  }
   0xb   :  { %v2914_v34 = vld [vmem:[%s4424_s0 + $0x200] sm:$0xff]   ;;  %v2913_v35 = vld [vmem:[%s4424_s0 + $0x78] sm:$0xff]   ;;  %v2915_v36 = vld [vmem:[%s4424_s0 + $0x208] sm:$0xff]  }
   0xc   :  { %v2916_v37 = vld [vmem:[%s4424_s0 + $0x80] sm:$0xff]   ;;  %v2918_v38 = vld [vmem:[%s4424_s0 + $0x210] sm:$0xff]   ;;  %v2917_v39 = vld [vmem:[%s4424_s0 + $0x88] sm:$0xff]  }
   0xd   :  { %v2919_v40 = vld [vmem:[%s4424_s0 + $0x218] sm:$0xff]   ;;  %v2920_v41 = vld [vmem:[%s4424_s0 + $0x90] sm:$0xff]   ;;  %v2922_v42 = vld [vmem:[%s4424_s0 + $0x220] sm:$0xff]  }
   0xe   :  { %v2921_v43 = vld [vmem:[%s4424_s0 + $0x98] sm:$0xff]   ;;  %v2923_v44 = vld [vmem:[%s4424_s0 + $0x228] sm:$0xff]   ;;  %v2924_v45 = vld [vmem:[%s4424_s0 + $0xa0] sm:$0xff]  }
   0xf   :  { %v2926_v46 = vld [vmem:[%s4424_s0 + $0x230] sm:$0xff]   ;;  %v2925_v47 = vld [vmem:[%s4424_s0 + $0xa8] sm:$0xff]   ;;  %v2927_v48 = vld [vmem:[%s4424_s0 + $0x238] sm:$0xff]  }
  0x10   :  { %v2928_v49 = vld [vmem:[%s4424_s0 + $0xb0] sm:$0xff]   ;;  %v2930_v50 = vld [vmem:[%s4424_s0 + $0x240] sm:$0xff]   ;;  %v2929_v51 = vld [vmem:[%s4424_s0 + $0xb8] sm:$0xff]  }
  0x11   :  { %2685 = vmatmul.mubr.msk.bf16.gmra.mrb[4].mxu0 %vm722_vm2, %v2889_v11  ;;  %2785 = vmatmul.mubr.msk.bf16.gmra.mrb[4].mxu1 %vm722_vm2, %v2891_v12  ;;  %v2931_v52 = vld [vmem:[%s4424_s0 + $0x248] sm:$0xff]   ;;  %v2932_v53 = vld [vmem:[%s4424_s0 + $0xc0] sm:$0xff]   ;;  %v2934_v54 = vld [vmem:[%s4424_s0 + $0x250] sm:$0xff]  }
  0x12   :  { %2688 = vmatprep.mubr.msk.bf16.mxu0 %vm722_vm2, %v2892_v13  ;;  %2788 = vmatprep.mubr.msk.bf16.mxu1 %vm722_vm2, %v2894_v14  ;;  %v2933_v55 = vld [vmem:[%s4424_s0 + $0xc8] sm:$0xff]   ;;  %v2935_v56 = vld [vmem:[%s4424_s0 + $0x258] sm:$0xff]   ;;  %v2936_v57 = vld [vmem:[%s4424_s0 + $0xd0] sm:$0xff]  }
  0x13   :  { %v2938_v58 = vld [vmem:[%s4424_s0 + $0x260] sm:$0xff]   ;;  %v2937_v59 = vld [vmem:[%s4424_s0 + $0xd8] sm:$0xff]   ;;  %v2939_v60 = vld [vmem:[%s4424_s0 + $0x268] sm:$0xff]  }
  0x14   :  { %v2940_v61 = vld [vmem:[%s4424_s0 + $0xe0] sm:$0xff]   ;;  %v2942_v62 = vld [vmem:[%s4424_s0 + $0x270] sm:$0xff]   ;;  %v2941_v63 = vld [vmem:[%s4424_s0 + $0xe8] sm:$0xff]  }
  0x15   :  { %v2943_v0 = vld [vmem:[%s4424_s0 + $0x278] sm:$0xff]   ;;  %v2944_v1 = vld [vmem:[%s4424_s0 + $0xf0] sm:$0xff]   ;;  %v2946_v2 = vld [vmem:[%s4424_s0 + $0x280] sm:$0xff]  }
  0x16   :  { %v2945_v3 = vld [vmem:[%s4424_s0 + $0xf8] sm:$0xff]   ;;  %v2947_v4 = vld [vmem:[%s4424_s0 + $0x288] sm:$0xff]   ;;  %v2948_v5 = vld [vmem:[%s4424_s0 + $0x100] sm:$0xff]  }
  0x17   :  { %v2950_v6 = vld [vmem:[%s4424_s0 + $0x290] sm:$0xff]   ;;  %v2949_v7 = vld [vmem:[%s4424_s0 + $0x108] sm:$0xff]   ;;  %v2951_v8 = vld [vmem:[%s4424_s0 + $0x298] sm:$0xff]  }
  0x18   :  { %v2952_v9 = vld [vmem:[%s4424_s0 + $0x110] sm:$0xff]   ;;  %v2954_v10 = vld [vmem:[%s4424_s0 + $0x2a0] sm:$0xff]   ;;  %v2953_v11 = vld [vmem:[%s4424_s0 + $0x118] sm:$0xff]  }
  0x19   :  { %2689 = vmatmul.mubr.msk.bf16.gmra.mrb[8].mxu0 %vm722_vm2, %v2893_v15  ;;  %2789 = vmatmul.mubr.msk.bf16.gmra.mrb[8].mxu1 %vm722_vm2, %v2895_v16  ;;  %v2955_v12 = vld [vmem:[%s4424_s0 + $0x2a8] sm:$0xff]   ;;  %v2956_v13 = vld [vmem:[%s4424_s0 + $0x120] sm:$0xff]   ;;  %v2958_v14 = vld [vmem:[%s4424_s0 + $0x2b0] sm:$0xff]  }
  0x1a   :  { %2692 = vmatprep.mubr.msk.bf16.mxu0 %vm722_vm2, %v2896_v17  ;;  %2792 = vmatprep.mubr.msk.bf16.mxu1 %vm722_vm2, %v2898_v18  ;;  %v2957_v15 = vld [vmem:[%s4424_s0 + $0x128] sm:$0xff]   ;;  %v2959_v16 = vld [vmem:[%s4424_s0 + $0x2b8] sm:$0xff]   ;;  %v2960_v17 = vld [vmem:[%s4424_s0 + $0x130] sm:$0xff]  }
  0x1b   :  { %v2962_v18 = vld [vmem:[%s4424_s0 + $0x2c0] sm:$0xff]  }
  0x21   :  { %2693 = vmatmul.mubr.msk.bf16.gmra.mrb[12].mxu0 %vm722_vm2, %v2897_v19  ;;  %2793 = vmatmul.mubr.msk.bf16.gmra.mrb[12].mxu1 %vm722_vm2, %v2899_v20  ;;  %v2961_v19 = vld [vmem:[%s4424_s0 + $0x138] sm:$0xff]   ;;  %v2963_v20 = vld [vmem:[%s4424_s0 + $0x2c8] sm:$0xff]  }
  0x22   :  { %2696 = vmatprep.mubr.msk.bf16.mxu0 %vm722_vm2, %v2900_v21  ;;  %2796 = vmatprep.mubr.msk.bf16.mxu1 %vm722_vm2, %v2902_v22  ;;  %v2964_v21 = vld [vmem:[%s4424_s0 + $0x140] sm:$0xff]   ;;  %v2966_v22 = vld [vmem:[%s4424_s0 + $0x2d0] sm:$0xff]  }
  0x29   :  { %2697 = vmatmul.mubr.msk.bf16.gmra.mrb[16].mxu0 %vm722_vm2, %v2901_v23  ;;  %2797 = vmatmul.mubr.msk.bf16.gmra.mrb[16].mxu1 %vm722_vm2, %v2903_v24  ;;  %v2965_v23 = vld [vmem:[%s4424_s0 + $0x148] sm:$0xff]   ;;  %v2967_v24 = vld [vmem:[%s4424_s0 + $0x2d8] sm:$0xff]  }
  0x2a   :  { %2700 = vmatprep.mubr.msk.bf16.mxu0 %vm722_vm2, %v2904_v25  ;;  %2800 = vmatprep.mubr.msk.bf16.mxu1 %vm722_vm2, %v2906_v26  ;;  %v2968_v25 = vld [vmem:[%s4424_s0 + $0x150] sm:$0xff]   ;;  %v2970_v26 = vld [vmem:[%s4424_s0 + $0x2e0] sm:$0xff]  }
  0x31   :  { %2701 = vmatmul.mubr.msk.bf16.gmra.mrb[20].mxu0 %vm722_vm2, %v2905_v27  ;;  %2801 = vmatmul.mubr.msk.bf16.gmra.mrb[20].mxu1 %vm722_vm2, %v2907_v28  ;;  %v2969_v27 = vld [vmem:[%s4424_s0 + $0x158] sm:$0xff]   ;;  %v2971_v28 = vld [vmem:[%s4424_s0 + $0x2e8] sm:$0xff]  }
  0x32   :  { %2704 = vmatprep.mubr.msk.bf16.mxu0 %vm722_vm2, %v2908_v29  ;;  %2804 = vmatprep.mubr.msk.bf16.mxu1 %vm722_vm2, %v2910_v30  ;;  %v2972_v29 = vld [vmem:[%s4424_s0 + $0x160] sm:$0xff]   ;;  %v2974_v30 = vld [vmem:[%s4424_s0 + $0x2f0] sm:$0xff]  }
  0x39   :  { %2705 = vmatmul.mubr.msk.bf16.gmra.mrb[24].mxu0 %vm722_vm2, %v2909_v31  ;;  %2805 = vmatmul.mubr.msk.bf16.gmra.mrb[24].mxu1 %vm722_vm2, %v2911_v32  ;;  %v2973_v31 = vld [vmem:[%s4424_s0 + $0x168] sm:$0xff]   ;;  %v2975_v32 = vld [vmem:[%s4424_s0 + $0x2f8] sm:$0xff]  }
  0x3a   :  { %2708 = vmatprep.mubr.msk.bf16.mxu0 %vm722_vm2, %v2912_v33  ;;  %2808 = vmatprep.mubr.msk.bf16.mxu1 %vm722_vm2, %v2914_v34  ;;  %v2976_v33 = vld [vmem:[%s4424_s0 + $0x170] sm:$0xff]   ;;  %v2978_v34 = vld [vmem:[%s4424_s0 + $0x300] sm:$0xff]  }
  0x41   :  { %2709 = vmatmul.mubr.msk.bf16.gmra.mrb[28].mxu0 %vm722_vm2, %v2913_v35  ;;  %2809 = vmatmul.mubr.msk.bf16.gmra.mrb[28].mxu1 %vm722_vm2, %v2915_v36  ;;  %v2977_v35 = vld [vmem:[%s4424_s0 + $0x178] sm:$0xff]   ;;  %v2979_v36 = vld [vmem:[%s4424_s0 + $0x308] sm:$0xff]  }
  0x42   :  { %2712 = vmatprep.mubr.msk.bf16.mxu0 %vm722_vm2, %v2916_v37  ;;  %2812 = vmatprep.mubr.msk.bf16.mxu1 %vm722_vm2, %v2918_v38  ;;  %v2980_v37 = vld [vmem:[%s4424_s0 + $0x180] sm:$0xff]   ;;  %v2982_v38 = vld [vmem:[%s4424_s0 + $0x310] sm:$0xff]  }
  0x49   :  { %2713 = vmatmul.mubr.msk.bf16.gmra.mrb[32].mxu0 %vm722_vm2, %v2917_v39  ;;  %2813 = vmatmul.mubr.msk.bf16.gmra.mrb[32].mxu1 %vm722_vm2, %v2919_v40  ;;  %v2981_v39 = vld [vmem:[%s4424_s0 + $0x188] sm:$0xff]   ;;  %v2983_v40 = vld [vmem:[%s4424_s0 + $0x318] sm:$0xff]  }
  0x4a   :  { %2716 = vmatprep.mubr.msk.bf16.mxu0 %vm722_vm2, %v2920_v41  ;;  %2816 = vmatprep.mubr.msk.bf16.mxu1 %vm722_vm2, %v2922_v42 }
  0x51   :  { %2717 = vmatmul.mubr.msk.bf16.gmra.mrb[36].mxu0 %vm722_vm2, %v2921_v43  ;;  %2817 = vmatmul.mubr.msk.bf16.gmra.mrb[36].mxu1 %vm722_vm2, %v2923_v44 }
  0x52   :  { %2720 = vmatprep.mubr.msk.bf16.mxu0 %vm722_vm2, %v2924_v45  ;;  %2820 = vmatprep.mubr.msk.bf16.mxu1 %vm722_vm2, %v2926_v46 }
  0x59   :  { %2721 = vmatmul.mubr.msk.bf16.gmra.mrb[40].mxu0 %vm722_vm2, %v2925_v47  ;;  %2821 = vmatmul.mubr.msk.bf16.gmra.mrb[40].mxu1 %vm722_vm2, %v2927_v48 }
  0x5a   :  { %2724 = vmatprep.mubr.msk.bf16.mxu0 %vm722_vm2, %v2928_v49  ;;  %2824 = vmatprep.mubr.msk.bf16.mxu1 %vm722_vm2, %v2930_v50 }
  0x61   :  { %2725 = vmatmul.mubr.msk.bf16.gmra.mrb[44].mxu0 %vm722_vm2, %v2929_v51  ;;  %2825 = vmatmul.mubr.msk.bf16.gmra.mrb[44].mxu1 %vm722_vm2, %v2931_v52 }
  0x62   :  { %2728 = vmatprep.mubr.msk.bf16.mxu0 %vm722_vm2, %v2932_v53  ;;  %2828 = vmatprep.mubr.msk.bf16.mxu1 %vm722_vm2, %v2934_v54 }
  0x69   :  { %2729 = vmatmul.mubr.msk.bf16.gmra.mrb[48].mxu0 %vm722_vm2, %v2933_v55  ;;  %2829 = vmatmul.mubr.msk.bf16.gmra.mrb[48].mxu1 %vm722_vm2, %v2935_v56 }
  0x6a   :  { %2732 = vmatprep.mubr.msk.bf16.mxu0 %vm722_vm2, %v2936_v57  ;;  %2832 = vmatprep.mubr.msk.bf16.mxu1 %vm722_vm2, %v2938_v58 }
  0x71   :  { %2733 = vmatmul.mubr.msk.bf16.gmra.mrb[52].mxu0 %vm722_vm2, %v2937_v59  ;;  %2833 = vmatmul.mubr.msk.bf16.gmra.mrb[52].mxu1 %vm722_vm2, %v2939_v60 }
  0x72   :  { %2736 = vmatprep.mubr.msk.bf16.mxu0 %vm722_vm2, %v2940_v61  ;;  %2836 = vmatprep.mubr.msk.bf16.mxu1 %vm722_vm2, %v2942_v62 }
  0x79   :  { %2737 = vmatmul.mubr.msk.bf16.gmra.mrb[56].mxu0 %vm722_vm2, %v2941_v63  ;;  %2837 = vmatmul.mubr.msk.bf16.gmra.mrb[56].mxu1 %vm722_vm2, %v2943_v0 }
  0x7a   :  { %2740 = vmatprep.mubr.msk.bf16.mxu0 %vm722_vm2, %v2944_v1  ;;  %2840 = vmatprep.mubr.msk.bf16.mxu1 %vm722_vm2, %v2946_v2 }
  0x81   :  { %2741 = vmatmul.mubr.msk.bf16.gmra.mrb[60].mxu0 %vm722_vm2, %v2945_v3  ;;  %2841 = vmatmul.mubr.msk.bf16.gmra.mrb[60].mxu1 %vm722_vm2, %v2947_v4 }
  0x82   :  { %2744 = vmatprep.mubr.msk.bf16.mxu0 %vm722_vm2, %v2948_v5  ;;  %2844 = vmatprep.mubr.msk.bf16.mxu1 %vm722_vm2, %v2950_v6 }
  0x89   :  { %2745 = vmatmul.mubr.msk.bf16.gmra.mrb[64].mxu0 %vm722_vm2, %v2949_v7  ;;  %2845 = vmatmul.mubr.msk.bf16.gmra.mrb[64].mxu1 %vm722_vm2, %v2951_v8 }
  0x8a   :  { %2748 = vmatprep.mubr.msk.bf16.mxu0 %vm722_vm2, %v2952_v9  ;;  %2848 = vmatprep.mubr.msk.bf16.mxu1 %vm722_vm2, %v2954_v10 }
  0x91   :  { %2749 = vmatmul.mubr.msk.bf16.gmra.mrb[68].mxu0 %vm722_vm2, %v2953_v11  ;;  %2849 = vmatmul.mubr.msk.bf16.gmra.mrb[68].mxu1 %vm722_vm2, %v2955_v12 }
  0x92   :  { %2752 = vmatprep.mubr.msk.bf16.mxu0 %vm722_vm2, %v2956_v13  ;;  %2852 = vmatprep.mubr.msk.bf16.mxu1 %vm722_vm2, %v2958_v14 }
  0x99   :  { %2753 = vmatmul.mubr.msk.bf16.gmra.mrb[72].mxu0 %vm722_vm2, %v2957_v15  ;;  %2853 = vmatmul.mubr.msk.bf16.gmra.mrb[72].mxu1 %vm722_vm2, %v2959_v16 }
  0x9a   :  { %2756 = vmatprep.mubr.msk.bf16.mxu0 %vm722_vm2, %v2960_v17  ;;  %2856 = vmatprep.mubr.msk.bf16.mxu1 %vm722_vm2, %v2962_v18 }
  0xa1   :  { %2757 = vmatmul.mubr.msk.bf16.gmra.mrb[76].mxu0 %vm722_vm2, %v2961_v19  ;;  %2857 = vmatmul.mubr.msk.bf16.gmra.mrb[76].mxu1 %vm722_vm2, %v2963_v20 }
  0xa2   :  { %2760 = vmatprep.mubr.msk.bf16.mxu0 %vm722_vm2, %v2964_v21  ;;  %2860 = vmatprep.mubr.msk.bf16.mxu1 %vm722_vm2, %v2966_v22 }
  0xa9   :  { %2761 = vmatmul.mubr.msk.bf16.gmra.mrb[80].mxu0 %vm722_vm2, %v2965_v23  ;;  %2861 = vmatmul.mubr.msk.bf16.gmra.mrb[80].mxu1 %vm722_vm2, %v2967_v24 }
  0xaa   :  { %2764 = vmatprep.mubr.msk.bf16.mxu0 %vm722_vm2, %v2968_v25  ;;  %2864 = vmatprep.mubr.msk.bf16.mxu1 %vm722_vm2, %v2970_v26 }
  0xb1   :  { %2765 = vmatmul.mubr.msk.bf16.gmra.mrb[84].mxu0 %vm722_vm2, %v2969_v27  ;;  %2865 = vmatmul.mubr.msk.bf16.gmra.mrb[84].mxu1 %vm722_vm2, %v2971_v28 }
  0xb2   :  { %2768 = vmatprep.mubr.msk.bf16.mxu0 %vm722_vm2, %v2972_v29  ;;  %2868 = vmatprep.mubr.msk.bf16.mxu1 %vm722_vm2, %v2974_v30 }
  0xb9   :  { %2769 = vmatmul.mubr.msk.bf16.gmra.mrb[88].mxu0 %vm722_vm2, %v2973_v31  ;;  %2869 = vmatmul.mubr.msk.bf16.gmra.mrb[88].mxu1 %vm722_vm2, %v2975_v32 }
  0xba   :  { %2772 = vmatprep.mubr.msk.bf16.mxu0 %vm722_vm2, %v2976_v33  ;;  %2872 = vmatprep.mubr.msk.bf16.mxu1 %vm722_vm2, %v2978_v34 }
  0xc1   :  { %2773 = vmatmul.mubr.msk.bf16.gmra.mrb[92].mxu0 %vm722_vm2, %v2977_v35  ;;  %2873 = vmatmul.mubr.msk.bf16.gmra.mrb[92].mxu1 %vm722_vm2, %v2979_v36 }
  0xc2   :  { %2776 = vmatprep.mubr.msk.bf16.mxu0 %vm722_vm2, %v2980_v37  ;;  %2876 = vmatprep.mubr.msk.bf16.mxu1 %vm722_vm2, %v2982_v38 }
  0xc9   :  { %2777 = vmatmul.mubr.msk.bf16.gmra.mrb[96].mxu0 %vm722_vm2, %v2981_v39  ;;  %2877 = vmatmul.mubr.msk.bf16.gmra.mrb[96].mxu1 %vm722_vm2, %v2983_v40 }
  0xdc   :  { %v3409_v41 = vpop.f32.mrb[0].mxu0  ;;  %v3411_v42 = vpop.f32.mrb[0].mxu1 }
  0xdd   :  { %v3413_v43 = vpop.f32.mrb[1].mxu0  ;;  %v3415_v44 = vpop.f32.mrb[1].mxu1 }
  0xde   :  { %v3417_v45 = vpop.f32.mrb[2].mxu0  ;;  %v3419_v46 = vpop.f32.mrb[2].mxu1 }
  0xdf   :  { %v3421_v47 = vpop.f32.mrb[3].mxu0  ;;  %v3423_v48 = vpop.f32.mrb[3].mxu1 }
  0xe4   :  { %v3425_v49 = vpop.f32.mrb[4].mxu0  ;;  %v3427_v50 = vpop.f32.mrb[4].mxu1 }
  0xe5   :  { %v3429_v51 = vpop.f32.mrb[5].mxu0  ;;  %v3431_v52 = vpop.f32.mrb[5].mxu1 }
  0xe6   :  { %v3433_v53 = vpop.f32.mrb[6].mxu0  ;;  %v3435_v54 = vpop.f32.mrb[6].mxu1 }
  0xe7   :  { %v3437_v55 = vpop.f32.mrb[7].mxu0  ;;  %v3439_v56 = vpop.f32.mrb[7].mxu1 }
  0xec   :  { %v3441_v57 = vpop.f32.mrb[8].mxu0  ;;  %v3443_v58 = vpop.f32.mrb[8].mxu1 }
  0xed   :  { %v3445_v59 = vpop.f32.mrb[9].mxu0  ;;  %v3447_v60 = vpop.f32.mrb[9].mxu1 }
  0xee   :  { %v3449_v61 = vpop.f32.mrb[10].mxu0  ;;  %v3451_v62 = vpop.f32.mrb[10].mxu1 }
  0xef   :  { %v3453_v63 = vpop.f32.mrb[11].mxu0  ;;  %v3455_v0 = vpop.f32.mrb[11].mxu1 }
  0xf4   :  { %v3457_v1 = vpop.f32.mrb[12].mxu0  ;;  %v3459_v2 = vpop.f32.mrb[12].mxu1 }
  0xf5   :  { %v3461_v3 = vpop.f32.mrb[13].mxu0  ;;  %v3463_v4 = vpop.f32.mrb[13].mxu1 }
  0xf6   :  { %v3465_v5 = vpop.f32.mrb[14].mxu0  ;;  %v3467_v6 = vpop.f32.mrb[14].mxu1 }
  0xf7   :  { %v3469_v7 = vpop.f32.mrb[15].mxu0  ;;  %v3471_v8 = vpop.f32.mrb[15].mxu1 }
  0xfc   :  { %v3473_v9 = vpop.f32.mrb[16].mxu0  ;;  %v3475_v10 = vpop.f32.mrb[16].mxu1 }
  0xfd   :  { %v3477_v11 = vpop.f32.mrb[17].mxu0  ;;  %v3479_v12 = vpop.f32.mrb[17].mxu1 }
  0xfe   :  { %v3481_v13 = vpop.f32.mrb[18].mxu0  ;;  %v3483_v14 = vpop.f32.mrb[18].mxu1 }
  0xff   :  { %v3485_v15 = vpop.f32.mrb[19].mxu0  ;;  %v3487_v16 = vpop.f32.mrb[19].mxu1 }
 0x104   :  { %v3489_v17 = vpop.f32.mrb[20].mxu0  ;;  %v3491_v18 = vpop.f32.mrb[20].mxu1 }
 0x105   :  { %v3493_v19 = vpop.f32.mrb[21].mxu0  ;;  %v3495_v20 = vpop.f32.mrb[21].mxu1 }
 0x106   :  { %v3497_v21 = vpop.f32.mrb[22].mxu0  ;;  %v3499_v22 = vpop.f32.mrb[22].mxu1 }
 0x107   :  { %v3501_v23 = vpop.f32.mrb[23].mxu0  ;;  %v3503_v24 = vpop.f32.mrb[23].mxu1 }
 0x10c   :  { %v3505_v25 = vpop.f32.mrb[24].mxu0  ;;  %v3507_v26 = vpop.f32.mrb[24].mxu1 }
 0x10d   :  { %v3509_v27 = vpop.f32.mrb[25].mxu0  ;;  %v3511_v28 = vpop.f32.mrb[25].mxu1 }
 0x10e   :  { %v3513_v29 = vpop.f32.mrb[26].mxu0  ;;  %v3515_v30 = vpop.f32.mrb[26].mxu1 }
 0x10f   :  { %4427 = vst [vmem:[#allocation2_spill] sm:$0xff] %v3515_v30  ;;  %v3517_v31 = vpop.f32.mrb[27].mxu0  ;;  %v3519_v32 = vpop.f32.mrb[27].mxu1 }
 0x110   :  { %4428 = vst [vmem:[#allocation3_spill] sm:$0xff] %v3517_v31  ;;  %4429 = vst [vmem:[#allocation4_spill] sm:$0xff] %v3519_v32 }
 0x114   :  { %v3521_v33 = vpop.f32.mrb[28].mxu0  ;;  %v3523_v34 = vpop.f32.mrb[28].mxu1 }
 0x115   :  { %4430 = vst [vmem:[#allocation5_spill] sm:$0xff] %v3521_v33  ;;  %4431 = vst [vmem:[#allocation6_spill] sm:$0xff] %v3523_v34  ;;  %v3525_v35 = vpop.f32.mrb[29].mxu0  ;;  %v3527_v36 = vpop.f32.mrb[29].mxu1 }
 0x116   :  { %4432 = vst [vmem:[#allocation7_spill] sm:$0xff] %v3525_v35  ;;  %4433 = vst [vmem:[#allocation8_spill] sm:$0xff] %v3527_v36  ;;  %v3529_v37 = vpop.f32.mrb[30].mxu0  ;;  %v3531_v38 = vpop.f32.mrb[30].mxu1 }
 0x117   :  { %4434 = vst [vmem:[#allocation9_spill] sm:$0xff] %v3529_v37  ;;  %4435 = vst [vmem:[#allocation10_spill] sm:$0xff] %v3531_v38  ;;  %v3533_v39 = vpop.f32.mrb[31].mxu0  ;;  %v3535_v40 = vpop.f32.mrb[31].mxu1 }
 0x118   :  { %4436 = vst [vmem:[#allocation11_spill] sm:$0xff] %v3533_v39  ;;  %4437 = vst [vmem:[#allocation12_spill] sm:$0xff] %v3535_v40 }
 0x11c   :  { %v3537_v30 = vpop.f32.mrb[32].mxu0  ;;  %v3539_v31 = vpop.f32.mrb[32].mxu1 }
 0x11d   :  { %4438 = vst [vmem:[#allocation13_spill] sm:$0xff] %v3537_v30  ;;  %4439 = vst [vmem:[#allocation14_spill] sm:$0xff] %v3539_v31  ;;  %v3541_v32 = vpop.f32.mrb[33].mxu0  ;;  %v3543_v33 = vpop.f32.mrb[33].mxu1 }
 0x11e   :  { %4440 = vst [vmem:[#allocation15_spill] sm:$0xff] %v3541_v32  ;;  %4441 = vst [vmem:[#allocation16_spill] sm:$0xff] %v3543_v33  ;;  %v3545_v34 = vpop.f32.mrb[34].mxu0  ;;  %v3547_v35 = vpop.f32.mrb[34].mxu1 }
 0x11f   :  { %4442 = vst [vmem:[#allocation17_spill] sm:$0xff] %v3545_v34  ;;  %4443 = vst [vmem:[#allocation18_spill] sm:$0xff] %v3547_v35  ;;  %v3549_v36 = vpop.f32.mrb[35].mxu0  ;;  %v3551_v37 = vpop.f32.mrb[35].mxu1 }
 0x120   :  { %4444 = vst [vmem:[#allocation19_spill] sm:$0xff] %v3549_v36  ;;  %4445 = vst [vmem:[#allocation20_spill] sm:$0xff] %v3551_v37 }
 0x124   :  { %v3553_v38 = vpop.f32.mrb[36].mxu0  ;;  %v3555_v39 = vpop.f32.mrb[36].mxu1 }
 0x125   :  { %4446 = vst [vmem:[#allocation21_spill] sm:$0xff] %v3553_v38  ;;  %4447 = vst [vmem:[#allocation22_spill] sm:$0xff] %v3555_v39  ;;  %v3557_v40 = vpop.f32.mrb[37].mxu0  ;;  %v3559_v30 = vpop.f32.mrb[37].mxu1 }
 0x126   :  { %4448 = vst [vmem:[#allocation23_spill] sm:$0xff] %v3557_v40  ;;  %4449 = vst [vmem:[#allocation24_spill] sm:$0xff] %v3559_v30  ;;  %v3561_v31 = vpop.f32.mrb[38].mxu0  ;;  %v3563_v32 = vpop.f32.mrb[38].mxu1 }
 0x127   :  { %4450 = vst [vmem:[#allocation25_spill] sm:$0xff] %v3561_v31  ;;  %4451 = vst [vmem:[#allocation26_spill] sm:$0xff] %v3563_v32  ;;  %v3565_v33 = vpop.f32.mrb[39].mxu0  ;;  %v3567_v34 = vpop.f32.mrb[39].mxu1 }
 0x128   :  { %4452 = vst [vmem:[#allocation27_spill] sm:$0xff] %v3565_v33  ;;  %4453 = vst [vmem:[#allocation28_spill] sm:$0xff] %v3567_v34 }
 0x12c   :  { %v3569_v35 = vpop.f32.mrb[40].mxu0  ;;  %v3571_v36 = vpop.f32.mrb[40].mxu1 }
 0x12d   :  { %4454 = vst [vmem:[#allocation29_spill] sm:$0xff] %v3569_v35  ;;  %4455 = vst [vmem:[#allocation30_spill] sm:$0xff] %v3571_v36  ;;  %v3573_v37 = vpop.f32.mrb[41].mxu0  ;;  %v3575_v38 = vpop.f32.mrb[41].mxu1 }
 0x12e   :  { %4456 = vst [vmem:[#allocation31_spill] sm:$0xff] %v3573_v37  ;;  %4457 = vst [vmem:[#allocation32_spill] sm:$0xff] %v3575_v38  ;;  %v3577_v39 = vpop.f32.mrb[42].mxu0  ;;  %v3579_v40 = vpop.f32.mrb[42].mxu1  ;;  %v3595_v38 = vsel %vm1863_vm3, %v3409_v41, -inf  ;;  %v3615_v41 = vsel %vm1863_vm3, %v3419_v46, -inf }
 0x12f   :  { %4458 = vst [vmem:[#allocation33_spill] sm:$0xff] %v3577_v39  ;;  %4459 = vst [vmem:[#allocation34_spill] sm:$0xff] %v3579_v40  ;;  %v3581_v30 = vpop.f32.mrb[43].mxu0  ;;  %v3583_v31 = vpop.f32.mrb[43].mxu1  ;;  %v3599_v40 = vsel %vm1863_vm3, %v3411_v42, -inf  ;;  %v3635_v46 = vsel %vm1863_vm3, %v3429_v51, -inf }
 0x130   :  { %4460 = vst [vmem:[#allocation35_spill] sm:$0xff] %v3581_v30  ;;  %4461 = vst [vmem:[#allocation36_spill] sm:$0xff] %v3583_v31  ;;  %v3659_v51 = vsel %vm1863_vm3, %v3441_v57, -inf  ;;  %v3683_v57 = vsel %vm1863_vm3, %v3453_v63, -inf  ;;  %v3703_v63 = vsel %vm1863_vm3, %v3465_v5, -inf  ;;  %v3716_v39 = vsel %vm1863_vm3, %v3469_v7, -inf }
 0x131   :  { %v3724_v5 = vsel %vm1863_vm3, %v3471_v8, -inf  ;;  %v3742_v8 = vsel %vm1863_vm3, %v3477_v11, -inf  ;;  %v3762_v11 = vsel %vm1863_vm3, %v3487_v16, -inf  ;;  %v3783_v16 = vsel %vm1863_vm3, %v3497_v21, -inf }
 0x134   :  { %v3585_v33 = vpop.f32.mrb[44].mxu0  ;;  %v3587_v34 = vpop.f32.mrb[44].mxu1 }
 0x135   :  { %4462 = vst [vmem:[#allocation37_spill] sm:$0xff] %v3585_v33  ;;  %4463 = vst [vmem:[#allocation38_spill] sm:$0xff] %v3587_v34  ;;  %v3589_v35 = vpop.f32.mrb[45].mxu0  ;;  %v3591_v36 = vpop.f32.mrb[45].mxu1  ;;  %v1864_v33 = vsel %vm1863_vm3, %v3413_v43, -inf  ;;  %v1874_v43 = vsel %vm1863_vm3, %v3423_v48, -inf }
 0x136   :  { %4464 = vst [vmem:[#allocation39_spill] sm:$0xff] %v3589_v35  ;;  %4465 = vst [vmem:[#allocation40_spill] sm:$0xff] %v3591_v36  ;;  %v3601_v30 = vpop.f32.mrb[46].mxu0  ;;  %v3603_v31 = vpop.f32.mrb[46].mxu1  ;;  %v3609_v35 = vsel %vm1863_vm3, %v3417_v45, -inf  ;;  %v1867_v36 = vsel %vm1863_vm3, %v3415_v44, -inf }
 0x137   :  { %4466 = vst [vmem:[#allocation41_spill] sm:$0xff] %v3601_v30  ;;  %4467 = vst [vmem:[#allocation42_spill] sm:$0xff] %v3603_v31  ;;  %v3617_v42 = vpop.f32.mrb[47].mxu0  ;;  %v3619_v34 = vpop.f32.mrb[47].mxu1  ;;  %v1871_v31 = vsel %vm1863_vm3, %v3421_v47, -inf  ;;  %v3627_v45 = vsel %vm1863_vm3, %v3425_v49, -inf }
 0x138   :  { %4468 = vst [vmem:[#allocation43_spill] sm:$0xff] %v3617_v42  ;;  %4469 = vst [vmem:[#allocation44_spill] sm:$0xff] %v3619_v34  ;;  %v3631_v44 = vsel %vm1863_vm3, %v3427_v50, -inf  ;;  %v3639_v34 = vsel %vm1863_vm3, %v3433_v53, -inf  ;;  %v3643_v47 = vsel %vm1863_vm3, %v3431_v52, -inf  ;;  %v3647_v48 = vsel %vm1863_vm3, %v3435_v54, -inf }
 0x139   :  { %v3651_v49 = vsel %vm1863_vm3, %v3437_v55, -inf  ;;  %v3655_v50 = vsel %vm1863_vm3, %v3439_v56, -inf  ;;  %v3663_v52 = vsel %vm1863_vm3, %v3443_v58, -inf  ;;  %v3667_v53 = vsel %vm1863_vm3, %v3445_v59, -inf }
 0x13a   :  { %v3671_v54 = vsel %vm1863_vm3, %v3449_v61, -inf  ;;  %v3675_v55 = vsel %vm1863_vm3, %v3447_v60, -inf  ;;  %v3679_v56 = vsel %vm1863_vm3, %v3451_v62, -inf  ;;  %v3687_v58 = vsel %vm1863_vm3, %v3455_v0, -inf }
 0x13b   :  { %v3691_v59 = vsel %vm1863_vm3, %v3457_v1, -inf  ;;  %v3695_v60 = vsel %vm1863_vm3, %v3459_v2, -inf  ;;  %v3699_v62 = vsel %vm1863_vm3, %v3461_v3, -inf  ;;  %v3707_v0 = vsel %vm1863_vm3, %v3463_v4, -inf }
 0x13c   :  { %v2730_v61 = vpop.f32.mrb[48].mxu0  ;;  %v2830_v42 = vpop.f32.mrb[48].mxu1  ;;  %v3720_v3 = vsel %vm1863_vm3, %v3467_v6, -inf }
 0x13d   :  { %v1865_v1 = vsel %vm1863_vm3, %v2730_v61, -inf  ;;  %v3710_v30 = vpop.f32.mrb[49].mxu0  ;;  %v3712_v2 = vpop.f32.mrb[49].mxu1  ;;  %4472 = vst [vmem:[#allocation47_spill] sm:$0xff] %v3720_v3  ;;  %v3728_v61 = vsel %vm1863_vm3, %v3473_v9, -inf  ;;  %v1869_v7 = vsel %vm1863_vm3, %v2830_v42, -inf }
 0x13e   :  { %4470 = vst [vmem:[#allocation45_spill] sm:$0xff] %v3710_v30  ;;  %4471 = vst [vmem:[#allocation46_spill] sm:$0xff] %v3712_v2  ;;  %v1866_v4 = vmax.f32 %v1864_v33, %v1865_v1  ;;  %v2731_v37 = vpop.f32.mrb[50].mxu0  ;;  %v2831_v32 = vpop.f32.mrb[50].mxu1  ;;  %v3732_v2 = vsel %vm1863_vm3, %v3475_v10, -inf  ;;  %v3746_v9 = vsel %vm1863_vm3, %v3479_v12, -inf }
 0x13f   :  { %v1872_v6 = vsel %vm1863_vm3, %v2731_v37, -inf  ;;  %v3736_v30 = vpop.f32.mrb[51].mxu0  ;;  %v3738_v3 = vpop.f32.mrb[51].mxu1  ;;  %v3750_v10 = vsel %vm1863_vm3, %v3481_v13, -inf  ;;  %v3754_v37 = vsel %vm1863_vm3, %v3485_v15, -inf  ;;  %v3758_v42 = vsel %vm1863_vm3, %v3483_v14, -inf }
 0x140   :  { %4473 = vst [vmem:[#allocation48_spill] sm:$0xff] %v3736_v30  ;;  %4474 = vst [vmem:[#allocation49_spill] sm:$0xff] %v3738_v3  ;;  %v1868_v33 = vmax.f32 %v1866_v4, %v1867_v36  ;;  %v1873_v1 = vmax.f32 %v1871_v31, %v1872_v6  ;;  %v3767_v12 = vld [vmem:[%s4425_s2] ss:$0 sm:$0xff]  ;;  %v3771_v13 = vsel %vm1863_vm3, %v3489_v17, -inf  ;;  %v3775_v15 = vsel %vm1863_vm3, %v3491_v18, -inf }
 0x141   :  { %v3779_v36 = vsel %vm1863_vm3, %v3493_v19, -inf  ;;  %v3787_v4 = vsel %vm1863_vm3, %v3495_v20, -inf  ;;  %v1876_v17 = vsel %vm1863_vm3, %v2831_v32, -inf  ;;  %v3792_v18 = vsel %vm1863_vm3, %v3501_v23, -inf }
 0x142   :  { %v1870_v31 = vmax.f32 %v1868_v33, %v1869_v7  ;;  %v1875_v14 = vmax.f32 %v1873_v1, %v1874_v43  ;;  %v3796_v43 = vsel %vm1863_vm3, %v3499_v22, -inf  ;;  %v3801_v33 = vsel %vm1863_vm3, %v3503_v24, -inf }
 0x143   :  { %4475 = vst [vmem:[#allocation50_spill] sm:$0xff] %v3796_v43  ;;  %v3805_v20 = vsel %vm1863_vm3, %v3505_v25, -inf  ;;  %v3809_v23 = vsel %vm1863_vm3, %v3507_v26, -inf }
 0x144   :  { %v2221_v19 = vadd.f32 %v3767_v12, %v1870_v31  ;;  %v1877_v7 = vmax.f32 %v1875_v14, %v1876_v17  ;;  %v2734_v6 = vpop.f32.mrb[52].mxu0  ;;  %v2834_v21 = vpop.f32.mrb[52].mxu1  ;;  %4476 = vst [vmem:[#allocation51_spill] sm:$0xff] %v3805_v20  ;;  %4477 = vst [vmem:[#allocation52_spill] sm:$0xff] %v3809_v23 }
 0x145   :  { %v1893_v22 = vsel %vm1863_vm3, %v2734_v6, -inf  ;;  %v1272_v32 = vpop.f32.mrb[53].mxu0  ;;  %v1672_v1 = vpop.f32.mrb[53].mxu1  ;;  %v1897_v20 = vsel %vm1863_vm3, %v2834_v21, -inf  ;;  %v3828_v21 = vsel %vm1863_vm3, %v3509_v27, -inf }
 0x146   :  { %v2271_v31 = vmax.f32 %v2221_v19, 0.0  ;;  %v2222_v14 = vadd.f32 %v3767_v12, %v1877_v7  ;;  %v1894_v17 = vmax.f32 %v3635_v46, %v1893_v22  ;;  %v1879_v24 = vsel %vm1863_vm3, %v1272_v32, -inf  ;;  %v2735_v3 = vpop.f32.mrb[54].mxu0  ;;  %v2835_v30 = vpop.f32.mrb[54].mxu1 }
 0x147   :  { %v1880_v25 = vmax.f32 %v3595_v38, %v1879_v24  ;;  %v1900_v26 = vsel %vm1863_vm3, %v2735_v3, -inf  ;;  %v1883_v23 = vsel %vm1863_vm3, %v1672_v1, -inf  ;;  %v1275_v6 = vpop.f32.mrb[55].mxu0  ;;  %v1675_v43 = vpop.f32.mrb[55].mxu1  ;;  %v3832_v3 = vsel %vm1863_vm3, %v3511_v28, -inf }
 0x148   :  { %2321 = vst.msk [vmem:[%s4426_s3] sm:$0xff] %vm1863_vm3, %v2271_v31  ;;  %v2272_v46 = vmax.f32 %v2222_v14, 0.0  ;;  %v1896_v19 = vmax.f32 %v1894_v17, %v3643_v47  ;;  %v1901_v7 = vmax.f32 %v3651_v49, %v1900_v26  ;;  %v1886_v38 = vsel %vm1863_vm3, %v1275_v6, -inf  ;;  %v4478_v47 = vld [vmem:[#allocation2_spill] sm:$0xff]  ;;  %v4479_v31 = vld [vmem:[#allocation3_spill] sm:$0xff]  ;;  %v4480_v17 = vld [vmem:[#allocation4_spill] sm:$0xff] }
 0x149   :  { %v1882_v22 = vmax.f32 %v1880_v25, %v3599_v40  ;;  %v1887_v32 = vmax.f32 %v3609_v35, %v1886_v38  ;;  %v3838_v1 = vsel %vm1863_vm3, %v3513_v29, -inf  ;;  %v3842_v49 = vsel %vm1863_vm3, %v4478_v47, -inf }
 0x14a   :  { %2322 = vst.msk [vmem:[%s4426_s3 + $0x8] sm:$0xff] %vm1863_vm3, %v2272_v46  ;;  %v1898_v27 = vmax.f32 %v1896_v19, %v1897_v20  ;;  %v1903_v28 = vmax.f32 %v1901_v7, %v3655_v50  ;;  %v3851_v40 = vsel %vm1863_vm3, %v4479_v31, -inf  ;;  %v1904_v29 = vsel %vm1863_vm3, %v2835_v30, -inf }
 0x14b   :  { %v1884_v35 = vmax.f32 %v1882_v22, %v1883_v23  ;;  %v1889_v14 = vmax.f32 %v1887_v32, %v3615_v41  ;;  %v3857_v24 = vsel %vm1863_vm3, %v4480_v17, -inf  ;;  %v1890_v20 = vsel %vm1863_vm3, %v1675_v43, -inf }
 0x14c   :  { %v2225_v25 = vadd.f32 %v3767_v12, %v1898_v27  ;;  %v1905_v26 = vmax.f32 %v1903_v28, %v1904_v29  ;;  %v2738_v6 = vpop.f32.mrb[56].mxu0  ;;  %v2838_v50 = vpop.f32.mrb[56].mxu1 }
 0x14d   :  { %v2223_v46 = vadd.f32 %v3767_v12, %v1884_v35  ;;  %v1891_v19 = vmax.f32 %v1889_v14, %v1890_v20  ;;  %v1921_v23 = vsel %vm1863_vm3, %v2738_v6, -inf  ;;  %v1288_v7 = vpop.f32.mrb[57].mxu0  ;;  %v1925_v30 = vsel %vm1863_vm3, %v2838_v50, -inf  ;;  %v1688_v41 = vpop.f32.mrb[57].mxu1  ;;  %v4481_v6 = vld [vmem:[#allocation5_spill] sm:$0xff] }
 0x14e   :  { %v2275_v38 = vmax.f32 %v2225_v25, 0.0  ;;  %v2226_v22 = vadd.f32 %v3767_v12, %v1905_v26  ;;  %v1922_v32 = vmax.f32 %v3667_v53, %v1921_v23  ;;  %v1907_v47 = vsel %vm1863_vm3, %v1288_v7, -inf  ;;  %v2739_v27 = vpop.f32.mrb[58].mxu0  ;;  %v2839_v43 = vpop.f32.mrb[58].mxu1  ;;  %v4482_v23 = vld [vmem:[#allocation6_spill] sm:$0xff] }
 0x14f   :  { %v2273_v28 = vmax.f32 %v2223_v46, 0.0  ;;  %v2224_v31 = vadd.f32 %v3767_v12, %v1891_v19  ;;  %v1908_v35 = vmax.f32 %v3627_v45, %v1907_v47  ;;  %v1928_v29 = vsel %vm1863_vm3, %v2739_v27, -inf  ;;  %v1291_v14 = vpop.f32.mrb[59].mxu0  ;;  %v1691_v17 = vpop.f32.mrb[59].mxu1  ;;  %v4485_v27 = vld [vmem:[#allocation9_spill] sm:$0xff] }
 0x150   :  { %2325 = vst.msk [vmem:[%s4426_s3 + $0x20] sm:$0xff] %vm1863_vm3, %v2275_v38  ;;  %v2276_v25 = vmax.f32 %v2226_v22, 0.0  ;;  %v1924_v53 = vmax.f32 %v1922_v32, %v3675_v55  ;;  %v1929_v26 = vmax.f32 %v3683_v57, %v1928_v29  ;;  %v1911_v20 = vsel %vm1863_vm3, %v1688_v41, -inf  ;;  %v4483_v38 = vld [vmem:[#allocation7_spill] sm:$0xff] }
 0x151   :  { %v3879_v50 = vsel %vm1863_vm3, %v4481_v6, -inf  ;;  %2323 = vst.msk [vmem:[%s4426_s3 + $0x10] sm:$0xff] %vm1863_vm3, %v2273_v28  ;;  %v2274_v45 = vmax.f32 %v2224_v31, 0.0  ;;  %v1910_v46 = vmax.f32 %v1908_v35, %v3631_v44  ;;  %v1914_v19 = vsel %vm1863_vm3, %v1291_v14, -inf  ;;  %v4484_v44 = vld [vmem:[#allocation8_spill] sm:$0xff]  ;;  %v4486_v14 = vld [vmem:[#allocation10_spill] sm:$0xff] }
 0x152   :  { %v3889_v55 = vsel %vm1863_vm3, %v4482_v23, -inf  ;;  %2326 = vst.msk [vmem:[%s4426_s3 + $0x28] sm:$0xff] %vm1863_vm3, %v2276_v25  ;;  %v1926_v57 = vmax.f32 %v1924_v53, %v1925_v30  ;;  %v1915_v7 = vmax.f32 %v3639_v34, %v1914_v19  ;;  %v1931_v41 = vmax.f32 %v1929_v26, %v3687_v58 }
 0x153   :  { %v3899_v22 = vsel %vm1863_vm3, %v4483_v38, -inf  ;;  %v3903_v32 = vsel %vm1863_vm3, %v4484_v44, -inf  ;;  %2324 = vst.msk [vmem:[%s4426_s3 + $0x18] sm:$0xff] %vm1863_vm3, %v2274_v45  ;;  %v1912_v47 = vmax.f32 %v1910_v46, %v1911_v20  ;;  %v1932_v30 = vsel %vm1863_vm3, %v2839_v43, -inf }
 0x154   :  { %v3912_v34 = vsel %vm1863_vm3, %v4485_v27, -inf  ;;  %v2229_v58 = vadd.f32 %v3767_v12, %v1926_v57  ;;  %v1933_v28 = vmax.f32 %v1931_v41, %v1932_v30  ;;  %v1917_v31 = vmax.f32 %v1915_v7, %v3647_v48  ;;  %v2742_v35 = vpop.f32.mrb[60].mxu0  ;;  %v2842_v29 = vpop.f32.mrb[60].mxu1 }
 0x155   :  { %v3918_v25 = vsel %vm1863_vm3, %v4486_v14, -inf  ;;  %v2227_v53 = vadd.f32 %v3767_v12, %v1912_v47  ;;  %v1918_v26 = vsel %vm1863_vm3, %v1691_v17, -inf  ;;  %v1949_v43 = vsel %vm1863_vm3, %v2742_v35, -inf  ;;  %v1304_v20 = vpop.f32.mrb[61].mxu0  ;;  %v1704_v6 = vpop.f32.mrb[61].mxu1 }
 0x156   :  { %v2279_v45 = vmax.f32 %v2229_v58, 0.0  ;;  %v2230_v46 = vadd.f32 %v3767_v12, %v1933_v28  ;;  %v1919_v19 = vmax.f32 %v1917_v31, %v1918_v26  ;;  %v1950_v48 = vmax.f32 %v3699_v62, %v1949_v43  ;;  %v2743_v23 = vpop.f32.mrb[62].mxu0  ;;  %v2843_v57 = vpop.f32.mrb[62].mxu1  ;;  %v4487_v28 = vld [vmem:[#allocation11_spill] sm:$0xff]  ;;  %v4488_v43 = vld [vmem:[#allocation12_spill] sm:$0xff] }
 0x157   :  { %v2277_v7 = vmax.f32 %v2227_v53, 0.0  ;;  %v1935_v41 = vsel %vm1863_vm3, %v1304_v20, -inf  ;;  %v1953_v38 = vsel %vm1863_vm3, %v2842_v29, -inf  ;;  %v1956_v44 = vsel %vm1863_vm3, %v2743_v23, -inf  ;;  %v1307_v17 = vpop.f32.mrb[63].mxu0  ;;  %v1707_v47 = vpop.f32.mrb[63].mxu1 }
 0x158   :  { %2329 = vst.msk [vmem:[%s4426_s3 + $0x40] sm:$0xff] %vm1863_vm3, %v2279_v45  ;;  %v2280_v30 = vmax.f32 %v2230_v46, 0.0  ;;  %v2228_v27 = vadd.f32 %v3767_v12, %v1919_v19  ;;  %v1936_v62 = vmax.f32 %v3659_v51, %v1935_v41  ;;  %v1952_v58 = vmax.f32 %v1950_v48, %v3707_v0  ;;  %v4490_v45 = vld [vmem:[#allocation14_spill] sm:$0xff] }
 0x159   :  { %v3937_v31 = vsel %vm1863_vm3, %v4487_v28, -inf  ;;  %2327 = vst.msk [vmem:[%s4426_s3 + $0x30] sm:$0xff] %vm1863_vm3, %v2277_v7  ;;  %v1957_v35 = vmax.f32 %v3716_v39, %v1956_v44  ;;  %v1939_v29 = vsel %vm1863_vm3, %v1704_v6, -inf  ;;  %v1942_v14 = vsel %vm1863_vm3, %v1307_v17, -inf  ;;  %v4489_v39 = vld [vmem:[#allocation13_spill] sm:$0xff] }
 0x15a   :  { %2330 = vst.msk [vmem:[%s4426_s3 + $0x48] sm:$0xff] %vm1863_vm3, %v2280_v30  ;;  %v2278_v51 = vmax.f32 %v2228_v27, 0.0  ;;  %v1954_v0 = vmax.f32 %v1952_v58, %v1953_v38  ;;  %v1938_v53 = vmax.f32 %v1936_v62, %v3663_v52  ;;  %v1943_v26 = vmax.f32 %v3671_v54, %v1942_v14  ;;  %v4491_v38 = vld [vmem:[#allocation15_spill] sm:$0xff] }
 0x15b   :  { %v3954_v20 = vsel %vm1863_vm3, %v4488_v43, -inf  ;;  %v3958_v6 = vsel %vm1863_vm3, %v4489_v39, -inf  ;;  %v3962_v46 = vsel %vm1863_vm3, %v4490_v45, -inf  ;;  %v1959_v19 = vmax.f32 %v1957_v35, %v3724_v5 }
 0x15c   :  { %2328 = vst.msk [vmem:[%s4426_s3 + $0x38] sm:$0xff] %vm1863_vm3, %v2278_v51  ;;  %v2233_v52 = vadd.f32 %v3767_v12, %v1954_v0  ;;  %v1940_v54 = vmax.f32 %v1938_v53, %v1939_v29  ;;  %v1960_v48 = vsel %vm1863_vm3, %v2843_v57, -inf  ;;  %v1945_v23 = vmax.f32 %v1943_v26, %v3679_v56  ;;  %v2746_v7 = vpop.f32.mrb[64].mxu0  ;;  %v2846_v41 = vpop.f32.mrb[64].mxu1 }
 0x15d   :  { %v3974_v44 = vsel %vm1863_vm3, %v4491_v38, -inf  ;;  %v1961_v17 = vmax.f32 %v1959_v19, %v1960_v48  ;;  %v1946_v5 = vsel %vm1863_vm3, %v1707_v47, -inf  ;;  %v1977_v30 = vsel %vm1863_vm3, %v2746_v7, -inf  ;;  %v1320_v27 = vpop.f32.mrb[65].mxu0  ;;  %v1720_v62 = vpop.f32.mrb[65].mxu1  ;;  %v4492_v38 = vld [vmem:[#allocation17_spill] sm:$0xff] }
 0x15e   :  { %v2283_v58 = vmax.f32 %v2233_v52, 0.0  ;;  %v2231_v28 = vadd.f32 %v3767_v12, %v1940_v54  ;;  %v1947_v35 = vmax.f32 %v1945_v23, %v1946_v5  ;;  %v1978_v57 = vmax.f32 %v3742_v8, %v1977_v30  ;;  %v2747_v56 = vpop.f32.mrb[66].mxu0  ;;  %v2847_v29 = vpop.f32.mrb[66].mxu1  ;;  %v4494_v5 = vld [vmem:[#allocation18_spill] sm:$0xff] }
 0x15f   :  { %v2234_v14 = vadd.f32 %v3767_v12, %v1961_v17  ;;  %v1963_v51 = vsel %vm1863_vm3, %v1320_v27, -inf  ;;  %v1981_v0 = vsel %vm1863_vm3, %v2846_v41, -inf  ;;  %v1984_v47 = vsel %vm1863_vm3, %v2747_v56, -inf  ;;  %v1323_v53 = vpop.f32.mrb[67].mxu0  ;;  %v1723_v26 = vpop.f32.mrb[67].mxu1  ;;  %v4496_v56 = vld [vmem:[#allocation19_spill] sm:$0xff] }
 0x160   :  { %2333 = vst.msk [vmem:[%s4426_s3 + $0x60] sm:$0xff] %vm1863_vm3, %v2283_v58  ;;  %v2281_v43 = vmax.f32 %v2231_v28, 0.0  ;;  %v2232_v8 = vadd.f32 %v3767_v12, %v1947_v35  ;;  %v1964_v39 = vmax.f32 %v3691_v59, %v1963_v51  ;;  %v1980_v45 = vmax.f32 %v1978_v57, %v3746_v9  ;;  %v4495_v58 = vld [vmem:[#allocation47_spill] sm:$0xff] }
 0x161   :  { %v2284_v19 = vmax.f32 %v2234_v14, 0.0  ;;  %v1985_v52 = vmax.f32 %v3754_v37, %v1984_v47  ;;  %v1967_v54 = vsel %vm1863_vm3, %v1720_v62, -inf  ;;  %v1970_v48 = vsel %vm1863_vm3, %v1323_v53, -inf  ;;  %v4493_v37 = vld [vmem:[#allocation16_spill] sm:$0xff] }
 0x162   :  { %2331 = vst.msk [vmem:[%s4426_s3 + $0x50] sm:$0xff] %vm1863_vm3, %v2281_v43  ;;  %v2282_v23 = vmax.f32 %v2232_v8, 0.0  ;;  %v1982_v7 = vmax.f32 %v1980_v45, %v1981_v0  ;;  %v1966_v41 = vmax.f32 %v1964_v39, %v3695_v60  ;;  %v1971_v59 = vmax.f32 %v3703_v63, %v1970_v48 }
 0x163   :  { %v4002_v9 = vsel %vm1863_vm3, %v4492_v38, -inf  ;;  %v4006_v17 = vsel %vm1863_vm3, %v4493_v37, -inf  ;;  %v4010_v30 = vsel %vm1863_vm3, %v4494_v5, -inf  ;;  %2334 = vst.msk [vmem:[%s4426_s3 + $0x68] sm:$0xff] %vm1863_vm3, %v2284_v19  ;;  %v1987_v60 = vmax.f32 %v1985_v52, %v3762_v11 }
 0x164   :  { %2332 = vst.msk [vmem:[%s4426_s3 + $0x58] sm:$0xff] %vm1863_vm3, %v2282_v23  ;;  %v2237_v63 = vadd.f32 %v3767_v12, %v1982_v7  ;;  %v1968_v27 = vmax.f32 %v1966_v41, %v1967_v54  ;;  %v1988_v62 = vsel %vm1863_vm3, %v2847_v29, -inf  ;;  %v1973_v28 = vmax.f32 %v1971_v59, %v4495_v58  ;;  %v2750_v35 = vpop.f32.mrb[68].mxu0  ;;  %v2850_v57 = vpop.f32.mrb[68].mxu1 }
 0x165   :  { %v4026_v14 = vsel %vm1863_vm3, %v4496_v56, -inf  ;;  %v1989_v51 = vmax.f32 %v1987_v60, %v1988_v62  ;;  %v1974_v11 = vsel %vm1863_vm3, %v1723_v26, -inf  ;;  %v2005_v0 = vsel %vm1863_vm3, %v2750_v35, -inf  ;;  %v1336_v47 = vpop.f32.mrb[69].mxu0  ;;  %v1736_v53 = vpop.f32.mrb[69].mxu1 }
 0x166   :  { %v2287_v43 = vmax.f32 %v2237_v63, 0.0  ;;  %v2235_v8 = vadd.f32 %v3767_v12, %v1968_v27  ;;  %v1975_v39 = vmax.f32 %v1973_v28, %v1974_v11  ;;  %v2006_v29 = vmax.f32 %v3779_v36, %v2005_v0  ;;  %v2751_v45 = vpop.f32.mrb[70].mxu0  ;;  %v2851_v19 = vpop.f32.mrb[70].mxu1  ;;  %v4497_v28 = vld [vmem:[#allocation20_spill] sm:$0xff] }
 0x167   :  { %v2238_v52 = vadd.f32 %v3767_v12, %v1989_v51  ;;  %v1991_v54 = vsel %vm1863_vm3, %v1336_v47, -inf  ;;  %v2009_v48 = vsel %vm1863_vm3, %v2850_v57, -inf  ;;  %v2012_v26 = vsel %vm1863_vm3, %v2751_v45, -inf  ;;  %v1339_v23 = vpop.f32.mrb[71].mxu0  ;;  %v1739_v7 = vpop.f32.mrb[71].mxu1  ;;  %v4499_v57 = vld [vmem:[#allocation22_spill] sm:$0xff] }
 0x168   :  { %2337 = vst.msk [vmem:[%s4426_s3 + $0x80] sm:$0xff] %vm1863_vm3, %v2287_v43  ;;  %v2285_v41 = vmax.f32 %v2235_v8, 0.0  ;;  %v2236_v36 = vadd.f32 %v3767_v12, %v1975_v39  ;;  %v1992_v59 = vmax.f32 %v3728_v61, %v1991_v54  ;;  %v2008_v38 = vmax.f32 %v2006_v29, %v3787_v4  ;;  %v4500_v43 = vld [vmem:[#allocation23_spill] sm:$0xff] }
 0x169   :  { %v2288_v37 = vmax.f32 %v2238_v52, 0.0  ;;  %v2013_v5 = vmax.f32 %v3792_v18, %v2012_v26  ;;  %v1995_v60 = vsel %vm1863_vm3, %v1736_v53, -inf  ;;  %v1998_v63 = vsel %vm1863_vm3, %v1339_v23, -inf  ;;  %v4498_v18 = vld [vmem:[#allocation21_spill] sm:$0xff] }
 0x16a   :  { %2335 = vst.msk [vmem:[%s4426_s3 + $0x70] sm:$0xff] %vm1863_vm3, %v2285_v41  ;;  %v2286_v27 = vmax.f32 %v2236_v36, 0.0  ;;  %v2010_v62 = vmax.f32 %v2008_v38, %v2009_v48  ;;  %v1994_v58 = vmax.f32 %v1992_v59, %v3732_v2  ;;  %v1999_v61 = vmax.f32 %v3750_v10, %v1998_v63 }
 0x16b   :  { %v4054_v4 = vsel %vm1863_vm3, %v4497_v28, -inf  ;;  %v4058_v35 = vsel %vm1863_vm3, %v4498_v18, -inf  ;;  %v4062_v56 = vsel %vm1863_vm3, %v4499_v57, -inf  ;;  %2338 = vst.msk [vmem:[%s4426_s3 + $0x88] sm:$0xff] %vm1863_vm3, %v2288_v37  ;;  %v2015_v2 = vmax.f32 %v2013_v5, %v3801_v33 }
 0x16c   :  { %2336 = vst.msk [vmem:[%s4426_s3 + $0x78] sm:$0xff] %vm1863_vm3, %v2286_v27  ;;  %v2241_v10 = vadd.f32 %v3767_v12, %v2010_v62  ;;  %v1996_v51 = vmax.f32 %v1994_v58, %v1995_v60  ;;  %v2016_v11 = vsel %vm1863_vm3, %v2851_v19, -inf  ;;  %v2001_v0 = vmax.f32 %v1999_v61, %v3758_v42  ;;  %v2754_v47 = vpop.f32.mrb[72].mxu0  ;;  %v2854_v53 = vpop.f32.mrb[72].mxu1 }
 0x16d   :  { %v4078_v8 = vsel %vm1863_vm3, %v4500_v43, -inf  ;;  %v2017_v39 = vmax.f32 %v2015_v2, %v2016_v11  ;;  %v2002_v33 = vsel %vm1863_vm3, %v1739_v7, -inf  ;;  %v2033_v29 = vsel %vm1863_vm3, %v2754_v47, -inf  ;;  %v1352_v45 = vpop.f32.mrb[73].mxu0  ;;  %v1752_v52 = vpop.f32.mrb[73].mxu1  ;;  %v4501_v2 = vld [vmem:[#allocation25_spill] sm:$0xff] }
 0x16e   :  { %v2291_v54 = vmax.f32 %v2241_v10, 0.0  ;;  %v2239_v48 = vadd.f32 %v3767_v12, %v1996_v51  ;;  %v2003_v26 = vmax.f32 %v2001_v0, %v2002_v33  ;;  %v2034_v19 = vmax.f32 %v3828_v21, %v2033_v29  ;;  %v2755_v42 = vpop.f32.mrb[74].mxu0  ;;  %v2855_v23 = vpop.f32.mrb[74].mxu1  ;;  %v4503_v51 = vld [vmem:[#allocation26_spill] sm:$0xff]  ;;  %v4505_v29 = vld [vmem:[#allocation27_spill] sm:$0xff] }
 0x16f   :  { %v2242_v41 = vadd.f32 %v3767_v12, %v2017_v39  ;;  %v2019_v36 = vsel %vm1863_vm3, %v1352_v45, -inf  ;;  %v2037_v59 = vsel %vm1863_vm3, %v2854_v53, -inf  ;;  %v2040_v7 = vsel %vm1863_vm3, %v2755_v42, -inf  ;;  %v1355_v38 = vpop.f32.mrb[75].mxu0  ;;  %v1755_v37 = vpop.f32.mrb[75].mxu1  ;;  %v4504_v53 = vld [vmem:[#allocation50_spill] sm:$0xff] }
 0x170   :  { %2341 = vst.msk [vmem:[%s4426_s3 + $0xa0] sm:$0xff] %vm1863_vm3, %v2291_v54  ;;  %v2289_v5 = vmax.f32 %v2239_v48, 0.0  ;;  %v2240_v21 = vadd.f32 %v3767_v12, %v2003_v26  ;;  %v2020_v60 = vmax.f32 %v3771_v13, %v2019_v36  ;;  %v2036_v63 = vmax.f32 %v2034_v19, %v3832_v3 }
 0x171   :  { %v2292_v27 = vmax.f32 %v2242_v41, 0.0  ;;  %v2041_v62 = vmax.f32 %v3851_v40, %v2040_v7  ;;  %v2023_v58 = vsel %vm1863_vm3, %v1752_v52, -inf  ;;  %v2026_v61 = vsel %vm1863_vm3, %v1355_v38, -inf  ;;  %v4502_v40 = vld [vmem:[#allocation24_spill] sm:$0xff] }
 0x172   :  { %2339 = vst.msk [vmem:[%s4426_s3 + $0x90] sm:$0xff] %vm1863_vm3, %v2289_v5  ;;  %v2290_v28 = vmax.f32 %v2240_v21, 0.0  ;;  %v2038_v18 = vmax.f32 %v2036_v63, %v2037_v59  ;;  %v2022_v57 = vmax.f32 %v2020_v60, %v3775_v15  ;;  %v2027_v13 = vmax.f32 %v3783_v16, %v2026_v61 }
 0x173   :  { %v4106_v3 = vsel %vm1863_vm3, %v4501_v2, -inf  ;;  %v4110_v10 = vsel %vm1863_vm3, %v4502_v40, -inf  ;;  %v4114_v11 = vsel %vm1863_vm3, %v4503_v51, -inf  ;;  %2342 = vst.msk [vmem:[%s4426_s3 + $0xa8] sm:$0xff] %vm1863_vm3, %v2292_v27  ;;  %v2043_v15 = vmax.f32 %v2041_v62, %v3857_v24  ;;  %v4506_v27 = vld [vmem:[#allocation51_spill] sm:$0xff]  ;;  %v4507_v40 = vld [vmem:[#allocation52_spill] sm:$0xff] }
 0x174   :  { %2340 = vst.msk [vmem:[%s4426_s3 + $0x98] sm:$0xff] %vm1863_vm3, %v2290_v28  ;;  %v2245_v16 = vadd.f32 %v3767_v12, %v2038_v18  ;;  %v2024_v0 = vmax.f32 %v2022_v57, %v2023_v58  ;;  %v2044_v47 = vsel %vm1863_vm3, %v2855_v23, -inf  ;;  %v2029_v43 = vmax.f32 %v2027_v13, %v4504_v53  ;;  %v2758_v39 = vpop.f32.mrb[76].mxu0  ;;  %v2858_v33 = vpop.f32.mrb[76].mxu1 }
 0x175   :  { %v4130_v45 = vsel %vm1863_vm3, %v4505_v29, -inf  ;;  %v2045_v52 = vmax.f32 %v2043_v15, %v2044_v47  ;;  %v2030_v24 = vsel %vm1863_vm3, %v1755_v37, -inf  ;;  %v2061_v54 = vsel %vm1863_vm3, %v2758_v39, -inf  ;;  %v1368_v48 = vpop.f32.mrb[77].mxu0  ;;  %v1768_v26 = vpop.f32.mrb[77].mxu1  ;;  %v4510_v47 = vld [vmem:[#allocation30_spill] sm:$0xff] }
 0x176   :  { %v2295_v19 = vmax.f32 %v2245_v16, 0.0  ;;  %v2243_v42 = vadd.f32 %v3767_v12, %v2024_v0  ;;  %v2031_v41 = vmax.f32 %v2029_v43, %v2030_v24  ;;  %v2062_v23 = vmax.f32 %v3899_v22, %v2061_v54  ;;  %v2759_v36 = vpop.f32.mrb[78].mxu0  ;;  %v2859_v59 = vpop.f32.mrb[78].mxu1  ;;  %v4508_v16 = vld [vmem:[#allocation28_spill] sm:$0xff]  ;;  %v4511_v54 = vld [vmem:[#allocation31_spill] sm:$0xff] }
 0x177   :  { %v2246_v7 = vadd.f32 %v3767_v12, %v2045_v52  ;;  %v2047_v38 = vsel %vm1863_vm3, %v1368_v48, -inf  ;;  %v2065_v5 = vsel %vm1863_vm3, %v2858_v33, -inf  ;;  %v2068_v37 = vsel %vm1863_vm3, %v2759_v36, -inf  ;;  %v1371_v21 = vpop.f32.mrb[79].mxu0  ;;  %v1771_v60 = vpop.f32.mrb[79].mxu1 }
 0x178   :  { %2345 = vst.msk [vmem:[%s4426_s3 + $0xc0] sm:$0xff] %vm1863_vm3, %v2295_v19  ;;  %v2293_v63 = vmax.f32 %v2243_v42, 0.0  ;;  %v2244_v22 = vadd.f32 %v3767_v12, %v2031_v41  ;;  %v2048_v62 = vmax.f32 %v4506_v27, %v2047_v38  ;;  %v2064_v58 = vmax.f32 %v2062_v23, %v3903_v32 }
 0x179   :  { %v2296_v61 = vmax.f32 %v2246_v7, 0.0  ;;  %v2069_v28 = vmax.f32 %v3937_v31, %v2068_v37  ;;  %v2051_v18 = vsel %vm1863_vm3, %v1768_v26, -inf  ;;  %v2054_v57 = vsel %vm1863_vm3, %v1371_v21, -inf  ;;  %v4509_v31 = vld [vmem:[#allocation29_spill] sm:$0xff] }
 0x17a   :  { %2343 = vst.msk [vmem:[%s4426_s3 + $0xb0] sm:$0xff] %vm1863_vm3, %v2293_v63  ;;  %v2294_v13 = vmax.f32 %v2244_v22, 0.0  ;;  %v2066_v2 = vmax.f32 %v2064_v58, %v2065_v5  ;;  %v2050_v51 = vmax.f32 %v2048_v62, %v4507_v40  ;;  %v2055_v15 = vmax.f32 %v3838_v1, %v2054_v57 }
 0x17b   :  { %v4158_v32 = vsel %vm1863_vm3, %v4508_v16, -inf  ;;  %v4162_v0 = vsel %vm1863_vm3, %v4509_v31, -inf  ;;  %v4166_v53 = vsel %vm1863_vm3, %v4510_v47, -inf  ;;  %2346 = vst.msk [vmem:[%s4426_s3 + $0xc8] sm:$0xff] %vm1863_vm3, %v2296_v61  ;;  %v2071_v43 = vmax.f32 %v2069_v28, %v3954_v20  ;;  %v4514_v16 = vld [vmem:[#allocation34_spill] sm:$0xff] }
 0x17c   :  { %2344 = vst.msk [vmem:[%s4426_s3 + $0xb8] sm:$0xff] %vm1863_vm3, %v2294_v13  ;;  %v2249_v1 = vadd.f32 %v3767_v12, %v2066_v2  ;;  %v2052_v39 = vmax.f32 %v2050_v51, %v2051_v18  ;;  %v2072_v33 = vsel %vm1863_vm3, %v2859_v59, -inf  ;;  %v2057_v29 = vmax.f32 %v2055_v15, %v3842_v49  ;;  %v2762_v52 = vpop.f32.mrb[80].mxu0  ;;  %v2862_v24 = vpop.f32.mrb[80].mxu1  ;;  %v4512_v51 = vld [vmem:[#allocation33_spill] sm:$0xff] }
 0x17d   :  { %v4182_v48 = vsel %vm1863_vm3, %v4511_v54, -inf  ;;  %v2073_v26 = vmax.f32 %v2071_v43, %v2072_v33  ;;  %v2058_v20 = vsel %vm1863_vm3, %v1771_v60, -inf  ;;  %v2089_v19 = vsel %vm1863_vm3, %v2762_v52, -inf  ;;  %v1384_v42 = vpop.f32.mrb[81].mxu0  ;;  %v1784_v41 = vpop.f32.mrb[81].mxu1 }
 0x17e   :  { %v2299_v23 = vmax.f32 %v2249_v1, 0.0  ;;  %v2247_v36 = vadd.f32 %v3767_v12, %v2052_v39  ;;  %v2059_v7 = vmax.f32 %v2057_v29, %v2058_v20  ;;  %v2090_v59 = vmax.f32 %v3974_v44, %v2089_v19  ;;  %v2763_v49 = vpop.f32.mrb[82].mxu0  ;;  %v2863_v38 = vpop.f32.mrb[82].mxu1  ;;  %v4515_v29 = vld [vmem:[#allocation35_spill] sm:$0xff] }
 0x17f   :  { %v2250_v5 = vadd.f32 %v3767_v12, %v2073_v26  ;;  %v2075_v37 = vsel %vm1863_vm3, %v1384_v42, -inf  ;;  %v2093_v21 = vsel %vm1863_vm3, %v2862_v24, -inf  ;;  %v2096_v60 = vsel %vm1863_vm3, %v2763_v49, -inf  ;;  %v1387_v63 = vpop.f32.mrb[83].mxu0  ;;  %v1787_v22 = vpop.f32.mrb[83].mxu1 }
 0x180   :  { %2349 = vst.msk [vmem:[%s4426_s3 + $0xe0] sm:$0xff] %vm1863_vm3, %v2299_v23  ;;  %v2297_v27 = vmax.f32 %v2247_v36, 0.0  ;;  %v2248_v44 = vadd.f32 %v3767_v12, %v2059_v7  ;;  %v2076_v62 = vmax.f32 %v3879_v50, %v2075_v37  ;;  %v2092_v58 = vmax.f32 %v2090_v59, %v4006_v17 }
 0x181   :  { %v2300_v61 = vmax.f32 %v2250_v5, 0.0  ;;  %v2097_v28 = vmax.f32 %v4026_v14, %v2096_v60  ;;  %v2079_v18 = vsel %vm1863_vm3, %v1784_v41, -inf  ;;  %v2082_v57 = vsel %vm1863_vm3, %v1387_v63, -inf  ;;  %v4513_v14 = vld [vmem:[#allocation32_spill] sm:$0xff] }
 0x182   :  { %2347 = vst.msk [vmem:[%s4426_s3 + $0xd0] sm:$0xff] %vm1863_vm3, %v2297_v27  ;;  %v2298_v13 = vmax.f32 %v2248_v44, 0.0  ;;  %v2094_v2 = vmax.f32 %v2092_v58, %v2093_v21  ;;  %v2078_v40 = vmax.f32 %v2076_v62, %v3889_v55  ;;  %v2083_v50 = vmax.f32 %v3912_v34, %v2082_v57  ;;  %v4517_v57 = vld [vmem:[#allocation37_spill] sm:$0xff] }
 0x183   :  { %v4210_v17 = vsel %vm1863_vm3, %v4512_v51, -inf  ;;  %v4214_v15 = vsel %vm1863_vm3, %v4513_v14, -inf  ;;  %v4218_v31 = vsel %vm1863_vm3, %v4514_v16, -inf  ;;  %2350 = vst.msk [vmem:[%s4426_s3 + $0xe8] sm:$0xff] %vm1863_vm3, %v2300_v61  ;;  %v2099_v55 = vmax.f32 %v2097_v28, %v4054_v4 }
 0x184   :  { %2348 = vst.msk [vmem:[%s4426_s3 + $0xd8] sm:$0xff] %vm1863_vm3, %v2298_v13  ;;  %v2253_v34 = vadd.f32 %v3767_v12, %v2094_v2  ;;  %v2080_v47 = vmax.f32 %v2078_v40, %v2079_v18  ;;  %v2100_v43 = vsel %vm1863_vm3, %v2863_v38, -inf  ;;  %v2085_v1 = vmax.f32 %v2083_v50, %v3918_v25  ;;  %v2766_v39 = vpop.f32.mrb[84].mxu0  ;;  %v2866_v33 = vpop.f32.mrb[84].mxu1  ;;  %v4516_v18 = vld [vmem:[#allocation36_spill] sm:$0xff]  ;;  %v4518_v13 = vld [vmem:[#allocation38_spill] sm:$0xff] }
 0x185   :  { %v4234_v52 = vsel %vm1863_vm3, %v4515_v29, -inf  ;;  %v2101_v24 = vmax.f32 %v2099_v55, %v2100_v43  ;;  %v2086_v4 = vsel %vm1863_vm3, %v1787_v22, -inf  ;;  %v2117_v54 = vsel %vm1863_vm3, %v2766_v39, -inf  ;;  %v1400_v26 = vpop.f32.mrb[85].mxu0  ;;  %v1800_v20 = vpop.f32.mrb[85].mxu1  ;;  %v4519_v55 = vld [vmem:[#allocation39_spill] sm:$0xff] }
 0x186   :  { %v2303_v19 = vmax.f32 %v2253_v34, 0.0  ;;  %v2251_v42 = vadd.f32 %v3767_v12, %v2080_v47  ;;  %v2087_v41 = vmax.f32 %v2085_v1, %v2086_v4  ;;  %v2118_v23 = vmax.f32 %v4078_v8, %v2117_v54  ;;  %v2767_v25 = vpop.f32.mrb[86].mxu0  ;;  %v2867_v36 = vpop.f32.mrb[86].mxu1 }
 0x187   :  { %v2254_v7 = vadd.f32 %v3767_v12, %v2101_v24  ;;  %v2103_v59 = vsel %vm1863_vm3, %v1400_v26, -inf  ;;  %v2121_v49 = vsel %vm1863_vm3, %v2866_v33, -inf  ;;  %v2124_v38 = vsel %vm1863_vm3, %v2767_v25, -inf  ;;  %v1403_v5 = vpop.f32.mrb[87].mxu0  ;;  %v1803_v37 = vpop.f32.mrb[87].mxu1 }
 0x188   :  { %2353 = vst.msk [vmem:[%s4426_s3 + $0x100] sm:$0xff] %vm1863_vm3, %v2303_v19  ;;  %v2301_v21 = vmax.f32 %v2251_v42, 0.0  ;;  %v2252_v8 = vadd.f32 %v3767_v12, %v2087_v41  ;;  %v2104_v60 = vmax.f32 %v3958_v6, %v2103_v59  ;;  %v2120_v63 = vmax.f32 %v2118_v23, %v4110_v10 }
 0x189   :  { %v2304_v22 = vmax.f32 %v2254_v7, 0.0  ;;  %v2125_v27 = vmax.f32 %v4130_v45, %v2124_v38  ;;  %v2107_v44 = vsel %vm1863_vm3, %v1800_v20, -inf  ;;  %v2110_v62 = vsel %vm1863_vm3, %v1403_v5, -inf }
 0x18a   :  { %2351 = vst.msk [vmem:[%s4426_s3 + $0xf0] sm:$0xff] %vm1863_vm3, %v2301_v21  ;;  %v2302_v58 = vmax.f32 %v2252_v8, 0.0  ;;  %v2122_v61 = vmax.f32 %v2120_v63, %v2121_v49  ;;  %v2106_v28 = vmax.f32 %v2104_v60, %v3962_v46  ;;  %v2111_v6 = vmax.f32 %v4002_v9, %v2110_v62  ;;  %v4520_v60 = vld [vmem:[#allocation41_spill] sm:$0xff] }
 0x18b   :  { %v2154_v10 = vsel %vm1863_vm3, %v4516_v18, -inf  ;;  %v4264_v45 = vsel %vm1863_vm3, %v4517_v57, -inf  ;;  %v4268_v2 = vsel %vm1863_vm3, %v4518_v13, -inf  ;;  %2354 = vst.msk [vmem:[%s4426_s3 + $0x108] sm:$0xff] %vm1863_vm3, %v2304_v22  ;;  %v2127_v46 = vmax.f32 %v2125_v27, %v4158_v32  ;;  %v4522_v22 = vld [vmem:[#allocation43_spill] sm:$0xff] }
 0x18c   :  { %2352 = vst.msk [vmem:[%s4426_s3 + $0xf8] sm:$0xff] %vm1863_vm3, %v2302_v58  ;;  %v2257_v9 = vadd.f32 %v3767_v12, %v2122_v61  ;;  %v2108_v40 = vmax.f32 %v2106_v28, %v2107_v44  ;;  %v2128_v50 = vsel %vm1863_vm3, %v2867_v36, -inf  ;;  %v2113_v51 = vmax.f32 %v2111_v6, %v4010_v30  ;;  %v2770_v14 = vpop.f32.mrb[88].mxu0  ;;  %v2870_v16 = vpop.f32.mrb[88].mxu1  ;;  %v4523_v6 = vld [vmem:[#allocation44_spill] sm:$0xff] }
 0x18d   :  { %v4284_v34 = vsel %vm1863_vm3, %v4519_v55, -inf  ;;  %v2129_v47 = vmax.f32 %v2127_v46, %v2128_v50  ;;  %v2114_v32 = vsel %vm1863_vm3, %v1803_v37, -inf  ;;  %v2145_v43 = vsel %vm1863_vm3, %v2770_v14, -inf  ;;  %v1416_v1 = vpop.f32.mrb[89].mxu0  ;;  %v1816_v39 = vpop.f32.mrb[89].mxu1 }
 0x18e   :  { %v2307_v33 = vmax.f32 %v2257_v9, 0.0  ;;  %v2255_v29 = vadd.f32 %v3767_v12, %v2108_v40  ;;  %v2115_v24 = vmax.f32 %v2113_v51, %v2114_v32  ;;  %v2146_v4 = vmax.f32 %v4182_v48, %v2145_v43  ;;  %v2771_v30 = vpop.f32.mrb[90].mxu0  ;;  %v2871_v54 = vpop.f32.mrb[90].mxu1 }
 0x18f   :  { %v2258_v26 = vadd.f32 %v3767_v12, %v2129_v47  ;;  %v2131_v20 = vsel %vm1863_vm3, %v1416_v1, -inf  ;;  %v2149_v19 = vsel %vm1863_vm3, %v2870_v16, -inf  ;;  %v2152_v42 = vsel %vm1863_vm3, %v2771_v30, -inf  ;;  %v1419_v41 = vpop.f32.mrb[91].mxu0  ;;  %v1819_v23 = vpop.f32.mrb[91].mxu1 }
 0x190   :  { %2357 = vst.msk [vmem:[%s4426_s3 + $0x120] sm:$0xff] %vm1863_vm3, %v2307_v33  ;;  %v2305_v25 = vmax.f32 %v2255_v29, 0.0  ;;  %v2256_v48 = vadd.f32 %v3767_v12, %v2115_v24  ;;  %v2132_v36 = vmax.f32 %v4058_v35, %v2131_v20  ;;  %v2148_v7 = vmax.f32 %v2146_v4, %v4214_v15 }
 0x191   :  { %v2308_v59 = vmax.f32 %v2258_v26, 0.0  ;;  %v2153_v49 = vmax.f32 %v4234_v52, %v2152_v42  ;;  %v2135_v38 = vsel %vm1863_vm3, %v1816_v39, -inf  ;;  %v2138_v5 = vsel %vm1863_vm3, %v1419_v41, -inf  ;;  %v4521_v52 = vld [vmem:[#allocation40_spill] sm:$0xff] }
 0x192   :  { %2355 = vst.msk [vmem:[%s4426_s3 + $0x110] sm:$0xff] %vm1863_vm3, %v2305_v25  ;;  %v2306_v37 = vmax.f32 %v2256_v48, 0.0  ;;  %v2150_v21 = vmax.f32 %v2148_v7, %v2149_v19  ;;  %v2134_v8 = vmax.f32 %v2132_v36, %v4062_v56  ;;  %v2139_v35 = vmax.f32 %v4106_v3, %v2138_v5  ;;  %v4525_v25 = vld [vmem:[#allocation46_spill] sm:$0xff]  ;;  %v4526_v36 = vld [vmem:[#allocation48_spill] sm:$0xff] }
 0x193   :  { %v4312_v15 = vsel %vm1863_vm3, %v4520_v60, -inf  ;;  %v2175_v63 = vsel %vm1863_vm3, %v4521_v52, -inf  ;;  %v2179_v27 = vsel %vm1863_vm3, %v4522_v22, -inf  ;;  %2358 = vst.msk [vmem:[%s4426_s3 + $0x128] sm:$0xff] %vm1863_vm3, %v2308_v59  ;;  %v2155_v44 = vmax.f32 %v2153_v49, %v2154_v10 }
 0x194   :  { %2356 = vst.msk [vmem:[%s4426_s3 + $0x118] sm:$0xff] %vm1863_vm3, %v2306_v37  ;;  %v2261_v56 = vadd.f32 %v3767_v12, %v2150_v21  ;;  %v2136_v3 = vmax.f32 %v2134_v8, %v2135_v38  ;;  %v2156_v62 = vsel %vm1863_vm3, %v2871_v54, -inf  ;;  %v2141_v58 = vmax.f32 %v2139_v35, %v4114_v11  ;;  %v2774_v61 = vpop.f32.mrb[92].mxu0  ;;  %v2874_v28 = vpop.f32.mrb[92].mxu1  ;;  %v4527_v21 = vld [vmem:[#allocation49_spill] sm:$0xff] }
 0x195   :  { %v2182_v18 = vsel %vm1863_vm3, %v4523_v6, -inf  ;;  %v2157_v57 = vmax.f32 %v2155_v44, %v2156_v62  ;;  %v2142_v10 = vsel %vm1863_vm3, %v1819_v23, -inf  ;;  %v2173_v13 = vsel %vm1863_vm3, %v2774_v61, -inf  ;;  %v1432_v46 = vpop.f32.mrb[93].mxu0  ;;  %v1832_v9 = vpop.f32.mrb[93].mxu1  ;;  %v4524_v23 = vld [vmem:[#allocation45_spill] sm:$0xff] }
 0x196   :  { %v2311_v40 = vmax.f32 %v2261_v56, 0.0  ;;  %v2259_v50 = vadd.f32 %v3767_v12, %v2136_v3  ;;  %v2143_v51 = vmax.f32 %v2141_v58, %v2142_v10  ;;  %v2174_v14 = vmax.f32 %v4284_v34, %v2173_v13  ;;  %v2775_v16 = vpop.f32.mrb[94].mxu0  ;;  %v2875_v11 = vpop.f32.mrb[94].mxu1  ;;  %v2984_v13 = vld [vmem:[%s4425_s2] ss:$0 sm:$0xff] }
 0x197   :  { %v2262_v55 = vadd.f32 %v3767_v12, %v2157_v57  ;;  %v2159_v47 = vsel %vm1863_vm3, %v1432_v46, -inf  ;;  %v2177_v32 = vsel %vm1863_vm3, %v2874_v28, -inf  ;;  %v2180_v43 = vsel %vm1863_vm3, %v2775_v16, -inf  ;;  %v1435_v1 = vpop.f32.mrb[95].mxu0  ;;  %v1835_v39 = vpop.f32.mrb[95].mxu1 }
 0x198   :  { %2361 = vst.msk [vmem:[%s4426_s3 + $0x140] sm:$0xff] %vm1863_vm3, %v2311_v40  ;;  %v2309_v33 = vmax.f32 %v2259_v50, 0.0  ;;  %v2260_v34 = vadd.f32 %v3767_v12, %v2143_v51  ;;  %v2160_v29 = vmax.f32 %v4162_v0, %v2159_v47  ;;  %v2176_v24 = vmax.f32 %v2174_v14, %v2175_v63 }
 0x199   :  { %v2312_v4 = vmax.f32 %v2262_v55, 0.0  ;;  %v2181_v30 = vmax.f32 %v2179_v27, %v2180_v43  ;;  %v2163_v54 = vsel %vm1863_vm3, %v1832_v9, -inf  ;;  %v2166_v26 = vsel %vm1863_vm3, %v1435_v1, -inf }
 0x19a   :  { %2359 = vst.msk [vmem:[%s4426_s3 + $0x130] sm:$0xff] %vm1863_vm3, %v2309_v33  ;;  %v2310_v20 = vmax.f32 %v2260_v34, 0.0  ;;  %v2178_v19 = vmax.f32 %v2176_v24, %v2177_v32  ;;  %v2162_v42 = vmax.f32 %v2160_v29, %v4166_v53  ;;  %v2167_v41 = vmax.f32 %v4210_v17, %v2166_v26  ;;  %v4528_v32 = vld [vmem:[#allocation42_spill] sm:$0xff] }
 0x19b   :  { %v2200_v0 = vsel %vm1863_vm3, %v4524_v23, -inf  ;;  %v2203_v48 = vsel %vm1863_vm3, %v4525_v25, -inf  ;;  %v2207_v7 = vsel %vm1863_vm3, %v4526_v36, -inf  ;;  %2362 = vst.msk [vmem:[%s4426_s3 + $0x148] sm:$0xff] %vm1863_vm3, %v2312_v4  ;;  %v2183_v59 = vmax.f32 %v2181_v30, %v2182_v18 }
 0x19c   :  { %2360 = vst.msk [vmem:[%s4426_s3 + $0x138] sm:$0xff] %vm1863_vm3, %v2310_v20  ;;  %v2265_v53 = vadd.f32 %v3767_v12, %v2178_v19  ;;  %v2164_v17 = vmax.f32 %v2162_v42, %v2163_v54  ;;  %v2184_v49 = vsel %vm1863_vm3, %v2875_v11, -inf  ;;  %v2169_v38 = vmax.f32 %v2167_v41, %v4218_v31  ;;  %v2778_v5 = vpop.f32.mrb[96].mxu0  ;;  %v2878_v37 = vpop.f32.mrb[96].mxu1 }
 0x19d   :  { %v2210_v8 = vsel %vm1863_vm3, %v4527_v21, -inf  ;;  %v2185_v35 = vmax.f32 %v2183_v59, %v2184_v49  ;;  %v2170_v60 = vsel %vm1863_vm3, %v1835_v39, -inf  ;;  %v2201_v52 = vsel %vm1863_vm3, %v2778_v5, -inf  ;;  %v1448_v63 = vpop.f32.mrb[97].mxu0  ;;  %v1848_v22 = vpop.f32.mrb[97].mxu1 }
 0x19e   :  { %v2315_v27 = vmax.f32 %v2265_v53, 0.0  ;;  %v2263_v44 = vadd.f32 %v3767_v12, %v2164_v17  ;;  %v2171_v56 = vmax.f32 %v2169_v38, %v2170_v60  ;;  %v2202_v3 = vmax.f32 %v2200_v0, %v2201_v52  ;;  %v2779_v62 = vpop.f32.mrb[98].mxu0  ;;  %v2879_v58 = vpop.f32.mrb[98].mxu1 }
 0x19f   :  { %v2266_v31 = vadd.f32 %v3767_v12, %v2185_v35  ;;  %v2187_v61 = vsel %vm1863_vm3, %v1448_v63, -inf  ;;  %v2205_v28 = vsel %vm1863_vm3, %v2878_v37, -inf  ;;  %v2208_v6 = vsel %vm1863_vm3, %v2779_v62, -inf  ;;  %v1451_v18 = vpop.f32.mrb[99].mxu0  ;;  %v1851_v57 = vpop.f32.mrb[99].mxu1 }
 0x1a0   :  { %2365 = vst.msk [vmem:[%s4426_s3 + $0x160] sm:$0xff] %vm1863_vm3, %v2315_v27  ;;  %v2313_v10 = vmax.f32 %v2263_v44, 0.0  ;;  %v2264_v46 = vadd.f32 %v2984_v13, %v2171_v56  ;;  %v2188_v12 = vmax.f32 %v4264_v45, %v2187_v61  ;;  %v2204_v9 = vmax.f32 %v2202_v3, %v2203_v48 }
 0x1a1   :  { %v2316_v40 = vmax.f32 %v2266_v31, 0.0  ;;  %v2209_v50 = vmax.f32 %v2207_v7, %v2208_v6  ;;  %v2191_v51 = vsel %vm1863_vm3, %v1848_v22, -inf  ;;  %v2194_v14 = vsel %vm1863_vm3, %v1451_v18, -inf }
 0x1a2   :  { %2363 = vst.msk [vmem:[%s4426_s3 + $0x150] sm:$0xff] %vm1863_vm3, %v2313_v10  ;;  %v2314_v16 = vmax.f32 %v2264_v46, 0.0  ;;  %v2206_v11 = vmax.f32 %v2204_v9, %v2205_v28  ;;  %v2190_v55 = vmax.f32 %v2188_v12, %v4268_v2  ;;  %v2195_v47 = vmax.f32 %v4312_v15, %v2194_v14 }
 0x1a3   :  { %v2196_v45 = vsel %vm1863_vm3, %v4528_v32, -inf  ;;  %2366 = vst.msk [vmem:[%s4426_s3 + $0x168] sm:$0xff] %vm1863_vm3, %v2316_v40  ;;  %v2211_v43 = vmax.f32 %v2209_v50, %v2210_v8  ;;  %v2212_v2 = vsel %vm1863_vm3, %v2879_v58, -inf  ;;  %v2198_v34 = vsel %vm1863_vm3, %v1851_v57, -inf }
 0x1a4   :  { %2364 = vst.msk [vmem:[%s4426_s3 + $0x158] sm:$0xff] %vm1863_vm3, %v2314_v16  ;;  %v2269_v1 = vadd.f32 %v2984_v13, %v2206_v11  ;;  %v2192_v39 = vmax.f32 %v2190_v55, %v2191_v51  ;;  %v2197_v33 = vmax.f32 %v2195_v47, %v2196_v45 }
 0x1a5   :  { %v2213_v15 = vmax.f32 %v2211_v43, %v2212_v2 }
 0x1a6   :  { %v2319_v29 = vmax.f32 %v2269_v1, 0.0  ;;  %v2267_v24 = vadd.f32 %v2984_v13, %v2192_v39  ;;  %v2199_v4 = vmax.f32 %v2197_v33, %v2198_v34 }
 0x1a7   :  { %v2270_v30 = vadd.f32 %v2984_v13, %v2213_v15 }
 0x1a8   :  { %2369 = vst.msk [vmem:[%s4426_s3 + $0x180] sm:$0xff] %vm1863_vm3, %v2319_v29  ;;  %v2317_v54 = vmax.f32 %v2267_v24, 0.0  ;;  %v2268_v26 = vadd.f32 %v2984_v13, %v2199_v4 }
 0x1a9   :  { %v2320_v20 = vmax.f32 %v2270_v30, 0.0 }
 0x1aa   :  { %2367 = vst.msk [vmem:[%s4426_s3 + $0x170] sm:$0xff] %vm1863_vm3, %v2317_v54  ;;  %v2318_v19 = vmax.f32 %v2268_v26, 0.0 }
 0x1ab   :  { %2370 = vst.msk [vmem:[%s4426_s3 + $0x188] sm:$0xff] %vm1863_vm3, %v2320_v20 }
 0x1ac   :  { %2368 = vst.msk [vmem:[%s4426_s3 + $0x178] sm:$0xff] %vm1863_vm3, %v2318_v19 }

// kernel: cnn_forward.4
= control target key start
LH: loop header
LB: loop body
LE: loop exit
PB: predicated region body
PF: predicated region fallthrough
CT: control target
= control target key end

     0   :  { %v1826_v0 = vmov 0   ;;  %vm691_vm0 = vcmask 261120   ;;  %vm1290_vm1 = vcmask 523264   ;;  %s2563_s1 = inlined_call_operand.vmem [shape: bf16[288,64], index: 1, kind: input, shape index: {}]   ;;  %s2564_s0 = inlined_call_operand.vmem [shape: bf16[4,112,288], index: 0, kind: input, shape index: {}]   ;;  %s2565_s2 = inlined_call_operand.vmem [shape: f32[1,64], index: 2, kind: input, shape index: {}]   ;;  %s2566_s3 = inlined_call_operand.vmem [shape: f32[112,64], index: 3, kind: output, shape index: {}]  }
   0x1   :  { %776 = vmatprep.subr.bf16.mxu0 %v1826_v0  ;;  %1663 = vmatprep.subr.bf16.mxu1 %v1826_v0  ;;  %v1696_v1 = vld [vmem:[%s2563_s1] sm:$0xff]   ;;  %v1697_v2 = vld [vmem:[%s2563_s1 + $0x8] sm:$0xff]   ;;  %v1698_v3 = vld [vmem:[%s2563_s1 + $0x10] sm:$0xff]  }
   0x2   :  { %777 = vmatpush1.bf16.msra.mxu0 %v1696_v1  ;;  %1679 = vmatpush1.bf16.msra.mxu1 %v1696_v1  ;;  %v1699_v4 = vld [vmem:[%s2563_s1 + $0x18] sm:$0xff]   ;;  %v1700_v5 = vld [vmem:[%s2563_s1 + $0x20] sm:$0xff]   ;;  %v1701_v7 = vld [vmem:[%s2563_s1 + $0x28] sm:$0xff]  }
   0x3   :  { %778 = vmatprep.subr.bf16.mxu0 %v1826_v0  ;;  %1664 = vmatprep.subr.bf16.mxu1 %v1826_v0  ;;  %v1714_v6 = vld [vmem:[%s2564_s0 + $0x4] ss:$12 sps:$4 sm:$0xff]   ;;  %v1717_v8 = vld [vmem:[%s2564_s0 + $0x1fc] ss:$12 sps:$4 sm:$0xff]   ;;  %v1712_v19 = vld [vmem:[%s2564_s0] ss:$12 sps:$4 sm:$0xff]  }
   0x4   :  { %808 = vmatprep.mubr.bf16.mxu0 %v1714_v6  ;;  %976 = vmatprep.mubr.bf16.mxu1 %v1717_v8  ;;  %v1702_v9 = vld [vmem:[%s2563_s1 + $0x30] sm:$0xff]   ;;  %v1703_v10 = vld [vmem:[%s2563_s1 + $0x38] sm:$0xff]   ;;  %v1704_v11 = vld [vmem:[%s2563_s1 + $0x40] sm:$0xff]  }
   0x5   :  { %v1705_v12 = vld [vmem:[%s2563_s1 + $0x48] sm:$0xff]   ;;  %v1706_v13 = vld [vmem:[%s2563_s1 + $0x50] sm:$0xff]   ;;  %v1707_v14 = vld [vmem:[%s2563_s1 + $0x58] sm:$0xff]  }
   0x6   :  { %779 = vmatpush1.bf16.msra.mxu0 %v1697_v2  ;;  %1680 = vmatpush1.bf16.msra.mxu1 %v1697_v2  ;;  %v1708_v15 = vld [vmem:[%s2563_s1 + $0x60] sm:$0xff]   ;;  %v1709_v16 = vld [vmem:[%s2563_s1 + $0x68] sm:$0xff]   ;;  %v1710_v17 = vld [vmem:[%s2563_s1 + $0x70] sm:$0xff]  }
   0x7   :  { %780 = vmatprep.subr.bf16.mxu0 %v1826_v0  ;;  %1665 = vmatprep.subr.bf16.mxu1 %v1826_v0  ;;  %v1711_v18 = vld [vmem:[%s2563_s1 + $0x78] sm:$0xff]   ;;  %v1718_v20 = vld [vmem:[%s2563_s1 + $0x80] sm:$0xff]   ;;  %v1737_v24 = vld [vmem:[%s2563_s1 + $0x88] sm:$0xff]  }
   0x8   :  { %v1715_v21 = vld [vmem:[%s2564_s0 + $0x1f8] ss:$12 sps:$4 sm:$0xff]   ;;  %v1719_v22 = vld [vmem:[%s2564_s0 + $0x1c] ss:$12 sps:$4 sm:$0xff]   ;;  %v1721_v23 = vld [vmem:[%s2564_s0 + $0x214] ss:$12 sps:$4 sm:$0xff]  }
   0x9   :  { %v1723_v25 = vld [vmem:[%s2564_s0 + $0x18] ss:$12 sps:$4 sm:$0xff]   ;;  %v1724_v26 = vld [vmem:[%s2564_s0 + $0x210] ss:$12 sps:$4 sm:$0xff]   ;;  %v1725_v27 = vld [vmem:[%s2564_s0 + $0x34] ss:$12 sps:$4 sm:$0xff]  }
   0xa   :  { %781 = vmatpush1.bf16.msra.mxu0 %v1698_v3  ;;  %1681 = vmatpush1.bf16.msra.mxu1 %v1698_v3  ;;  %v1727_v28 = vld [vmem:[%s2564_s0 + $0x22c] ss:$12 sps:$4 sm:$0xff]   ;;  %v1729_v29 = vld [vmem:[%s2564_s0 + $0x30] ss:$12 sps:$4 sm:$0xff]   ;;  %v1730_v30 = vld [vmem:[%s2564_s0 + $0x228] ss:$12 sps:$4 sm:$0xff]  }
   0xb   :  { %782 = vmatprep.subr.bf16.mxu0 %v1826_v0  ;;  %1666 = vmatprep.subr.bf16.mxu1 %v1826_v0  ;;  %v1731_v31 = vld [vmem:[%s2564_s0 + $0x4c] ss:$12 sps:$4 sm:$0xff]   ;;  %v1733_v32 = vld [vmem:[%s2564_s0 + $0x244] ss:$12 sps:$4 sm:$0xff]   ;;  %v1735_v33 = vld [vmem:[%s2564_s0 + $0x48] ss:$12 sps:$4 sm:$0xff]  }
   0xc   :  { %v1736_v34 = vld [vmem:[%s2564_s0 + $0x240] ss:$12 sps:$4 sm:$0xff]   ;;  %v1738_v35 = vld [vmem:[%s2564_s0 + $0x64] ss:$12 sps:$4 sm:$0xff]   ;;  %v1740_v36 = vld [vmem:[%s2564_s0 + $0x25c] ss:$12 sps:$4 sm:$0xff]  }
   0xd   :  { %v1742_v37 = vld [vmem:[%s2564_s0 + $0x60] ss:$12 sps:$4 sm:$0xff]   ;;  %v1743_v38 = vld [vmem:[%s2564_s0 + $0x258] ss:$12 sps:$4 sm:$0xff]   ;;  %v1744_v39 = vld [vmem:[%s2564_s0 + $0x7c] ss:$12 sps:$4 sm:$0xff]  }
   0xe   :  { %783 = vmatpush1.bf16.msra.mxu0 %v1699_v4  ;;  %1682 = vmatpush1.bf16.msra.mxu1 %v1699_v4  ;;  %v1746_v40 = vld [vmem:[%s2564_s0 + $0x274] ss:$12 sps:$4 sm:$0xff]   ;;  %v1748_v41 = vld [vmem:[%s2564_s0 + $0x78] ss:$12 sps:$4 sm:$0xff]   ;;  %v1749_v42 = vld [vmem:[%s2564_s0 + $0x270] ss:$12 sps:$4 sm:$0xff]  }
   0xf   :  { %784 = vmatprep.subr.bf16.mxu0 %v1826_v0  ;;  %1667 = vmatprep.subr.bf16.mxu1 %v1826_v0  ;;  %v1750_v43 = vld [vmem:[%s2564_s0 + $0x94] ss:$12 sps:$4 sm:$0xff]   ;;  %v1752_v44 = vld [vmem:[%s2564_s0 + $0x28c] ss:$12 sps:$4 sm:$0xff]   ;;  %v1754_v45 = vld [vmem:[%s2564_s0 + $0x90] ss:$12 sps:$4 sm:$0xff]  }
  0x10   :  { %v1755_v46 = vld [vmem:[%s2564_s0 + $0x288] ss:$12 sps:$4 sm:$0xff]   ;;  %v1756_v47 = vld [vmem:[%s2564_s0 + $0xac] ss:$12 sps:$4 sm:$0xff]   ;;  %v1761_v51 = vld [vmem:[%s2564_s0 + $0xc4] ss:$12 sps:$4 sm:$0xff]  }
  0x11   :  { %v1758_v48 = vld [vmem:[%s2564_s0 + $0x8] ss:$12 sps:$4 sm:$0xff]   ;;  %v1760_v50 = vld [vmem:[%s2564_s0 + $0x20] ss:$12 sps:$4 sm:$0xff]   ;;  %v1763_v52 = vld [vmem:[%s2564_s0 + $0x38] ss:$12 sps:$4 sm:$0xff]  }
  0x12   :  { %785 = vmatpush1.bf16.msra.mxu0 %v1700_v5  ;;  %1683 = vmatpush1.bf16.msra.mxu1 %v1700_v5  ;;  %v1759_v49 = vld [vmem:[%s2564_s0 + $0xa8] ss:$12 sps:$4 sm:$0xff]   ;;  %v1764_v53 = vld [vmem:[%s2564_s0 + $0xc0] ss:$12 sps:$4 sm:$0xff]   ;;  %v1765_v54 = vld [vmem:[%s2564_s0 + $0x50] ss:$12 sps:$4 sm:$0xff]  }
  0x13   :  { %786 = vmatprep.subr.bf16.mxu0 %v1826_v0  ;;  %1668 = vmatprep.subr.bf16.mxu1 %v1826_v0  ;;  %v1766_v55 = vld [vmem:[%s2564_s0 + $0xdc] ss:$12 sps:$4 sm:$0xff]   ;;  %v1769_v57 = vld [vmem:[%s2564_s0 + $0xd8] ss:$12 sps:$4 sm:$0xff]   ;;  %v1770_v58 = vld [vmem:[%s2564_s0 + $0x80] ss:$12 sps:$4 sm:$0xff]  }
  0x14   :  { %v1768_v56 = vld [vmem:[%s2564_s0 + $0x68] ss:$12 sps:$4 sm:$0xff]   ;;  %v1773_v60 = vld [vmem:[%s2564_s0 + $0x98] ss:$12 sps:$4 sm:$0xff]   ;;  %v1774_v61 = vld [vmem:[%s2564_s0 + $0xf0] ss:$12 sps:$4 sm:$0xff]  }
  0x15   :  { %v1771_v59 = vld [vmem:[%s2564_s0 + $0xf4] ss:$12 sps:$4 sm:$0xff]   ;;  %v1775_v62 = vld [vmem:[%s2564_s0 + $0xb0] ss:$12 sps:$4 sm:$0xff]   ;;  %v1776_v63 = vld [vmem:[%s2564_s0 + $0x10c] ss:$12 sps:$4 sm:$0xff]  }
  0x16   :  { %787 = vmatpush1.bf16.msra.mxu0 %v1701_v7  ;;  %1684 = vmatpush1.bf16.msra.mxu1 %v1701_v7  ;;  %v1779_v1 = vld [vmem:[%s2564_s0 + $0x108] ss:$12 sps:$4 sm:$0xff]   ;;  %v1780_v2 = vld [vmem:[%s2564_s0 + $0xe0] ss:$12 sps:$4 sm:$0xff]   ;;  %v1781_v3 = vld [vmem:[%s2564_s0 + $0x124] ss:$12 sps:$4 sm:$0xff]  }
  0x17   :  { %788 = vmatprep.subr.bf16.mxu0 %v1826_v0  ;;  %1669 = vmatprep.subr.bf16.mxu1 %v1826_v0  ;;  %v1783_v4 = vld [vmem:[%s2564_s0 + $0xf8] ss:$12 sps:$4 sm:$0xff]   ;;  %v1784_v5 = vld [vmem:[%s2564_s0 + $0x120] ss:$12 sps:$4 sm:$0xff]   ;;  %v1785_v6 = vld [vmem:[%s2564_s0 + $0x110] ss:$12 sps:$4 sm:$0xff]  }
  0x18   :  { %v1786_v7 = vld [vmem:[%s2564_s0 + $0x13c] ss:$12 sps:$4 sm:$0xff]  }
  0x19   :  { %v1788_v8 = vld [vmem:[%s2564_s0 + $0x128] ss:$12 sps:$4 sm:$0xff]  }
  0x1a   :  { %789 = vmatpush1.bf16.msra.mxu0 %v1702_v9  ;;  %1685 = vmatpush1.bf16.msra.mxu1 %v1702_v9  ;;  %v1789_v9 = vld [vmem:[%s2564_s0 + $0x138] ss:$12 sps:$4 sm:$0xff]  }
  0x1b   :  { %790 = vmatprep.subr.bf16.mxu0 %v1826_v0  ;;  %1670 = vmatprep.subr.bf16.mxu1 %v1826_v0 }
  0x1e   :  { %791 = vmatpush1.bf16.msra.mxu0 %v1703_v10  ;;  %1686 = vmatpush1.bf16.msra.mxu1 %v1703_v10  ;;  %v1790_v10 = vld [vmem:[%s2564_s0 + $0x140] ss:$12 sps:$4 sm:$0xff]  }
  0x1f   :  { %792 = vmatprep.subr.bf16.mxu0 %v1826_v0  ;;  %1671 = vmatprep.subr.bf16.mxu1 %v1826_v0 }
  0x22   :  { %793 = vmatpush1.bf16.msra.mxu0 %v1704_v11  ;;  %1687 = vmatpush1.bf16.msra.mxu1 %v1704_v11  ;;  %v1791_v11 = vld [vmem:[%s2564_s0 + $0x154] ss:$12 sps:$4 sm:$0xff]  }
  0x23   :  { %794 = vmatprep.subr.bf16.mxu0 %v1826_v0  ;;  %1672 = vmatprep.subr.bf16.mxu1 %v1826_v0 }
  0x26   :  { %795 = vmatpush1.bf16.msra.mxu0 %v1705_v12  ;;  %1688 = vmatpush1.bf16.msra.mxu1 %v1705_v12  ;;  %v1793_v12 = vld [vmem:[%s2564_s0 + $0x158] ss:$12 sps:$4 sm:$0xff]  }
  0x27   :  { %796 = vmatprep.subr.bf16.mxu0 %v1826_v0  ;;  %1673 = vmatprep.subr.bf16.mxu1 %v1826_v0 }
  0x2a   :  { %797 = vmatpush1.bf16.msra.mxu0 %v1706_v13  ;;  %1689 = vmatpush1.bf16.msra.mxu1 %v1706_v13  ;;  %v1794_v13 = vld [vmem:[%s2564_s0 + $0x150] ss:$12 sps:$4 sm:$0xff]  }
  0x2b   :  { %798 = vmatprep.subr.bf16.mxu0 %v1826_v0  ;;  %1674 = vmatprep.subr.bf16.mxu1 %v1826_v0 }
  0x2e   :  { %799 = vmatpush1.bf16.msra.mxu0 %v1707_v14  ;;  %1690 = vmatpush1.bf16.msra.mxu1 %v1707_v14  ;;  %v1795_v14 = vld [vmem:[%s2564_s0 + $0x170] ss:$12 sps:$4 sm:$0xff]  }
  0x2f   :  { %800 = vmatprep.subr.bf16.mxu0 %v1826_v0  ;;  %1675 = vmatprep.subr.bf16.mxu1 %v1826_v0 }
  0x32   :  { %801 = vmatpush1.bf16.msra.mxu0 %v1708_v15  ;;  %1691 = vmatpush1.bf16.msra.mxu1 %v1708_v15  ;;  %v1796_v15 = vld [vmem:[%s2564_s0 + $0x16c] ss:$12 sps:$4 sm:$0xff]  }
  0x33   :  { %802 = vmatprep.subr.bf16.mxu0 %v1826_v0  ;;  %1676 = vmatprep.subr.bf16.mxu1 %v1826_v0 }
  0x36   :  { %803 = vmatpush1.bf16.msra.mxu0 %v1709_v16  ;;  %1692 = vmatpush1.bf16.msra.mxu1 %v1709_v16  ;;  %v1798_v16 = vld [vmem:[%s2564_s0 + $0x188] ss:$12 sps:$4 sm:$0xff]  }
  0x37   :  { %804 = vmatprep.subr.bf16.mxu0 %v1826_v0  ;;  %1677 = vmatprep.subr.bf16.mxu1 %v1826_v0 }
  0x3a   :  { %805 = vmatpush1.bf16.msra.mxu0 %v1710_v17  ;;  %1693 = vmatpush1.bf16.msra.mxu1 %v1710_v17  ;;  %v1799_v17 = vld [vmem:[%s2564_s0 + $0x168] ss:$12 sps:$4 sm:$0xff]  }
  0x3b   :  { %806 = vmatprep.subr.bf16.mxu0 %v1826_v0  ;;  %1678 = vmatprep.subr.bf16.mxu1 %v1826_v0  ;;  %v1778_v0 = vld [vmem:[%s2564_s0 + $0xc8] ss:$12 sps:$4 sm:$0xff]  }
  0x3e   :  { %807 = vmatpush1.bf16.msra.mxu0 %v1711_v18  ;;  %1694 = vmatpush1.bf16.msra.mxu1 %v1711_v18  ;;  %v1800_v18 = vld [vmem:[%s2564_s0 + $0x1a0] ss:$12 sps:$4 sm:$0xff]  }
  0x3f   :  { %1603 = vmatprep.subr.bf16.mxu1 %v1718_v20 }
  0x41   :  { %809 = vmatmul.mubr.bf16.vlgmr.msra.gmra.mrb[0].mxu0 %v1712_v19  ;;  %977 = vmatmul.mubr.bf16.vlgmr.msra.gmra.mrb[0].mxu1 %v1715_v21  ;;  %v1801_v19 = vld [vmem:[%s2564_s0 + $0x184] ss:$12 sps:$4 sm:$0xff]   ;;  %v1804_v21 = vld [vmem:[%s2564_s0 + $0x180] ss:$12 sps:$4 sm:$0xff]  }
  0x42   :  { %1604 = vmatpush3.bf16.msra.mxu1 %v1718_v20  ;;  %816 = vmatprep.mubr.bf16.mxu0 %v1719_v22  ;;  %v1803_v20 = vld [vmem:[%s2564_s0 + $0x1b8] ss:$12 sps:$4 sm:$0xff]   ;;  %v1805_v22 = vld [vmem:[%s2564_s0 + $0x1d0] ss:$12 sps:$4 sm:$0xff]  }
  0x43   :  { %984 = vmatprep.mubr.bf16.mxu1 %v1721_v23  ;;  %1605 = vmatprep.subr.bf16.mxu1 %v1737_v24  ;;  %v1806_v23 = vld [vmem:[%s2564_s0 + $0x19c] ss:$12 sps:$4 sm:$0xff]  }
  0x46   :  { %1606 = vmatpush3.bf16.msra.mxu1 %v1737_v24  ;;  %v1808_v24 = vld [vmem:[%s2564_s0 + $0x1e8] ss:$12 sps:$4 sm:$0xff]  }
  0x49   :  { %817 = vmatmul.mubr.bf16.gmra.mrb[4].mxu0 %v1723_v25  ;;  %985 = vmatmul.mubr.bf16.gmra.mrb[4].mxu1 %v1724_v26  ;;  %v1809_v25 = vld [vmem:[%s2564_s0 + $0x198] ss:$12 sps:$4 sm:$0xff]   ;;  %v1810_v26 = vld [vmem:[%s2564_s0 + $0x200] ss:$12 sps:$4 sm:$0xff]  }
  0x4a   :  { %824 = vmatprep.mubr.bf16.mxu0 %v1725_v27  ;;  %992 = vmatprep.mubr.bf16.mxu1 %v1727_v28  ;;  %v1811_v27 = vld [vmem:[%s2564_s0 + $0x1b4] ss:$12 sps:$4 sm:$0xff]   ;;  %v1813_v28 = vld [vmem:[%s2564_s0 + $0x218] ss:$12 sps:$4 sm:$0xff]  }
  0x51   :  { %825 = vmatmul.mubr.bf16.gmra.mrb[8].mxu0 %v1729_v29  ;;  %993 = vmatmul.mubr.bf16.gmra.mrb[8].mxu1 %v1730_v30  ;;  %v1814_v29 = vld [vmem:[%s2564_s0 + $0x1b0] ss:$12 sps:$4 sm:$0xff]  }
  0x52   :  { %832 = vmatprep.mubr.bf16.mxu0 %v1731_v31  ;;  %1000 = vmatprep.mubr.bf16.mxu1 %v1733_v32  ;;  %v1815_v30 = vld [vmem:[%s2564_s0 + $0x230] ss:$12 sps:$4 sm:$0xff]   ;;  %v1816_v31 = vld [vmem:[%s2564_s0 + $0x1cc] ss:$12 sps:$4 sm:$0xff]   ;;  %v1818_v32 = vld [vmem:[%s2564_s0 + $0x248] ss:$12 sps:$4 sm:$0xff]  }
  0x59   :  { %833 = vmatmul.mubr.bf16.gmra.mrb[12].mxu0 %v1735_v33  ;;  %1001 = vmatmul.mubr.bf16.gmra.mrb[12].mxu1 %v1736_v34  ;;  %v1819_v33 = vld [vmem:[%s2564_s0 + $0x1c8] ss:$12 sps:$4 sm:$0xff]   ;;  %v1820_v34 = vld [vmem:[%s2564_s0 + $0x260] ss:$12 sps:$4 sm:$0xff]  }
  0x5a   :  { %840 = vmatprep.mubr.bf16.mxu0 %v1738_v35  ;;  %1008 = vmatprep.mubr.bf16.mxu1 %v1740_v36  ;;  %v1821_v35 = vld [vmem:[%s2564_s0 + $0x1e4] ss:$12 sps:$4 sm:$0xff]  }
  0x5b   :  { %v1823_v36 = vld [vmem:[%s2564_s0 + $0x278] ss:$12 sps:$4 sm:$0xff]  }
  0x61   :  { %841 = vmatmul.mubr.bf16.gmra.mrb[16].mxu0 %v1742_v37  ;;  %1009 = vmatmul.mubr.bf16.gmra.mrb[16].mxu1 %v1743_v38  ;;  %v1824_v37 = vld [vmem:[%s2564_s0 + $0x1e0] ss:$12 sps:$4 sm:$0xff]   ;;  %v1825_v38 = vld [vmem:[%s2564_s0 + $0x290] ss:$12 sps:$4 sm:$0xff]  }
  0x62   :  { %848 = vmatprep.mubr.bf16.mxu0 %v1744_v39  ;;  %1016 = vmatprep.mubr.bf16.mxu1 %v1746_v40 }
  0x69   :  { %849 = vmatmul.mubr.bf16.gmra.mrb[20].mxu0 %v1748_v41  ;;  %1017 = vmatmul.mubr.bf16.gmra.mrb[20].mxu1 %v1749_v42 }
  0x6a   :  { %856 = vmatprep.mubr.bf16.mxu0 %v1750_v43  ;;  %1024 = vmatprep.mubr.bf16.mxu1 %v1752_v44 }
  0x71   :  { %857 = vmatmul.mubr.bf16.gmra.mrb[24].mxu0 %v1754_v45  ;;  %1025 = vmatmul.mubr.bf16.gmra.mrb[24].mxu1 %v1755_v46 }
  0x72   :  { %864 = vmatprep.mubr.bf16.mxu0 %v1756_v47  ;;  %1607 = vmatprep.mubr.msk.bf16.mxu1 %vm691_vm0, %v1758_v48 }
  0x79   :  { %865 = vmatmul.mubr.bf16.gmra.mrb[28].mxu0 %v1759_v49  ;;  %1608 = vmatmul.mubr.msk.bf16.vlgmr.msra.gmra.mrb[28].mxu1 %vm691_vm0, %v1760_v50 }
  0x7a   :  { %872 = vmatprep.mubr.bf16.mxu0 %v1761_v51  ;;  %1611 = vmatprep.mubr.msk.bf16.mxu1 %vm691_vm0, %v1763_v52 }
  0x81   :  { %873 = vmatmul.mubr.bf16.gmra.mrb[32].mxu0 %v1764_v53  ;;  %1612 = vmatmul.mubr.msk.bf16.gmra.mrb[32].mxu1 %vm691_vm0, %v1765_v54 }
  0x82   :  { %880 = vmatprep.mubr.bf16.mxu0 %v1766_v55  ;;  %1615 = vmatprep.mubr.msk.bf16.mxu1 %vm691_vm0, %v1768_v56 }
  0x89   :  { %881 = vmatmul.mubr.bf16.gmra.mrb[36].mxu0 %v1769_v57  ;;  %1616 = vmatmul.mubr.msk.bf16.gmra.mrb[36].mxu1 %vm691_vm0, %v1770_v58 }
  0x8a   :  { %888 = vmatprep.mubr.bf16.mxu0 %v1771_v59  ;;  %1619 = vmatprep.mubr.msk.bf16.mxu1 %vm691_vm0, %v1773_v60 }
  0x91   :  { %889 = vmatmul.mubr.bf16.gmra.mrb[40].mxu0 %v1774_v61  ;;  %1620 = vmatmul.mubr.msk.bf16.gmra.mrb[40].mxu1 %vm691_vm0, %v1775_v62 }
  0x92   :  { %896 = vmatprep.mubr.bf16.mxu0 %v1776_v63  ;;  %1623 = vmatprep.mubr.msk.bf16.mxu1 %vm691_vm0, %v1778_v0 }
  0x99   :  { %897 = vmatmul.mubr.bf16.gmra.mrb[44].mxu0 %v1779_v1  ;;  %1624 = vmatmul.mubr.msk.bf16.gmra.mrb[44].mxu1 %vm691_vm0, %v1780_v2 }
  0x9a   :  { %904 = vmatprep.mubr.bf16.mxu0 %v1781_v3  ;;  %1627 = vmatprep.mubr.msk.bf16.mxu1 %vm691_vm0, %v1783_v4 }
  0xa1   :  { %905 = vmatmul.mubr.bf16.gmra.mrb[48].mxu0 %v1784_v5  ;;  %1628 = vmatmul.mubr.msk.bf16.gmra.mrb[48].mxu1 %vm691_vm0, %v1785_v6 }
  0xa2   :  { %912 = vmatprep.mubr.bf16.mxu0 %v1786_v7  ;;  %1631 = vmatprep.mubr.msk.bf16.mxu1 %vm691_vm0, %v1788_v8 }
  0xa9   :  { %913 = vmatmul.mubr.bf16.gmra.mrb[52].mxu0 %v1789_v9  ;;  %1632 = vmatmul.mubr.msk.bf16.gmra.mrb[52].mxu1 %vm691_vm0, %v1790_v10 }
  0xaa   :  { %920 = vmatprep.mubr.bf16.mxu0 %v1791_v11  ;;  %1635 = vmatprep.mubr.msk.bf16.mxu1 %vm691_vm0, %v1793_v12 }
  0xb1   :  { %921 = vmatmul.mubr.bf16.gmra.mrb[56].mxu0 %v1794_v13  ;;  %1636 = vmatmul.mubr.msk.bf16.gmra.mrb[56].mxu1 %vm691_vm0, %v1795_v14 }
  0xb2   :  { %928 = vmatprep.mubr.bf16.mxu0 %v1796_v15  ;;  %1639 = vmatprep.mubr.msk.bf16.mxu1 %vm691_vm0, %v1798_v16 }
  0xb9   :  { %929 = vmatmul.mubr.bf16.gmra.mrb[60].mxu0 %v1799_v17  ;;  %1640 = vmatmul.mubr.msk.bf16.gmra.mrb[60].mxu1 %vm691_vm0, %v1800_v18 }
  0xba   :  { %936 = vmatprep.mubr.bf16.mxu0 %v1801_v19  ;;  %1643 = vmatprep.mubr.msk.bf16.mxu1 %vm691_vm0, %v1803_v20 }
  0xc1   :  { %937 = vmatmul.mubr.bf16.gmra.mrb[64].mxu0 %v1804_v21  ;;  %1644 = vmatmul.mubr.msk.bf16.gmra.mrb[64].mxu1 %vm691_vm0, %v1805_v22 }
  0xc2   :  { %944 = vmatprep.mubr.bf16.mxu0 %v1806_v23  ;;  %1647 = vmatprep.mubr.msk.bf16.mxu1 %vm691_vm0, %v1808_v24 }
  0xc9   :  { %945 = vmatmul.mubr.bf16.gmra.mrb[68].mxu0 %v1809_v25  ;;  %1648 = vmatmul.mubr.msk.bf16.gmra.mrb[68].mxu1 %vm691_vm0, %v1810_v26 }
  0xca   :  { %952 = vmatprep.mubr.bf16.mxu0 %v1811_v27  ;;  %1651 = vmatprep.mubr.msk.bf16.mxu1 %vm691_vm0, %v1813_v28 }
  0xd1   :  { %953 = vmatmul.mubr.bf16.gmra.mrb[72].mxu0 %v1814_v29  ;;  %1652 = vmatmul.mubr.msk.bf16.gmra.mrb[72].mxu1 %vm691_vm0, %v1815_v30 }
  0xd2   :  { %960 = vmatprep.mubr.bf16.mxu0 %v1816_v31  ;;  %1655 = vmatprep.mubr.msk.bf16.mxu1 %vm691_vm0, %v1818_v32 }
  0xd9   :  { %961 = vmatmul.mubr.bf16.gmra.mrb[76].mxu0 %v1819_v33  ;;  %1656 = vmatmul.mubr.msk.bf16.gmra.mrb[76].mxu1 %vm691_vm0, %v1820_v34 }
  0xda   :  { %968 = vmatprep.mubr.bf16.mxu0 %v1821_v35  ;;  %1659 = vmatprep.mubr.msk.bf16.mxu1 %vm691_vm0, %v1823_v36 }
  0xe1   :  { %969 = vmatmul.mubr.bf16.gmra.mrb[80].mxu0 %v1824_v37  ;;  %1660 = vmatmul.mubr.msk.bf16.gmra.mrb[80].mxu1 %vm691_vm0, %v1825_v38 }
 0x114   :  { %v810_v39 = vpop.f32.mrb[0].mxu0  ;;  %v2213_v40 = vpop.f32.mrb[0].mxu1 }
 0x115   :  { %v812_v41 = vpop.f32.mrb[1].mxu0  ;;  %v980_v42 = vpop.f32.mrb[1].mxu1 }
 0x116   :  { %v2215_v43 = vpop.f32.mrb[2].mxu0  ;;  %v2217_v44 = vpop.f32.mrb[2].mxu1 }
 0x117   :  { %v815_v45 = vpop.f32.mrb[3].mxu0  ;;  %v983_v46 = vpop.f32.mrb[3].mxu1 }
 0x11c   :  { %v818_v47 = vpop.f32.mrb[4].mxu0  ;;  %v2219_v48 = vpop.f32.mrb[4].mxu1 }
 0x11d   :  { %v820_v49 = vpop.f32.mrb[5].mxu0  ;;  %v988_v50 = vpop.f32.mrb[5].mxu1 }
 0x11e   :  { %v821_v51 = vpop.f32.mrb[6].mxu0  ;;  %v2221_v52 = vpop.f32.mrb[6].mxu1 }
 0x11f   :  { %v823_v53 = vpop.f32.mrb[7].mxu0  ;;  %v991_v54 = vpop.f32.mrb[7].mxu1 }
 0x124   :  { %v826_v55 = vpop.f32.mrb[8].mxu0  ;;  %v2223_v56 = vpop.f32.mrb[8].mxu1 }
 0x125   :  { %v828_v57 = vpop.f32.mrb[9].mxu0  ;;  %v996_v58 = vpop.f32.mrb[9].mxu1 }
 0x126   :  { %v829_v59 = vpop.f32.mrb[10].mxu0  ;;  %v2225_v60 = vpop.f32.mrb[10].mxu1 }
 0x127   :  { %v831_v61 = vpop.f32.mrb[11].mxu0  ;;  %v999_v62 = vpop.f32.mrb[11].mxu1 }
 0x12c   :  { %v834_v63 = vpop.f32.mrb[12].mxu0  ;;  %v2227_v0 = vpop.f32.mrb[12].mxu1 }
 0x12d   :  { %v836_v1 = vpop.f32.mrb[13].mxu0  ;;  %v1004_v2 = vpop.f32.mrb[13].mxu1 }
 0x12e   :  { %v837_v3 = vpop.f32.mrb[14].mxu0  ;;  %v2229_v4 = vpop.f32.mrb[14].mxu1 }
 0x12f   :  { %v839_v5 = vpop.f32.mrb[15].mxu0  ;;  %v1007_v6 = vpop.f32.mrb[15].mxu1 }
 0x134   :  { %v842_v7 = vpop.f32.mrb[16].mxu0  ;;  %v2231_v8 = vpop.f32.mrb[16].mxu1 }
 0x135   :  { %v844_v9 = vpop.f32.mrb[17].mxu0  ;;  %v1012_v10 = vpop.f32.mrb[17].mxu1 }
 0x136   :  { %v845_v11 = vpop.f32.mrb[18].mxu0  ;;  %v2233_v12 = vpop.f32.mrb[18].mxu1 }
 0x137   :  { %v847_v13 = vpop.f32.mrb[19].mxu0  ;;  %v1015_v14 = vpop.f32.mrb[19].mxu1 }
 0x13c   :  { %v850_v15 = vpop.f32.mrb[20].mxu0  ;;  %v2235_v16 = vpop.f32.mrb[20].mxu1 }
 0x13d   :  { %v852_v17 = vpop.f32.mrb[21].mxu0  ;;  %v1020_v18 = vpop.f32.mrb[21].mxu1 }
 0x13e   :  { %v853_v19 = vpop.f32.mrb[22].mxu0  ;;  %v2237_v20 = vpop.f32.mrb[22].mxu1 }
 0x13f   :  { %v855_v21 = vpop.f32.mrb[23].mxu0  ;;  %v1023_v22 = vpop.f32.mrb[23].mxu1 }
 0x144   :  { %v858_v23 = vpop.f32.mrb[24].mxu0  ;;  %v2239_v24 = vpop.f32.mrb[24].mxu1 }
 0x145   :  { %v860_v25 = vpop.f32.mrb[25].mxu0  ;;  %v1028_v26 = vpop.f32.mrb[25].mxu1 }
 0x146   :  { %v861_v27 = vpop.f32.mrb[26].mxu0  ;;  %v2241_v28 = vpop.f32.mrb[26].mxu1 }
 0x147   :  { %v863_v29 = vpop.f32.mrb[27].mxu0  ;;  %v1031_v30 = vpop.f32.mrb[27].mxu1 }
 0x14c   :  { %v866_v31 = vpop.f32.mrb[28].mxu0  ;;  %v1609_v32 = vpop.f32.mrb[28].mxu1 }
 0x14d   :  { %v2243_v33 = vadd.f32 %v1609_v32, %v818_v47  ;;  %v868_v34 = vpop.f32.mrb[29].mxu0  ;;  %v1067_v35 = vpop.f32.mrb[29].mxu1 }
 0x14e   :  { %v1068_v36 = vadd.f32 %v1067_v35, %v810_v39  ;;  %v869_v37 = vpop.f32.mrb[30].mxu0  ;;  %v1610_v38 = vpop.f32.mrb[30].mxu1 }
 0x14f   :  { %v2245_v41 = vadd.f32 %v1610_v38, %v821_v51  ;;  %v871_v42 = vpop.f32.mrb[31].mxu0  ;;  %v1070_v45 = vpop.f32.mrb[31].mxu1 }
 0x150   :  { %v1071_v46 = vadd.f32 %v1070_v45, %v2215_v43  ;;  %v2259_v30 = vsel %vm1290_vm1, %v1068_v36, -inf }
 0x154   :  { %v874_v49 = vpop.f32.mrb[32].mxu0  ;;  %v1613_v50 = vpop.f32.mrb[32].mxu1 }
 0x155   :  { %v2248_v53 = vadd.f32 %v1613_v50, %v834_v63  ;;  %v876_v54 = vpop.f32.mrb[33].mxu0  ;;  %v1083_v57 = vpop.f32.mrb[33].mxu1 }
 0x156   :  { %v1084_v58 = vadd.f32 %v1083_v57, %v826_v55  ;;  %v877_v47 = vpop.f32.mrb[34].mxu0  ;;  %v1614_v61 = vpop.f32.mrb[34].mxu1 }
 0x157   :  { %v2250_v62 = vadd.f32 %v1614_v61, %v837_v3  ;;  %v879_v39 = vpop.f32.mrb[35].mxu0  ;;  %v1086_v1 = vpop.f32.mrb[35].mxu1 }
 0x158   :  { %v1087_v2 = vadd.f32 %v1086_v1, %v829_v59 }
 0x15c   :  { %v882_v51 = vpop.f32.mrb[36].mxu0  ;;  %v1617_v5 = vpop.f32.mrb[36].mxu1 }
 0x15d   :  { %v2252_v6 = vadd.f32 %v1617_v5, %v850_v15  ;;  %v884_v9 = vpop.f32.mrb[37].mxu0  ;;  %v1099_v43 = vpop.f32.mrb[37].mxu1 }
 0x15e   :  { %v1100_v10 = vadd.f32 %v1099_v43, %v842_v7  ;;  %v885_v13 = vpop.f32.mrb[38].mxu0  ;;  %v1618_v63 = vpop.f32.mrb[38].mxu1  ;;  %v2284_v9 = vsel %vm1290_vm1, %v2243_v33, -inf  ;;  %v2301_v33 = vsel %vm1290_vm1, %v2245_v41, -inf }
 0x15f   :  { %v2254_v14 = vadd.f32 %v1618_v63, %v853_v19  ;;  %v887_v17 = vpop.f32.mrb[39].mxu0  ;;  %v1102_v55 = vpop.f32.mrb[39].mxu1 }
 0x160   :  { %v1103_v18 = vadd.f32 %v1102_v55, %v845_v11  ;;  %v2311_v41 = vsel %vm1290_vm1, %v1100_v10, -inf }
 0x162   :  { %v2326_v10 = vsel %vm1290_vm1, %v1103_v18, -inf }
 0x164   :  { %v890_v3 = vpop.f32.mrb[40].mxu0  ;;  %v1621_v21 = vpop.f32.mrb[40].mxu1 }
 0x165   :  { %v1124_v22 = vadd.f32 %v1621_v21, %v866_v31  ;;  %v892_v25 = vpop.f32.mrb[41].mxu0  ;;  %v1115_v59 = vpop.f32.mrb[41].mxu1  ;;  %v2269_v31 = vsel %vm1290_vm1, %v1071_v46, -inf }
 0x166   :  { %v2256_v26 = vadd.f32 %v1115_v59, %v858_v23  ;;  %v893_v15 = vpop.f32.mrb[42].mxu0  ;;  %v1622_v29 = vpop.f32.mrb[42].mxu1 }
 0x167   :  { %v2262_v7 = vsel %vm1290_vm1, %v1124_v22, -inf  ;;  %v1127_v19 = vadd.f32 %v1622_v29, %v869_v37  ;;  %v895_v32 = vpop.f32.mrb[43].mxu0  ;;  %v1118_v34 = vpop.f32.mrb[43].mxu1 }
 0x168   :  { %v1293_v11 = vmax.f32 %v2259_v30, %v2262_v7  ;;  %v2266_v35 = vadd.f32 %v1118_v34, %v861_v27  ;;  %v2277_v27 = vsel %vm1290_vm1, %v1084_v58, -inf  ;;  %v2292_v58 = vsel %vm1290_vm1, %v1087_v2, -inf }
 0x169   :  { %v2272_v23 = vsel %vm1290_vm1, %v1127_v19, -inf }
 0x16a   :  { %v1300_v36 = vmax.f32 %v2269_v31, %v2272_v23 }
 0x16c   :  { %v898_v38 = vpop.f32.mrb[44].mxu0  ;;  %v1625_v42 = vpop.f32.mrb[44].mxu1 }
 0x16d   :  { %v1140_v45 = vadd.f32 %v1625_v42, %v882_v51  ;;  %v900_v37 = vpop.f32.mrb[45].mxu0  ;;  %v1131_v50 = vpop.f32.mrb[45].mxu1 }
 0x16e   :  { %v1132_v54 = vadd.f32 %v1131_v50, %v874_v49  ;;  %v901_v57 = vpop.f32.mrb[46].mxu0  ;;  %v1626_v61 = vpop.f32.mrb[46].mxu1  ;;  %v2318_v50 = vsel %vm1290_vm1, %v2248_v53, -inf  ;;  %v2335_v53 = vsel %vm1290_vm1, %v2250_v62, -inf  ;;  %v2346_v62 = vsel %vm1290_vm1, %v2256_v26, -inf }
 0x16f   :  { %v2280_v46 = vsel %vm1290_vm1, %v1140_v45, -inf  ;;  %v1143_v39 = vadd.f32 %v1626_v61, %v885_v13  ;;  %v903_v1 = vpop.f32.mrb[47].mxu0  ;;  %v1134_v5 = vpop.f32.mrb[47].mxu1  ;;  %v2362_v26 = vsel %vm1290_vm1, %v2266_v35, -inf }
 0x170   :  { %v2289_v49 = vsel %vm1290_vm1, %v1132_v54, -inf  ;;  %v1135_v43 = vadd.f32 %v1134_v5, %v877_v47 }
 0x171   :  { %v1307_v63 = vmax.f32 %v2284_v9, %v2289_v49  ;;  %v2297_v13 = vsel %vm1290_vm1, %v1143_v39, -inf }
 0x172   :  { %v2306_v55 = vsel %vm1290_vm1, %v1135_v43, -inf }
 0x173   :  { %v1314_v47 = vmax.f32 %v2301_v33, %v2306_v55 }
 0x174   :  { %v906_v2 = vpop.f32.mrb[48].mxu0  ;;  %v1629_v21 = vpop.f32.mrb[48].mxu1 }
 0x175   :  { %v1156_v22 = vadd.f32 %v1629_v21, %v898_v38  ;;  %v908_v25 = vpop.f32.mrb[49].mxu0  ;;  %v1147_v59 = vpop.f32.mrb[49].mxu1 }
 0x176   :  { %v1148_v29 = vadd.f32 %v1147_v59, %v890_v3  ;;  %v909_v19 = vpop.f32.mrb[50].mxu0  ;;  %v1630_v32 = vpop.f32.mrb[50].mxu1 }
 0x177   :  { %v2314_v34 = vsel %vm1290_vm1, %v1156_v22, -inf  ;;  %v1159_v42 = vadd.f32 %v1630_v32, %v901_v57  ;;  %v911_v45 = vpop.f32.mrb[51].mxu0  ;;  %v1150_v37 = vpop.f32.mrb[51].mxu1 }
 0x178   :  { %v2323_v3 = vsel %vm1290_vm1, %v1148_v29, -inf  ;;  %v1151_v54 = vadd.f32 %v1150_v37, %v893_v15 }
 0x179   :  { %v2331_v57 = vsel %vm1290_vm1, %v1159_v42, -inf }
 0x17a   :  { %v2340_v1 = vsel %vm1290_vm1, %v1151_v54, -inf  ;;  %v2353_v54 = vsel %vm1290_vm1, %v2252_v6, -inf  ;;  %v2371_v6 = vsel %vm1290_vm1, %v2254_v14, -inf }
 0x17c   :  { %v914_v15 = vpop.f32.mrb[52].mxu0  ;;  %v1633_v5 = vpop.f32.mrb[52].mxu1 }
 0x17d   :  { %v1172_v43 = vadd.f32 %v1633_v5, %v914_v15  ;;  %v916_v21 = vpop.f32.mrb[53].mxu0  ;;  %v1163_v22 = vpop.f32.mrb[53].mxu1 }
 0x17e   :  { %v1164_v25 = vadd.f32 %v1163_v22, %v906_v2  ;;  %v917_v59 = vpop.f32.mrb[54].mxu0  ;;  %v1634_v29 = vpop.f32.mrb[54].mxu1 }
 0x17f   :  { %v2349_v32 = vsel %vm1290_vm1, %v1172_v43, -inf  ;;  %v1175_v42 = vadd.f32 %v1634_v29, %v917_v59  ;;  %v919_v45 = vpop.f32.mrb[55].mxu0  ;;  %v1166_v37 = vpop.f32.mrb[55].mxu1 }
 0x180   :  { %v2358_v2 = vsel %vm1290_vm1, %v1164_v25, -inf  ;;  %v1167_v5 = vadd.f32 %v1166_v37, %v909_v19 }
 0x181   :  { %v2367_v21 = vsel %vm1290_vm1, %v1175_v42, -inf }
 0x182   :  { %v2376_v25 = vsel %vm1290_vm1, %v1167_v5, -inf }
 0x184   :  { %v922_v19 = vpop.f32.mrb[56].mxu0  ;;  %v1637_v59 = vpop.f32.mrb[56].mxu1 }
 0x185   :  { %v924_v29 = vpop.f32.mrb[57].mxu0  ;;  %v1179_v45 = vpop.f32.mrb[57].mxu1 }
 0x186   :  { %v1180_v37 = vadd.f32 %v1179_v45, %v922_v19  ;;  %v925_v42 = vpop.f32.mrb[58].mxu0  ;;  %v1638_v15 = vpop.f32.mrb[58].mxu1 }
 0x187   :  { %v927_v43 = vpop.f32.mrb[59].mxu0  ;;  %v1182_v39 = vpop.f32.mrb[59].mxu1 }
 0x188   :  { %v1294_v14 = vsel %vm1290_vm1, %v1180_v37, -inf  ;;  %v1183_v38 = vadd.f32 %v1182_v39, %v925_v42 }
 0x189   :  { %v1295_v5 = vmax.f32 %v1293_v11, %v1294_v14 }
 0x18a   :  { %v1301_v22 = vsel %vm1290_vm1, %v1183_v38, -inf }
 0x18b   :  { %v1302_v35 = vmax.f32 %v1300_v36, %v1301_v22 }
 0x18c   :  { %v930_v29 = vpop.f32.mrb[60].mxu0  ;;  %v1641_v18 = vpop.f32.mrb[60].mxu1 }
 0x18d   :  { %v1188_v19 = vadd.f32 %v1637_v59, %v930_v29  ;;  %v932_v45 = vpop.f32.mrb[61].mxu0  ;;  %v1195_v61 = vpop.f32.mrb[61].mxu1  ;;  %v2567_v29 = vmax.f32 %v2277_v27, %v2280_v46  ;;  %v2420_v46 = vld [vmem:[%s2565_s2] ss:$0 sm:$0xff] }
 0x18e   :  { %v933_v43 = vpop.f32.mrb[62].mxu0  ;;  %v1642_v17 = vpop.f32.mrb[62].mxu1 }
 0x18f   :  { %v1308_v37 = vsel %vm1290_vm1, %v1188_v19, -inf  ;;  %v1191_v39 = vadd.f32 %v1638_v15, %v933_v43  ;;  %v935_v42 = vpop.f32.mrb[63].mxu0  ;;  %v1198_v51 = vpop.f32.mrb[63].mxu1 }
 0x190   :  { %v2392_v30 = vmax.f32 %v1307_v63, %v1308_v37 }
 0x191   :  { %v1315_v7 = vsel %vm1290_vm1, %v1191_v39, -inf }
 0x192   :  { %v2398_v11 = vmax.f32 %v1314_v47, %v1315_v7  ;;  %v2568_v47 = vmax.f32 %v2292_v58, %v2297_v13 }
 0x194   :  { %v938_v31 = vpop.f32.mrb[64].mxu0  ;;  %v2400_v23 = vpop.f32.mrb[64].mxu1 }
 0x195   :  { %v1196_v36 = vadd.f32 %v1195_v61, %v938_v31  ;;  %v940_v38 = vpop.f32.mrb[65].mxu0  ;;  %v1211_v15 = vpop.f32.mrb[65].mxu1 }
 0x196   :  { %v941_v22 = vpop.f32.mrb[66].mxu0  ;;  %v2402_v59 = vpop.f32.mrb[66].mxu1 }
 0x197   :  { %v1322_v9 = vsel %vm1290_vm1, %v1196_v36, -inf  ;;  %v1199_v49 = vadd.f32 %v1198_v51, %v941_v22  ;;  %v943_v63 = vpop.f32.mrb[67].mxu0  ;;  %v1214_v14 = vpop.f32.mrb[67].mxu1 }
 0x198   :  { %v1323_v33 = vmax.f32 %v2567_v29, %v1322_v9 }
 0x199   :  { %v1329_v55 = vsel %vm1290_vm1, %v1199_v49, -inf }
 0x19a   :  { %v1330_v61 = vmax.f32 %v2568_v47, %v1329_v55 }
 0x19c   :  { %v946_v19 = vpop.f32.mrb[68].mxu0  ;;  %v1649_v45 = vpop.f32.mrb[68].mxu1 }
 0x19d   :  { %v1204_v43 = vadd.f32 %v1641_v18, %v946_v19  ;;  %v1236_v37 = vadd.f32 %v1649_v45, %v2213_v40  ;;  %v948_v39 = vpop.f32.mrb[69].mxu0  ;;  %v2413_v42 = vpop.f32.mrb[69].mxu1  ;;  %v2569_v40 = vmax.f32 %v2318_v50, %v2323_v3 }
 0x19e   :  { %v949_v51 = vpop.f32.mrb[70].mxu0  ;;  %v1650_v7 = vpop.f32.mrb[70].mxu1 }
 0x19f   :  { %v1336_v31 = vsel %vm1290_vm1, %v1204_v43, -inf  ;;  %v1296_v27 = vsel %vm1290_vm1, %v1236_v37, -inf  ;;  %v1207_v58 = vadd.f32 %v1642_v17, %v949_v51  ;;  %v1239_v13 = vadd.f32 %v1650_v7, %v2217_v44  ;;  %v951_v18 = vpop.f32.mrb[71].mxu0  ;;  %v2423_v36 = vpop.f32.mrb[71].mxu1 }
 0x1a0   :  { %v2428_v38 = vmax.f32 %v2569_v40, %v1336_v31  ;;  %v1297_v22 = vmax.f32 %v1295_v5, %v1296_v27  ;;  %v2570_v17 = vmax.f32 %v2335_v53, %v2340_v1  ;;  %v2571_v27 = vmax.f32 %v2311_v41, %v2314_v34 }
 0x1a1   :  { %v1343_v9 = vsel %vm1290_vm1, %v1207_v58, -inf  ;;  %v1303_v49 = vsel %vm1290_vm1, %v1239_v13, -inf }
 0x1a2   :  { %v1396_v63 = vadd.f32 %v2420_v46, %v1297_v22  ;;  %v2436_v29 = vmax.f32 %v2570_v17, %v1343_v9  ;;  %v1304_v44 = vmax.f32 %v1302_v35, %v1303_v49  ;;  %v2572_v9 = vmax.f32 %v2326_v10, %v2331_v57 }
 0x1a4   :  { %v1410_v55 = vmax.f32 %v1396_v63, 0.0  ;;  %v1397_v47 = vadd.f32 %v2420_v46, %v1304_v44  ;;  %v954_v19 = vpop.f32.mrb[72].mxu0  ;;  %v1653_v50 = vpop.f32.mrb[72].mxu1 }
 0x1a5   :  { %v1212_v3 = vadd.f32 %v1211_v15, %v954_v19  ;;  %v1252_v5 = vadd.f32 %v1653_v50, %v2223_v56  ;;  %v956_v45 = vpop.f32.mrb[73].mxu0  ;;  %v1243_v43 = vpop.f32.mrb[73].mxu1 }
 0x1a6   :  { %1424 = vst.msk [vmem:[%s2566_s3] sm:$0xff] %vm1290_vm1, %v1410_v55  ;;  %v1411_v37 = vmax.f32 %v1397_v47, 0.0  ;;  %v1244_v53 = vadd.f32 %v1243_v43, %v2219_v48  ;;  %v957_v1 = vpop.f32.mrb[74].mxu0  ;;  %v1654_v35 = vpop.f32.mrb[74].mxu1 }
 0x1a7   :  { %v1350_v39 = vsel %vm1290_vm1, %v1212_v3, -inf  ;;  %v1324_v51 = vsel %vm1290_vm1, %v1252_v5, -inf  ;;  %v1215_v7 = vadd.f32 %v1214_v14, %v957_v1  ;;  %v1255_v15 = vadd.f32 %v1654_v35, %v2225_v60  ;;  %v959_v56 = vpop.f32.mrb[75].mxu0  ;;  %v1246_v31 = vpop.f32.mrb[75].mxu1 }
 0x1a8   :  { %1425 = vst.msk [vmem:[%s2566_s3 + $0x8] sm:$0xff] %vm1290_vm1, %v1411_v37  ;;  %v1351_v48 = vmax.f32 %v2571_v27, %v1350_v39  ;;  %v1325_v58 = vmax.f32 %v1323_v33, %v1324_v51  ;;  %v1310_v13 = vsel %vm1290_vm1, %v1244_v53, -inf  ;;  %v1247_v18 = vadd.f32 %v1246_v31, %v2221_v52 }
 0x1a9   :  { %v1311_v14 = vmax.f32 %v2392_v30, %v1310_v13  ;;  %v1357_v60 = vsel %vm1290_vm1, %v1215_v7, -inf  ;;  %v1331_v40 = vsel %vm1290_vm1, %v1255_v15, -inf }
 0x1aa   :  { %v1400_v22 = vadd.f32 %v2420_v46, %v1325_v58  ;;  %v1358_v49 = vmax.f32 %v2572_v9, %v1357_v60  ;;  %v1332_v63 = vmax.f32 %v1330_v61, %v1331_v40  ;;  %v1317_v41 = vsel %vm1290_vm1, %v1247_v18, -inf }
 0x1ab   :  { %v1398_v34 = vadd.f32 %v2420_v46, %v1311_v14  ;;  %v1318_v33 = vmax.f32 %v2398_v11, %v1317_v41 }
 0x1ac   :  { %v1414_v52 = vmax.f32 %v1400_v22, 0.0  ;;  %v1401_v30 = vadd.f32 %v2420_v46, %v1332_v63  ;;  %v962_v17 = vpop.f32.mrb[76].mxu0  ;;  %v1657_v44 = vpop.f32.mrb[76].mxu1 }
 0x1ad   :  { %v1412_v55 = vmax.f32 %v1398_v34, 0.0  ;;  %v1399_v47 = vadd.f32 %v2420_v46, %v1318_v33  ;;  %v1220_v19 = vadd.f32 %v2400_v23, %v962_v17  ;;  %v1268_v10 = vadd.f32 %v1657_v44, %v2231_v8  ;;  %v964_v57 = vpop.f32.mrb[77].mxu0  ;;  %v1259_v61 = vpop.f32.mrb[77].mxu1 }
 0x1ae   :  { %1428 = vst.msk [vmem:[%s2566_s3 + $0x20] sm:$0xff] %vm1290_vm1, %v1414_v52  ;;  %v1415_v11 = vmax.f32 %v1401_v30, 0.0  ;;  %v1260_v50 = vadd.f32 %v1259_v61, %v2227_v0  ;;  %v965_v3 = vpop.f32.mrb[78].mxu0  ;;  %v1658_v5 = vpop.f32.mrb[78].mxu1  ;;  %v2573_v0 = vmax.f32 %v2353_v54, %v2358_v2  ;;  %v2574_v54 = vmax.f32 %v2371_v6, %v2376_v25 }
 0x1af   :  { %1426 = vst.msk [vmem:[%s2566_s3 + $0x10] sm:$0xff] %vm1290_vm1, %v1412_v55  ;;  %v1413_v23 = vmax.f32 %v1399_v47, 0.0  ;;  %v1364_v8 = vsel %vm1290_vm1, %v1220_v19, -inf  ;;  %v1352_v45 = vsel %vm1290_vm1, %v1268_v10, -inf  ;;  %v1223_v43 = vadd.f32 %v2402_v59, %v965_v3  ;;  %v967_v37 = vpop.f32.mrb[79].mxu0  ;;  %v1262_v53 = vpop.f32.mrb[79].mxu1 }
 0x1b0   :  { %1429 = vst.msk [vmem:[%s2566_s3 + $0x28] sm:$0xff] %vm1290_vm1, %v1415_v11  ;;  %v1365_v1 = vmax.f32 %v2573_v0, %v1364_v8  ;;  %v1353_v35 = vmax.f32 %v1351_v48, %v1352_v45  ;;  %v1338_v39 = vsel %vm1290_vm1, %v1260_v50, -inf  ;;  %v1271_v51 = vadd.f32 %v1658_v5, %v2233_v12 }
 0x1b1   :  { %1427 = vst.msk [vmem:[%s2566_s3 + $0x18] sm:$0xff] %vm1290_vm1, %v1413_v23  ;;  %v1339_v59 = vmax.f32 %v2428_v38, %v1338_v39  ;;  %v1371_v7 = vsel %vm1290_vm1, %v1223_v43, -inf  ;;  %v1263_v15 = vadd.f32 %v1262_v53, %v2229_v4  ;;  %v2575_v52 = vmax.f32 %v2346_v62, %v2349_v32 }
 0x1b2   :  { %v1404_v56 = vadd.f32 %v2420_v46, %v1353_v35  ;;  %v1372_v2 = vmax.f32 %v2574_v54, %v1371_v7  ;;  %v1359_v31 = vsel %vm1290_vm1, %v1271_v51, -inf }
 0x1b3   :  { %v1402_v12 = vadd.f32 %v2420_v46, %v1339_v59  ;;  %v1360_v27 = vmax.f32 %v1358_v49, %v1359_v31  ;;  %v1345_v48 = vsel %vm1290_vm1, %v1263_v15, -inf }
 0x1b4   :  { %v1418_v58 = vmax.f32 %v1404_v56, 0.0  ;;  %v1346_v38 = vmax.f32 %v2436_v29, %v1345_v48  ;;  %v970_v13 = vpop.f32.mrb[80].mxu0  ;;  %v1661_v18 = vpop.f32.mrb[80].mxu1 }
 0x1b5   :  { %v1416_v14 = vmax.f32 %v1402_v12, 0.0  ;;  %v1405_v4 = vadd.f32 %v2420_v46, %v1360_v27  ;;  %v1228_v60 = vadd.f32 %v2413_v42, %v970_v13  ;;  %v1284_v6 = vadd.f32 %v1661_v18, %v2239_v24  ;;  %v972_v25 = vpop.f32.mrb[81].mxu0  ;;  %v1275_v40 = vpop.f32.mrb[81].mxu1 }
 0x1b6   :  { %1432 = vst.msk [vmem:[%s2566_s3 + $0x40] sm:$0xff] %vm1290_vm1, %v1418_v58  ;;  %v1403_v22 = vadd.f32 %v2420_v46, %v1346_v38  ;;  %v1276_v29 = vadd.f32 %v1275_v40, %v2235_v16  ;;  %v973_v9 = vpop.f32.mrb[82].mxu0  ;;  %v1662_v49 = vpop.f32.mrb[82].mxu1 }
 0x1b7   :  { %1430 = vst.msk [vmem:[%s2566_s3 + $0x30] sm:$0xff] %vm1290_vm1, %v1416_v14  ;;  %v1419_v42 = vmax.f32 %v1405_v4, 0.0  ;;  %v1378_v24 = vsel %vm1290_vm1, %v1228_v60, -inf  ;;  %v1231_v63 = vadd.f32 %v2423_v36, %v973_v9  ;;  %v975_v41 = vpop.f32.mrb[83].mxu0  ;;  %v1278_v34 = vpop.f32.mrb[83].mxu1  ;;  %v1287_v17 = vadd.f32 %v1662_v49, %v2241_v28 }
 0x1b8   :  { %v1417_v33 = vmax.f32 %v1403_v22, 0.0  ;;  %v1379_v30 = vmax.f32 %v2575_v52, %v1378_v24  ;;  %v1366_v16 = vsel %vm1290_vm1, %v1276_v29, -inf  ;;  %v1380_v44 = vsel %vm1290_vm1, %v1284_v6, -inf }
 0x1b9   :  { %1433 = vst.msk [vmem:[%s2566_s3 + $0x48] sm:$0xff] %vm1290_vm1, %v1419_v42  ;;  %v1367_v55 = vmax.f32 %v1365_v1, %v1366_v16  ;;  %v1385_v36 = vsel %vm1290_vm1, %v1231_v63, -inf  ;;  %v1279_v47 = vadd.f32 %v1278_v34, %v2237_v20  ;;  %v2576_v28 = vmax.f32 %v2362_v26, %v2367_v21 }
 0x1ba   :  { %1431 = vst.msk [vmem:[%s2566_s3 + $0x38] sm:$0xff] %vm1290_vm1, %v1417_v33  ;;  %v1381_v62 = vmax.f32 %v1379_v30, %v1380_v44  ;;  %v1387_v10 = vsel %vm1290_vm1, %v1287_v17, -inf }
 0x1bb   :  { %v1386_v32 = vmax.f32 %v2576_v28, %v1385_v36  ;;  %v1406_v19 = vadd.f32 %v2420_v46, %v1367_v55  ;;  %v1373_v57 = vsel %vm1290_vm1, %v1279_v47, -inf }
 0x1bc   :  { %v1408_v61 = vadd.f32 %v2420_v46, %v1381_v62  ;;  %v1374_v20 = vmax.f32 %v1372_v2, %v1373_v57 }
 0x1bd   :  { %v1388_v11 = vmax.f32 %v1386_v32, %v1387_v10  ;;  %v1420_v50 = vmax.f32 %v1406_v19, 0.0 }
 0x1be   :  { %v1422_v3 = vmax.f32 %v1408_v61, 0.0  ;;  %v1407_v23 = vadd.f32 %v2420_v46, %v1374_v20 }
 0x1bf   :  { %v1409_v5 = vadd.f32 %v2420_v46, %v1388_v11  ;;  %1434 = vst.msk [vmem:[%s2566_s3 + $0x50] sm:$0xff] %vm1290_vm1, %v1420_v50 }
 0x1c0   :  { %1436 = vst.msk [vmem:[%s2566_s3 + $0x60] sm:$0xff] %vm1290_vm1, %v1422_v3  ;;  %v1421_v21 = vmax.f32 %v1407_v23, 0.0 }
 0x1c1   :  { %v1423_v26 = vmax.f32 %v1409_v5, 0.0 }
 0x1c2   :  { %1435 = vst.msk [vmem:[%s2566_s3 + $0x58] sm:$0xff] %vm1290_vm1, %v1421_v21 }
 0x1c3   :  { %1437 = vst.msk [vmem:[%s2566_s3 + $0x68] sm:$0xff] %vm1290_vm1, %v1423_v26 }

// kernel: cnn_forward.5
= control target key start
LH: loop header
LB: loop body
LE: loop exit
PB: predicated region body
PF: predicated region fallthrough
CT: control target
= control target key end

     0   :  { %v427_v27 = vlaneseq  ;;  %v3031_v35 = vmov 1966171168   ;;  %s3706_s0 = inlined_call_operand.vmem [shape: bf16[2,3136], index: 0, kind: input, shape index: {}]   ;;  %s3707_s1 = inlined_call_operand.vmem [shape: bf16[3136,10], index: 1, kind: input, shape index: {}]   ;;  %s3708_s2 = inlined_call_operand.vmem [shape: f32[1,10], index: 2, kind: input, shape index: {}]   ;;  %s3709_s3 = inlined_call_operand.hbm [shape: f32[2,10], index: 3, kind: output, shape index: {}]  }
   0x1   :  { %v2808_v0 = vld [vmem:[%s3707_s1 + $0x40] sm:$0xff]   ;;  %v2812_v4 = vld [vmem:[%s3707_s1 + $0x48] sm:$0xff]   ;;  %v2816_v8 = vld [vmem:[%s3707_s1 + $0x50] sm:$0xff]   ;;  %v425_v36 = vunpack.c.l.s4 %v3031_v35 }
   0x2   :  { %v2809_v1 = vld [vmem:[%s3707_s1] sm:$0xff]   ;;  %2523 = vmatprep.subr.bf16.mxu0 %v2808_v0  ;;  %v2813_v5 = vld [vmem:[%s3707_s1 + $0x8] sm:$0xff]   ;;  %v2817_v9 = vld [vmem:[%s3707_s1 + $0x10] sm:$0xff]   ;;  %v428_v32 = vshrl.u32 %v427_v27, 7 }
   0x3   :  { %v2810_v2 = vld [vmem:[%s3707_s1 + $0xc0] sm:$0xff]   ;;  %2524 = vmatpush3.bf16.msra.mxu0 %v2809_v1  ;;  %v2814_v6 = vld [vmem:[%s3707_s1 + $0xc8] sm:$0xff]   ;;  %v2818_v10 = vld [vmem:[%s3707_s1 + $0xd0] sm:$0xff]   ;;  %v426_v39 = vunpack.c.0.s8 %v425_v36 }
   0x4   :  { %v2811_v3 = vld [vmem:[%s3707_s1 + $0x80] sm:$0xff]   ;;  %2545 = vmatprep.subr.bf16.mxu1 %v2810_v2  ;;  %2525 = vmatprep.subr.bf16.mxu0 %v2812_v4  ;;  %v2815_v7 = vld [vmem:[%s3707_s1 + $0x88] sm:$0xff]   ;;  %v2819_v11 = vld [vmem:[%s3707_s1 + $0x90] sm:$0xff]  }
   0x5   :  { %2546 = vmatpush3.bf16.msra.mxu1 %v2811_v3  ;;  %v2820_v12 = vld [vmem:[%s3707_s1 + $0x58] sm:$0xff]   ;;  %v2824_v16 = vld [vmem:[%s3707_s1 + $0x60] sm:$0xff]   ;;  %v2828_v20 = vld [vmem:[%s3707_s1 + $0x68] sm:$0xff]   ;;  %v3160_v41 = vsub.s32 %v426_v39, %v428_v32 }
   0x6   :  { %2547 = vmatprep.subr.bf16.mxu1 %v2814_v6  ;;  %v2821_v13 = vld [vmem:[%s3707_s1 + $0x18] sm:$0xff]   ;;  %v2825_v17 = vld [vmem:[%s3707_s1 + $0x20] sm:$0xff]   ;;  %v2829_v21 = vld [vmem:[%s3707_s1 + $0x28] sm:$0xff]  }
   0x7   :  { %2526 = vmatpush3.bf16.msra.mxu0 %v2813_v5  ;;  %v2822_v14 = vld [vmem:[%s3707_s1 + $0xd8] sm:$0xff]   ;;  %v2826_v18 = vld [vmem:[%s3707_s1 + $0xe0] sm:$0xff]   ;;  %v2830_v22 = vld [vmem:[%s3707_s1 + $0xe8] sm:$0xff]  }
   0x8   :  { %2527 = vmatprep.subr.bf16.mxu0 %v2816_v8  ;;  %v2823_v15 = vld [vmem:[%s3707_s1 + $0x98] sm:$0xff]   ;;  %v2827_v19 = vld [vmem:[%s3707_s1 + $0xa0] sm:$0xff]   ;;  %v2831_v23 = vld [vmem:[%s3707_s1 + $0xa8] sm:$0xff]  }
   0x9   :  { %2548 = vmatpush3.bf16.msra.mxu1 %v2815_v7  ;;  %v2832_v24 = vld [vmem:[%s3707_s1 + $0x70] sm:$0xff]   ;;  %v2836_v29 = vld [vmem:[%s3707_s1 + $0x78] sm:$0xff]   ;;  %v16_v33 = vld [vmem:[%s3706_s0] sm:$0xff] }
   0xa   :  { %2549 = vmatprep.subr.bf16.mxu1 %v2818_v10  ;;  %v2833_v25 = vld [vmem:[%s3707_s1 + $0x30] sm:$0xff]   ;;  %v2837_v30 = vld [vmem:[%s3707_s1 + $0x38] sm:$0xff]   ;;  %v2841_v37 = vld [vmem:[%s3707_s1 + $0x140] sm:$0xff]   ;;  %v423_v38 = vcombine.high %v16_v33, %v16_v33  ;;  %v430_v42 = vrot.slane %v16_v33, %v3160_v41 }
   0xb   :  { %2528 = vmatpush3.bf16.msra.mxu0 %v2817_v9  ;;  %v2834_v26 = vld [vmem:[%s3707_s1 + $0xf0] sm:$0xff]   ;;  %v2838_v31 = vld [vmem:[%s3707_s1 + $0xf8] sm:$0xff]   ;;  %v2843_v40 = vld [vmem:[%s3707_s1 + $0x1c0] sm:$0xff]  }
   0xc   :  { %2529 = vmatprep.subr.bf16.mxu0 %v2820_v12  ;;  %v2835_v28 = vld [vmem:[%s3707_s1 + $0xb0] sm:$0xff]   ;;  %v2840_v34 = vld [vmem:[%s3707_s1 + $0xb8] sm:$0xff]   ;;  %v3164_v43 = vrot.slane %v423_v38, %v3160_v41  ;;  %v438_v44 = vcombine.high %v430_v42, %v430_v42  ;;  %v446_v45 = vrot.slane %v430_v42, %v3160_v41  ;;  %v2842_v48 = vld [vmem:[%s3707_s1 + $0x100] sm:$0xff]  }
   0xd   :  { %2550 = vmatpush3.bf16.msra.mxu1 %v2819_v11  ;;  %v2845_v51 = vld [vmem:[%s3707_s1 + $0x148] sm:$0xff]   ;;  %v2844_v53 = vld [vmem:[%s3707_s1 + $0x180] sm:$0xff]   ;;  %v2849_v57 = vld [vmem:[%s3707_s1 + $0x150] sm:$0xff]  }
   0xe   :  { %2551 = vmatprep.subr.bf16.mxu1 %v2822_v14  ;;  %v439_v46 = vcombine.high %v3164_v43, %v3164_v43  ;;  %v460_v47 = vrot.slane %v438_v44, %v3160_v41  ;;  %v468_v50 = vcombine.high %v446_v45, %v446_v45  ;;  %v2847_v54 = vld [vmem:[%s3707_s1 + $0x1c8] sm:$0xff]   ;;  %v2851_v59 = vld [vmem:[%s3707_s1 + $0x1d0] sm:$0xff]   ;;  %v2853_v61 = vld [vmem:[%s3707_s1 + $0x158] sm:$0xff]  }
   0xf   :  { %2530 = vmatpush3.bf16.msra.mxu0 %v2821_v13  ;;  %v2846_v56 = vld [vmem:[%s3707_s1 + $0x108] sm:$0xff]   ;;  %v2850_v60 = vld [vmem:[%s3707_s1 + $0x110] sm:$0xff]   ;;  %v2855_v63 = vld [vmem:[%s3707_s1 + $0x1d8] sm:$0xff]  }
  0x10   :  { %2531 = vmatprep.subr.bf16.mxu0 %v2824_v16  ;;  %v467_v49 = vrot.slane %v439_v46, %v3160_v41  ;;  %1820 = vmatprep.mubr.bf16.mxu0 %v460_v47  ;;  %v470_v52 = vcombine.high %v460_v47, %v460_v47  ;;  %v2848_v58 = vld [vmem:[%s3707_s1 + $0x188] sm:$0xff]   ;;  %v2852_v62 = vld [vmem:[%s3707_s1 + $0x190] sm:$0xff]   ;;  %v2854_v0 = vld [vmem:[%s3707_s1 + $0x118] sm:$0xff]  }
  0x11   :  { %2552 = vmatpush3.bf16.msra.mxu1 %v2823_v15  ;;  %v2857_v1 = vld [vmem:[%s3707_s1 + $0x160] sm:$0xff]   ;;  %v2856_v2 = vld [vmem:[%s3707_s1 + $0x198] sm:$0xff]   ;;  %v2861_v5 = vld [vmem:[%s3707_s1 + $0x168] sm:$0xff]  }
  0x12   :  { %2553 = vmatprep.subr.bf16.mxu1 %v2826_v18  ;;  %v471_v55 = vcombine.high %v467_v49, %v467_v49  ;;  %1860 = vmatprep.mubr.bf16.mxu1 %v470_v52  ;;  %v2859_v3 = vld [vmem:[%s3707_s1 + $0x1e0] sm:$0xff]   ;;  %v2863_v7 = vld [vmem:[%s3707_s1 + $0x1e8] sm:$0xff]   ;;  %v2865_v9 = vld [vmem:[%s3707_s1 + $0x170] sm:$0xff]  }
  0x13   :  { %2532 = vmatpush3.bf16.msra.mxu0 %v2825_v17  ;;  %v2858_v4 = vld [vmem:[%s3707_s1 + $0x120] sm:$0xff]   ;;  %v2862_v8 = vld [vmem:[%s3707_s1 + $0x128] sm:$0xff]   ;;  %v2867_v11 = vld [vmem:[%s3707_s1 + $0x1f0] sm:$0xff]   ;;  %v453_v17 = vrot.slane %v3164_v43, %v3160_v41 }
  0x14   :  { %2533 = vmatprep.subr.bf16.mxu0 %v2828_v20  ;;  %v2860_v6 = vld [vmem:[%s3707_s1 + $0x1a0] sm:$0xff]   ;;  %v2864_v10 = vld [vmem:[%s3707_s1 + $0x1a8] sm:$0xff]   ;;  %v2866_v12 = vld [vmem:[%s3707_s1 + $0x130] sm:$0xff]  }
  0x15   :  { %2554 = vmatpush3.bf16.msra.mxu1 %v2827_v19  ;;  %v2869_v13 = vld [vmem:[%s3707_s1 + $0x178] sm:$0xff]   ;;  %v2868_v14 = vld [vmem:[%s3707_s1 + $0x1b0] sm:$0xff]   ;;  %v2873_v18 = vld [vmem:[%s3707_s1 + $0x240] sm:$0xff]  }
  0x16   :  { %2555 = vmatprep.subr.bf16.mxu1 %v2830_v22  ;;  %v2871_v15 = vld [vmem:[%s3707_s1 + $0x1f8] sm:$0xff]   ;;  %v2875_v20 = vld [vmem:[%s3707_s1 + $0x2c0] sm:$0xff]   ;;  %v469_v22 = vcombine.high %v453_v17, %v453_v17  ;;  %v2881_v27 = vld [vmem:[%s3707_s1 + $0x250] sm:$0xff]  }
  0x17   :  { %2534 = vmatpush3.bf16.msra.mxu0 %v2829_v21  ;;  %v2870_v16 = vld [vmem:[%s3707_s1 + $0x138] sm:$0xff]   ;;  %v2874_v21 = vld [vmem:[%s3707_s1 + $0x200] sm:$0xff]   ;;  %v2884_v32 = vld [vmem:[%s3707_s1 + $0x290] sm:$0xff]  }
  0x18   :  { %2535 = vmatprep.subr.bf16.mxu0 %v2832_v24  ;;  %v2872_v19 = vld [vmem:[%s3707_s1 + $0x1b8] sm:$0xff]   ;;  %v2876_v24 = vld [vmem:[%s3707_s1 + $0x280] sm:$0xff]   ;;  %v2893_v39 = vld [vmem:[%s3707_s1 + $0x268] sm:$0xff]  }
  0x19   :  { %2556 = vmatpush3.bf16.msra.mxu1 %v2831_v23  ;;  %v2877_v23 = vld [vmem:[%s3707_s1 + $0x248] sm:$0xff]   ;;  %v2887_v33 = vld [vmem:[%s3707_s1 + $0x2d8] sm:$0xff]   ;;  %v2889_v35 = vld [vmem:[%s3707_s1 + $0x260] sm:$0xff]  }
  0x1a   :  { %2557 = vmatprep.subr.bf16.mxu1 %v2834_v26  ;;  %v2878_v26 = vld [vmem:[%s3707_s1 + $0x208] sm:$0xff]   ;;  %v2888_v36 = vld [vmem:[%s3707_s1 + $0x298] sm:$0xff]   ;;  %v2890_v38 = vld [vmem:[%s3707_s1 + $0x220] sm:$0xff]  }
  0x1b   :  { %2536 = vmatpush3.bf16.msra.mxu0 %v2833_v25  ;;  %v2879_v25 = vld [vmem:[%s3707_s1 + $0x2c8] sm:$0xff]   ;;  %v2897_v44 = vld [vmem:[%s3707_s1 + $0x270] sm:$0xff]  }
  0x1c   :  { %2537 = vmatprep.subr.bf16.mxu0 %v2836_v29  ;;  %v2883_v29 = vld [vmem:[%s3707_s1 + $0x2d0] sm:$0xff]   ;;  %v2895_v42 = vld [vmem:[%s3707_s1 + $0x2e8] sm:$0xff]  }
  0x1d   :  { %2558 = vmatpush3.bf16.msra.mxu1 %v2835_v28  ;;  %v2880_v28 = vld [vmem:[%s3707_s1 + $0x288] sm:$0xff]  }
  0x1e   :  { %2559 = vmatprep.subr.bf16.mxu1 %v2838_v31  ;;  %v2885_v31 = vld [vmem:[%s3707_s1 + $0x258] sm:$0xff]   ;;  %v2894_v43 = vld [vmem:[%s3707_s1 + $0x228] sm:$0xff]  }
  0x1f   :  { %2538 = vmatpush3.bf16.msra.mxu0 %v2837_v30  ;;  %v2882_v30 = vld [vmem:[%s3707_s1 + $0x210] sm:$0xff]   ;;  %v2896_v46 = vld [vmem:[%s3707_s1 + $0x2a8] sm:$0xff]  }
  0x20   :  { %2567 = vmatprep.subr.bf16.mxu0 %v2841_v37  ;;  %v2891_v37 = vld [vmem:[%s3707_s1 + $0x2e0] sm:$0xff]  }
  0x21   :  { %2560 = vmatpush3.bf16.msra.mxu1 %v2840_v34  ;;  %v2886_v34 = vld [vmem:[%s3707_s1 + $0x218] sm:$0xff]  }
  0x22   :  { %2589 = vmatprep.subr.bf16.mxu1 %v2843_v40  ;;  %1821 = vmatmul.mubr.bf16.vlgmr.msra.gmra.mrb[0].mxu0 %v446_v45  ;;  %v2892_v40 = vld [vmem:[%s3707_s1 + $0x2a0] sm:$0xff]   ;;  %v17_v45 = vld [vmem:[%s3706_s0 + $0x8] sm:$0xff] }
  0x23   :  { %2568 = vmatpush3.bf16.msra.mxu0 %v2842_v48  ;;  %1900 = vmatprep.mubr.bf16.mxu0 %v467_v49  ;;  %v479_v47 = vrot.slane %v17_v45, %v3160_v41  ;;  %v472_v48 = vcombine.high %v17_v45, %v17_v45  ;;  %v2899_v49 = vld [vmem:[%s3707_s1 + $0x2f0] sm:$0xff]  }
  0x24   :  { %1861 = vmatmul.mubr.bf16.vlgmr.msra.gmra.mrb[0].mxu1 %v468_v50  ;;  %2569 = vmatprep.subr.bf16.mxu0 %v2845_v51  ;;  %v2898_v50 = vld [vmem:[%s3707_s1 + $0x230] sm:$0xff]  }
  0x25   :  { %2590 = vmatpush3.bf16.msra.mxu1 %v2844_v53  ;;  %1940 = vmatprep.mubr.bf16.mxu1 %v471_v55  ;;  %v487_v51 = vcombine.high %v479_v47, %v479_v47  ;;  %v3349_v52 = vrot.slane %v472_v48, %v3160_v41  ;;  %v2901_v53 = vld [vmem:[%s3707_s1 + $0x278] sm:$0xff]   ;;  %v2948_v45 = vld [vmem:[%s3707_s1 + $0x4d0] sm:$0xff]  }
  0x26   :  { %2591 = vmatprep.subr.bf16.mxu1 %v2847_v54  ;;  %v2900_v54 = vld [vmem:[%s3707_s1 + $0x2b0] sm:$0xff]  }
  0x27   :  { %2570 = vmatpush3.bf16.msra.mxu0 %v2846_v56  ;;  %v509_v55 = vrot.slane %v487_v51, %v3160_v41  ;;  %v488_v56 = vcombine.high %v3349_v52, %v3349_v52  ;;  %v2949_v48 = vld [vmem:[%s3707_s1 + $0x490] sm:$0xff]   ;;  %v2954_v51 = vld [vmem:[%s3707_s1 + $0x460] sm:$0xff]  }
  0x28   :  { %2571 = vmatprep.subr.bf16.mxu0 %v2849_v57  ;;  %v2903_v57 = vld [vmem:[%s3707_s1 + $0x2f8] sm:$0xff]  }
  0x29   :  { %2592 = vmatpush3.bf16.msra.mxu1 %v2848_v58  ;;  %v2902_v58 = vld [vmem:[%s3707_s1 + $0x238] sm:$0xff]  }
  0x2a   :  { %2593 = vmatprep.subr.bf16.mxu1 %v2851_v59  ;;  %v519_v59 = vcombine.high %v509_v55, %v509_v55 }
  0x2b   :  { %2572 = vmatpush3.bf16.msra.mxu0 %v2850_v60  ;;  %v495_v60 = vrot.slane %v479_v47, %v3160_v41  ;;  %v2950_v47 = vld [vmem:[%s3707_s1 + $0x458] sm:$0xff]  }
  0x2c   :  { %2573 = vmatprep.subr.bf16.mxu0 %v2853_v61  ;;  %v2905_v61 = vld [vmem:[%s3707_s1 + $0x340] sm:$0xff]  }
  0x2d   :  { %2594 = vmatpush3.bf16.msra.mxu1 %v2852_v62  ;;  %v2904_v62 = vld [vmem:[%s3707_s1 + $0x2b8] sm:$0xff]  }
  0x2e   :  { %2595 = vmatprep.subr.bf16.mxu1 %v2855_v63  ;;  %v516_v63 = vrot.slane %v488_v56, %v3160_v41  ;;  %v2957_v56 = vld [vmem:[%s3707_s1 + $0x4a0] sm:$0xff]  }
  0x2f   :  { %2574 = vmatpush3.bf16.msra.mxu0 %v2854_v0  ;;  %v2907_v0 = vld [vmem:[%s3707_s1 + $0x3c0] sm:$0xff]  }
  0x30   :  { %2575 = vmatprep.subr.bf16.mxu0 %v2857_v1  ;;  %v2906_v1 = vld [vmem:[%s3707_s1 + $0x300] sm:$0xff]  }
  0x31   :  { %2596 = vmatpush3.bf16.msra.mxu1 %v2856_v2  ;;  %v517_v2 = vcombine.high %v495_v60, %v495_v60 }
  0x32   :  { %2597 = vmatprep.subr.bf16.mxu1 %v2859_v3  ;;  %v2909_v3 = vld [vmem:[%s3707_s1 + $0x348] sm:$0xff]  }
  0x33   :  { %2576 = vmatpush3.bf16.msra.mxu0 %v2858_v4  ;;  %v2908_v4 = vld [vmem:[%s3707_s1 + $0x380] sm:$0xff]  }
  0x34   :  { %2577 = vmatprep.subr.bf16.mxu0 %v2861_v5  ;;  %v520_v5 = vcombine.high %v516_v63, %v516_v63 }
  0x35   :  { %2598 = vmatpush3.bf16.msra.mxu1 %v2860_v6  ;;  %v2911_v6 = vld [vmem:[%s3707_s1 + $0x3c8] sm:$0xff]  }
  0x36   :  { %2599 = vmatprep.subr.bf16.mxu1 %v2863_v7  ;;  %v2910_v7 = vld [vmem:[%s3707_s1 + $0x308] sm:$0xff]  }
  0x37   :  { %2578 = vmatpush3.bf16.msra.mxu0 %v2862_v8  ;;  %v2913_v8 = vld [vmem:[%s3707_s1 + $0x350] sm:$0xff]  }
  0x38   :  { %2579 = vmatprep.subr.bf16.mxu0 %v2865_v9  ;;  %v2912_v9 = vld [vmem:[%s3707_s1 + $0x388] sm:$0xff]  }
  0x39   :  { %2600 = vmatpush3.bf16.msra.mxu1 %v2864_v10  ;;  %v2915_v10 = vld [vmem:[%s3707_s1 + $0x3d0] sm:$0xff]  }
  0x3a   :  { %2601 = vmatprep.subr.bf16.mxu1 %v2867_v11  ;;  %v2914_v11 = vld [vmem:[%s3707_s1 + $0x310] sm:$0xff]  }
  0x3b   :  { %2580 = vmatpush3.bf16.msra.mxu0 %v2866_v12  ;;  %v2917_v12 = vld [vmem:[%s3707_s1 + $0x358] sm:$0xff]  }
  0x3c   :  { %2581 = vmatprep.subr.bf16.mxu0 %v2869_v13  ;;  %v2916_v13 = vld [vmem:[%s3707_s1 + $0x390] sm:$0xff]  }
  0x3d   :  { %2602 = vmatpush3.bf16.msra.mxu1 %v2868_v14  ;;  %v2919_v14 = vld [vmem:[%s3707_s1 + $0x3d8] sm:$0xff]  }
  0x3e   :  { %2603 = vmatprep.subr.bf16.mxu1 %v2871_v15  ;;  %v2918_v15 = vld [vmem:[%s3707_s1 + $0x318] sm:$0xff]  }
  0x3f   :  { %2582 = vmatpush3.bf16.msra.mxu0 %v2870_v16  ;;  %v2921_v16 = vld [vmem:[%s3707_s1 + $0x360] sm:$0xff]  }
  0x40   :  { %2611 = vmatprep.subr.bf16.mxu0 %v2873_v18  ;;  %v2923_v18 = vld [vmem:[%s3707_s1 + $0x3e0] sm:$0xff]  }
  0x41   :  { %2604 = vmatpush3.bf16.msra.mxu1 %v2872_v19  ;;  %v2922_v19 = vld [vmem:[%s3707_s1 + $0x320] sm:$0xff]  }
  0x42   :  { %1901 = vmatmul.mubr.bf16.vlgmr.msra.gmra.mrb[4].mxu0 %v453_v17  ;;  %2633 = vmatprep.subr.bf16.mxu1 %v2875_v20  ;;  %v2920_v17 = vld [vmem:[%s3707_s1 + $0x398] sm:$0xff]   ;;  %v2925_v20 = vld [vmem:[%s3707_s1 + $0x368] sm:$0xff]  }
  0x43   :  { %2612 = vmatpush3.bf16.msra.mxu0 %v2874_v21  ;;  %1980 = vmatprep.mubr.bf16.mxu0 %v509_v55  ;;  %v2924_v21 = vld [vmem:[%s3707_s1 + $0x3a0] sm:$0xff]   ;;  %v2958_v55 = vld [vmem:[%s3707_s1 + $0x468] sm:$0xff]  }
  0x44   :  { %1941 = vmatmul.mubr.bf16.vlgmr.msra.gmra.mrb[4].mxu1 %v469_v22  ;;  %2613 = vmatprep.subr.bf16.mxu0 %v2877_v23  ;;  %v2927_v22 = vld [vmem:[%s3707_s1 + $0x3e8] sm:$0xff]  }
  0x45   :  { %2634 = vmatpush3.bf16.msra.mxu1 %v2876_v24  ;;  %2020 = vmatprep.mubr.bf16.mxu1 %v519_v59  ;;  %v2926_v23 = vld [vmem:[%s3707_s1 + $0x328] sm:$0xff]   ;;  %v2929_v24 = vld [vmem:[%s3707_s1 + $0x370] sm:$0xff]  }
  0x46   :  { %2635 = vmatprep.subr.bf16.mxu1 %v2879_v25  ;;  %v2928_v25 = vld [vmem:[%s3707_s1 + $0x3a8] sm:$0xff]   ;;  %v2962_v59 = vld [vmem:[%s3707_s1 + $0x470] sm:$0xff]  }
  0x47   :  { %2614 = vmatpush3.bf16.msra.mxu0 %v2878_v26  ;;  %v2931_v26 = vld [vmem:[%s3707_s1 + $0x3f0] sm:$0xff]  }
  0x48   :  { %2615 = vmatprep.subr.bf16.mxu0 %v2881_v27  ;;  %v2930_v27 = vld [vmem:[%s3707_s1 + $0x330] sm:$0xff]  }
  0x49   :  { %2636 = vmatpush3.bf16.msra.mxu1 %v2880_v28  ;;  %v2933_v28 = vld [vmem:[%s3707_s1 + $0x378] sm:$0xff]  }
  0x4a   :  { %2637 = vmatprep.subr.bf16.mxu1 %v2883_v29  ;;  %v2932_v29 = vld [vmem:[%s3707_s1 + $0x3b0] sm:$0xff]  }
  0x4b   :  { %2616 = vmatpush3.bf16.msra.mxu0 %v2882_v30  ;;  %v2935_v30 = vld [vmem:[%s3707_s1 + $0x3f8] sm:$0xff]  }
  0x4c   :  { %2617 = vmatprep.subr.bf16.mxu0 %v2885_v31  ;;  %v2934_v31 = vld [vmem:[%s3707_s1 + $0x338] sm:$0xff]  }
  0x4d   :  { %2638 = vmatpush3.bf16.msra.mxu1 %v2884_v32  ;;  %v502_v32 = vrot.slane %v3349_v52, %v3160_v41  ;;  %v2953_v52 = vld [vmem:[%s3707_s1 + $0x498] sm:$0xff]  }
  0x4e   :  { %2639 = vmatprep.subr.bf16.mxu1 %v2887_v33  ;;  %v2938_v33 = vld [vmem:[%s3707_s1 + $0x440] sm:$0xff]  }
  0x4f   :  { %2618 = vmatpush3.bf16.msra.mxu0 %v2886_v34  ;;  %v2937_v34 = vld [vmem:[%s3707_s1 + $0x3b8] sm:$0xff]  }
  0x50   :  { %2619 = vmatprep.subr.bf16.mxu0 %v2889_v35  ;;  %v2940_v35 = vld [vmem:[%s3707_s1 + $0x4c0] sm:$0xff]  }
  0x51   :  { %2640 = vmatpush3.bf16.msra.mxu1 %v2888_v36  ;;  %v2939_v36 = vld [vmem:[%s3707_s1 + $0x400] sm:$0xff]  }
  0x52   :  { %2641 = vmatprep.subr.bf16.mxu1 %v2891_v37  ;;  %v518_v37 = vcombine.high %v502_v32, %v502_v32 }
  0x53   :  { %2620 = vmatpush3.bf16.msra.mxu0 %v2890_v38  ;;  %v2942_v38 = vld [vmem:[%s3707_s1 + $0x448] sm:$0xff]  }
  0x54   :  { %2621 = vmatprep.subr.bf16.mxu0 %v2893_v39  ;;  %v2941_v39 = vld [vmem:[%s3707_s1 + $0x480] sm:$0xff]  }
  0x55   :  { %2642 = vmatpush3.bf16.msra.mxu1 %v2892_v40  ;;  %v2944_v40 = vld [vmem:[%s3707_s1 + $0x4c8] sm:$0xff]  }
  0x56   :  { %2643 = vmatprep.subr.bf16.mxu1 %v2895_v42  ;;  %v2943_v42 = vld [vmem:[%s3707_s1 + $0x408] sm:$0xff]  }
  0x57   :  { %2622 = vmatpush3.bf16.msra.mxu0 %v2894_v43  ;;  %v2946_v43 = vld [vmem:[%s3707_s1 + $0x450] sm:$0xff]  }
  0x58   :  { %2623 = vmatprep.subr.bf16.mxu0 %v2897_v44  ;;  %v2945_v44 = vld [vmem:[%s3707_s1 + $0x488] sm:$0xff]  }
  0x59   :  { %2644 = vmatpush3.bf16.msra.mxu1 %v2896_v46  ;;  %v2947_v46 = vld [vmem:[%s3707_s1 + $0x410] sm:$0xff]  }
  0x5a   :  { %2645 = vmatprep.subr.bf16.mxu1 %v2899_v49  ;;  %v2952_v49 = vld [vmem:[%s3707_s1 + $0x4d8] sm:$0xff]  }
  0x5b   :  { %2624 = vmatpush3.bf16.msra.mxu0 %v2898_v50  ;;  %v2951_v50 = vld [vmem:[%s3707_s1 + $0x418] sm:$0xff]  }
  0x5c   :  { %2625 = vmatprep.subr.bf16.mxu0 %v2901_v53  ;;  %v2956_v53 = vld [vmem:[%s3707_s1 + $0x4e0] sm:$0xff]  }
  0x5d   :  { %2646 = vmatpush3.bf16.msra.mxu1 %v2900_v54  ;;  %v2955_v54 = vld [vmem:[%s3707_s1 + $0x420] sm:$0xff]  }
  0x5e   :  { %2647 = vmatprep.subr.bf16.mxu1 %v2903_v57  ;;  %v2960_v57 = vld [vmem:[%s3707_s1 + $0x4e8] sm:$0xff]  }
  0x5f   :  { %2626 = vmatpush3.bf16.msra.mxu0 %v2902_v58  ;;  %v2959_v58 = vld [vmem:[%s3707_s1 + $0x428] sm:$0xff]  }
  0x60   :  { %2655 = vmatprep.subr.bf16.mxu0 %v2905_v61  ;;  %v2961_v61 = vld [vmem:[%s3707_s1 + $0x4a8] sm:$0xff]  }
  0x61   :  { %2648 = vmatpush3.bf16.msra.mxu1 %v2904_v62 }
  0x62   :  { %1981 = vmatmul.mubr.bf16.vlgmr.msra.gmra.mrb[8].mxu0 %v495_v60  ;;  %2677 = vmatprep.subr.bf16.mxu1 %v2907_v0  ;;  %v18_v60 = vld [vmem:[%s3706_s0 + $0x10] sm:$0xff] }
  0x63   :  { %2656 = vmatpush3.bf16.msra.mxu0 %v2906_v1  ;;  %2060 = vmatprep.mubr.bf16.mxu0 %v516_v63  ;;  %v528_v62 = vrot.slane %v18_v60, %v3160_v41  ;;  %v521_v63 = vcombine.high %v18_v60, %v18_v60  ;;  %v2964_v0 = vld [vmem:[%s3707_s1 + $0x4f0] sm:$0xff]  }
  0x64   :  { %2021 = vmatmul.mubr.bf16.vlgmr.msra.gmra.mrb[8].mxu1 %v517_v2  ;;  %2657 = vmatprep.subr.bf16.mxu0 %v2909_v3  ;;  %v2963_v1 = vld [vmem:[%s3707_s1 + $0x430] sm:$0xff]  }
  0x65   :  { %2678 = vmatpush3.bf16.msra.mxu1 %v2908_v4  ;;  %2100 = vmatprep.mubr.bf16.mxu1 %v520_v5  ;;  %v536_v2 = vcombine.high %v528_v62, %v528_v62  ;;  %v3555_v3 = vrot.slane %v521_v63, %v3160_v41  ;;  %v2966_v4 = vld [vmem:[%s3707_s1 + $0x478] sm:$0xff]   ;;  %v2965_v5 = vld [vmem:[%s3707_s1 + $0x4b0] sm:$0xff]  }
  0x66   :  { %2679 = vmatprep.subr.bf16.mxu1 %v2911_v6 }
  0x67   :  { %2658 = vmatpush3.bf16.msra.mxu0 %v2910_v7  ;;  %v558_v6 = vrot.slane %v536_v2, %v3160_v41  ;;  %v537_v7 = vcombine.high %v3555_v3, %v3555_v3 }
  0x68   :  { %2659 = vmatprep.subr.bf16.mxu0 %v2913_v8  ;;  %v2968_v8 = vld [vmem:[%s3707_s1 + $0x4f8] sm:$0xff]  }
  0x69   :  { %2680 = vmatpush3.bf16.msra.mxu1 %v2912_v9  ;;  %v2967_v9 = vld [vmem:[%s3707_s1 + $0x438] sm:$0xff]  }
  0x6a   :  { %2681 = vmatprep.subr.bf16.mxu1 %v2915_v10  ;;  %v568_v10 = vcombine.high %v558_v6, %v558_v6 }
  0x6b   :  { %2660 = vmatpush3.bf16.msra.mxu0 %v2914_v11  ;;  %v544_v11 = vrot.slane %v528_v62, %v3160_v41 }
  0x6c   :  { %2661 = vmatprep.subr.bf16.mxu0 %v2917_v12  ;;  %v2970_v12 = vld [vmem:[%s3707_s1 + $0x540] sm:$0xff]  }
  0x6d   :  { %2682 = vmatpush3.bf16.msra.mxu1 %v2916_v13  ;;  %v2969_v13 = vld [vmem:[%s3707_s1 + $0x4b8] sm:$0xff]  }
  0x6e   :  { %2683 = vmatprep.subr.bf16.mxu1 %v2919_v14  ;;  %v565_v14 = vrot.slane %v537_v7, %v3160_v41 }
  0x6f   :  { %2662 = vmatpush3.bf16.msra.mxu0 %v2918_v15  ;;  %v2972_v15 = vld [vmem:[%s3707_s1 + $0x5c0] sm:$0xff]  }
  0x70   :  { %2663 = vmatprep.subr.bf16.mxu0 %v2921_v16  ;;  %v2971_v16 = vld [vmem:[%s3707_s1 + $0x500] sm:$0xff]  }
  0x71   :  { %2684 = vmatpush3.bf16.msra.mxu1 %v2920_v17  ;;  %v566_v17 = vcombine.high %v544_v11, %v544_v11 }
  0x72   :  { %2685 = vmatprep.subr.bf16.mxu1 %v2923_v18  ;;  %v2974_v18 = vld [vmem:[%s3707_s1 + $0x548] sm:$0xff]  }
  0x73   :  { %2664 = vmatpush3.bf16.msra.mxu0 %v2922_v19  ;;  %v2973_v19 = vld [vmem:[%s3707_s1 + $0x580] sm:$0xff]  }
  0x74   :  { %2665 = vmatprep.subr.bf16.mxu0 %v2925_v20  ;;  %v569_v20 = vcombine.high %v565_v14, %v565_v14 }
  0x75   :  { %2686 = vmatpush3.bf16.msra.mxu1 %v2924_v21  ;;  %v2976_v21 = vld [vmem:[%s3707_s1 + $0x5c8] sm:$0xff]  }
  0x76   :  { %2687 = vmatprep.subr.bf16.mxu1 %v2927_v22  ;;  %v2975_v22 = vld [vmem:[%s3707_s1 + $0x508] sm:$0xff]  }
  0x77   :  { %2666 = vmatpush3.bf16.msra.mxu0 %v2926_v23  ;;  %v2978_v23 = vld [vmem:[%s3707_s1 + $0x550] sm:$0xff]  }
  0x78   :  { %2667 = vmatprep.subr.bf16.mxu0 %v2929_v24  ;;  %v2977_v24 = vld [vmem:[%s3707_s1 + $0x588] sm:$0xff]  }
  0x79   :  { %2688 = vmatpush3.bf16.msra.mxu1 %v2928_v25  ;;  %v2980_v25 = vld [vmem:[%s3707_s1 + $0x5d0] sm:$0xff]  }
  0x7a   :  { %2689 = vmatprep.subr.bf16.mxu1 %v2931_v26  ;;  %v2979_v26 = vld [vmem:[%s3707_s1 + $0x510] sm:$0xff]  }
  0x7b   :  { %2668 = vmatpush3.bf16.msra.mxu0 %v2930_v27  ;;  %v2982_v27 = vld [vmem:[%s3707_s1 + $0x558] sm:$0xff]  }
  0x7c   :  { %2669 = vmatprep.subr.bf16.mxu0 %v2933_v28  ;;  %v2981_v28 = vld [vmem:[%s3707_s1 + $0x590] sm:$0xff]  }
  0x7d   :  { %2690 = vmatpush3.bf16.msra.mxu1 %v2932_v29  ;;  %v2984_v29 = vld [vmem:[%s3707_s1 + $0x5d8] sm:$0xff]  }
  0x7e   :  { %2691 = vmatprep.subr.bf16.mxu1 %v2935_v30  ;;  %v2983_v30 = vld [vmem:[%s3707_s1 + $0x518] sm:$0xff]  }
  0x7f   :  { %2670 = vmatpush3.bf16.msra.mxu0 %v2934_v31  ;;  %v2986_v31 = vld [vmem:[%s3707_s1 + $0x560] sm:$0xff]  }
  0x80   :  { %2699 = vmatprep.subr.bf16.mxu0 %v2938_v33  ;;  %v2988_v33 = vld [vmem:[%s3707_s1 + $0x5e0] sm:$0xff]  }
  0x81   :  { %2692 = vmatpush3.bf16.msra.mxu1 %v2937_v34  ;;  %v2987_v34 = vld [vmem:[%s3707_s1 + $0x520] sm:$0xff]  }
  0x82   :  { %2061 = vmatmul.mubr.bf16.vlgmr.msra.gmra.mrb[12].mxu0 %v502_v32  ;;  %2721 = vmatprep.subr.bf16.mxu1 %v2940_v35  ;;  %v2985_v32 = vld [vmem:[%s3707_s1 + $0x598] sm:$0xff]   ;;  %v2990_v35 = vld [vmem:[%s3707_s1 + $0x568] sm:$0xff]  }
  0x83   :  { %2700 = vmatpush3.bf16.msra.mxu0 %v2939_v36  ;;  %2140 = vmatprep.mubr.bf16.mxu0 %v558_v6  ;;  %v2989_v36 = vld [vmem:[%s3707_s1 + $0x5a0] sm:$0xff]  }
  0x84   :  { %2101 = vmatmul.mubr.bf16.vlgmr.msra.gmra.mrb[12].mxu1 %v518_v37  ;;  %2701 = vmatprep.subr.bf16.mxu0 %v2942_v38  ;;  %v2992_v37 = vld [vmem:[%s3707_s1 + $0x5e8] sm:$0xff]  }
  0x85   :  { %2722 = vmatpush3.bf16.msra.mxu1 %v2941_v39  ;;  %2180 = vmatprep.mubr.bf16.mxu1 %v568_v10  ;;  %v2991_v38 = vld [vmem:[%s3707_s1 + $0x528] sm:$0xff]   ;;  %v2994_v39 = vld [vmem:[%s3707_s1 + $0x570] sm:$0xff]  }
  0x86   :  { %2723 = vmatprep.subr.bf16.mxu1 %v2944_v40  ;;  %v2993_v40 = vld [vmem:[%s3707_s1 + $0x5a8] sm:$0xff]  }
  0x87   :  { %2702 = vmatpush3.bf16.msra.mxu0 %v2943_v42  ;;  %v2996_v42 = vld [vmem:[%s3707_s1 + $0x5f0] sm:$0xff]  }
  0x88   :  { %2703 = vmatprep.subr.bf16.mxu0 %v2946_v43  ;;  %v2995_v43 = vld [vmem:[%s3707_s1 + $0x530] sm:$0xff]  }
  0x89   :  { %2724 = vmatpush3.bf16.msra.mxu1 %v2945_v44  ;;  %v2998_v44 = vld [vmem:[%s3707_s1 + $0x578] sm:$0xff]  }
  0x8a   :  { %2725 = vmatprep.subr.bf16.mxu1 %v2948_v45  ;;  %v2997_v45 = vld [vmem:[%s3707_s1 + $0x5b0] sm:$0xff]  }
  0x8b   :  { %2704 = vmatpush3.bf16.msra.mxu0 %v2947_v46  ;;  %v3000_v46 = vld [vmem:[%s3707_s1 + $0x5f8] sm:$0xff]  }
  0x8c   :  { %2705 = vmatprep.subr.bf16.mxu0 %v2950_v47  ;;  %v2999_v47 = vld [vmem:[%s3707_s1 + $0x538] sm:$0xff]  }
  0x8d   :  { %2726 = vmatpush3.bf16.msra.mxu1 %v2949_v48 }
  0x8e   :  { %2727 = vmatprep.subr.bf16.mxu1 %v2952_v49 }
  0x8f   :  { %2706 = vmatpush3.bf16.msra.mxu0 %v2951_v50 }
  0x90   :  { %2707 = vmatprep.subr.bf16.mxu0 %v2954_v51 }
  0x91   :  { %2728 = vmatpush3.bf16.msra.mxu1 %v2953_v52 }
  0x92   :  { %2729 = vmatprep.subr.bf16.mxu1 %v2956_v53 }
  0x93   :  { %2708 = vmatpush3.bf16.msra.mxu0 %v2955_v54 }
  0x94   :  { %2709 = vmatprep.subr.bf16.mxu0 %v2958_v55 }
  0x95   :  { %2730 = vmatpush3.bf16.msra.mxu1 %v2957_v56 }
  0x96   :  { %2731 = vmatprep.subr.bf16.mxu1 %v2960_v57 }
  0x97   :  { %2710 = vmatpush3.bf16.msra.mxu0 %v2959_v58 }
  0x98   :  { %2711 = vmatprep.subr.bf16.mxu0 %v2962_v59 }
  0x99   :  { %2732 = vmatpush3.bf16.msra.mxu1 %v2961_v61 }
  0x9a   :  { %2733 = vmatprep.subr.bf16.mxu1 %v2964_v0 }
  0x9b   :  { %2712 = vmatpush3.bf16.msra.mxu0 %v2963_v1 }
  0x9c   :  { %2713 = vmatprep.subr.bf16.mxu0 %v2966_v4 }
  0x9d   :  { %2734 = vmatpush3.bf16.msra.mxu1 %v2965_v5 }
  0x9e   :  { %2735 = vmatprep.subr.bf16.mxu1 %v2968_v8 }
  0x9f   :  { %2714 = vmatpush3.bf16.msra.mxu0 %v2967_v9 }
  0xa0   :  { %2743 = vmatprep.subr.bf16.mxu0 %v2970_v12 }
  0xa1   :  { %2736 = vmatpush3.bf16.msra.mxu1 %v2969_v13 }
  0xa2   :  { %2141 = vmatmul.mubr.bf16.vlgmr.msra.gmra.mrb[16].mxu0 %v544_v11  ;;  %2765 = vmatprep.subr.bf16.mxu1 %v2972_v15 }
  0xa3   :  { %2744 = vmatpush3.bf16.msra.mxu0 %v2971_v16  ;;  %2220 = vmatprep.mubr.bf16.mxu0 %v565_v14 }
  0xa4   :  { %2181 = vmatmul.mubr.bf16.vlgmr.msra.gmra.mrb[16].mxu1 %v566_v17  ;;  %2745 = vmatprep.subr.bf16.mxu0 %v2974_v18 }
  0xa5   :  { %2766 = vmatpush3.bf16.msra.mxu1 %v2973_v19  ;;  %2260 = vmatprep.mubr.bf16.mxu1 %v569_v20 }
  0xa6   :  { %2767 = vmatprep.subr.bf16.mxu1 %v2976_v21 }
  0xa7   :  { %2746 = vmatpush3.bf16.msra.mxu0 %v2975_v22 }
  0xa8   :  { %2747 = vmatprep.subr.bf16.mxu0 %v2978_v23 }
  0xa9   :  { %2768 = vmatpush3.bf16.msra.mxu1 %v2977_v24 }
  0xaa   :  { %2769 = vmatprep.subr.bf16.mxu1 %v2980_v25 }
  0xab   :  { %2748 = vmatpush3.bf16.msra.mxu0 %v2979_v26 }
  0xac   :  { %2749 = vmatprep.subr.bf16.mxu0 %v2982_v27 }
  0xad   :  { %2770 = vmatpush3.bf16.msra.mxu1 %v2981_v28 }
  0xae   :  { %2771 = vmatprep.subr.bf16.mxu1 %v2984_v29 }
  0xaf   :  { %2750 = vmatpush3.bf16.msra.mxu0 %v2983_v30 }
  0xb0   :  { %2751 = vmatprep.subr.bf16.mxu0 %v2986_v31 }
  0xb1   :  { %2772 = vmatpush3.bf16.msra.mxu1 %v2985_v32 }
  0xb2   :  { %2773 = vmatprep.subr.bf16.mxu1 %v2988_v33 }
  0xb3   :  { %2752 = vmatpush3.bf16.msra.mxu0 %v2987_v34 }
  0xb4   :  { %2753 = vmatprep.subr.bf16.mxu0 %v2990_v35 }
  0xb5   :  { %2774 = vmatpush3.bf16.msra.mxu1 %v2989_v36 }
  0xb6   :  { %2775 = vmatprep.subr.bf16.mxu1 %v2992_v37 }
  0xb7   :  { %2754 = vmatpush3.bf16.msra.mxu0 %v2991_v38 }
  0xb8   :  { %2755 = vmatprep.subr.bf16.mxu0 %v2994_v39 }
  0xb9   :  { %2776 = vmatpush3.bf16.msra.mxu1 %v2993_v40 }
  0xba   :  { %2777 = vmatprep.subr.bf16.mxu1 %v2996_v42 }
  0xbb   :  { %2756 = vmatpush3.bf16.msra.mxu0 %v2995_v43 }
  0xbc   :  { %8 = vsyncpa [#allocation3], 0  ;;  %2757 = vmatprep.subr.bf16.mxu0 %v2998_v44  ;;  %v551_v48 = vrot.slane %v3555_v3, %v3160_v41  ;;  %v3002_v49 = vld [vmem:[%s3707_s1 + $0x5b8] sm:$0xff]   ;;  %v3003_v50 = vld [vmem:[%s3707_s1 + $0x600] sm:$0xff]   ;;  %v3032_v51 = vmov 0.0   ;;  %vm3033_vm0 = vmmov 0  }
  0xbd   :  { %2778 = vmatpush3.bf16.msra.mxu1 %v2997_v45  ;;  %v3004_v53 = vld [vmem:[%s3707_s1 + $0x608] sm:$0xff]   ;;  %v3005_v54 = vld [vmem:[%s3707_s1 + $0x610] sm:$0xff]   ;;  %v3006_v55 = vld [vmem:[%s3707_s1 + $0x618] sm:$0xff]   ;;  %vm1784_vm1 = vcmask 523264   ;;  %vm2308_vm2 = vcmask 74752  }
  0xbe   :  { %2779 = vmatprep.subr.bf16.mxu1 %v3000_v46  ;;  %v567_v52 = vcombine.high %v551_v48, %v551_v48  ;;  %v2325_v56 = vld.sshfl [vmem:[%s3706_s0 + $0x18] sm:$0x1 pattern:$0x75316420]  ;;  %v2324_v59 = vld [vmem:[%s3708_s2] ss:$0 sm:$0xff] }
  0xbf   :  { %2758 = vmatpush3.bf16.msra.mxu0 %v2999_v47  ;;  %v583_v57 = vrot.slane %v2325_v56, %v3160_v41  ;;  %s3034_s0 = smov [#allocation2]  }
  0xc0   :  { %2792 = vmatprep.subr.bf16.mxu0 %v3032_v51  ;;  %s2316_s1 = sshll.u32 %s3034_s0, 4  ;;  %s2317_s1 = int_to_ptr.vmem [resolvable:$true] %s2316_s1 }
  0xc1   :  { %2780 = vmatpush3.bf16.msra.mxu1 %v3002_v49  ;;  %s3007_s2 = scalar_lea.vmem %s2317_s1, 32  ;;  %p3012_p1 = scmp.lt.s32.totalorder %s2317_s1, %s2317_s1 }
  0xc2   :  { %2221 = vmatmul.mubr.bf16.vlgmr.msra.gmra.mrb[20].mxu0 %v551_v48  ;;  %p3008_p0 = scmp.ne.s32.totalorder %s2317_s1, %s3007_s2  ;;  %p3013_p2 = scmp.lt.s32.totalorder %s3007_s2, %s3007_s2 }
  0xc3   :  { %2793 = vmatpush3.bf16.msra.mxu0 %v3003_v50  ;;  %2800 = vmatprep.mubr.msk.bf16.mxu0 %vm3033_vm0, %v3032_v51 }
  0xc4   :  { %2261 = vmatmul.mubr.bf16.vlgmr.msra.gmra.mrb[20].mxu1 %v567_v52  ;;  %2794 = vmatprep.subr.bf16.mxu0 %v3032_v51  ;;  %p3014_p3 = por %p3013_p2, %p3012_p1 }
  0xc6   :  { %p3015_p4 = pnand %p3014_p3, %p3008_p0 }
  0xc7   :  { %2795 = vmatpush3.bf16.msra.mxu0 %v3004_v53 }
  0xc8   :  { %2796 = vmatprep.subr.bf16.mxu0 %v3032_v51 }
  0xcb   :  { %2797 = vmatpush3.bf16.msra.mxu0 %v3005_v54 }
  0xcc   :  { %2798 = vmatprep.subr.bf16.mxu0 %v3032_v51 }
  0xcf   :  { %2799 = vmatpush3.bf16.msra.mxu0 %v3006_v55 }
  0xd2   :  { %2801 = vmatmul.mubr.msk.bf16.vlgmr.msra.gmra.mrb[24].mxu0 %vm1784_vm1, %v583_v57 }
  0xf5   :  { %v2539_v58 = vpop.f32.mrb[0].mxu0 }
  0xf6   :  { %v2540_v60 = vpop.f32.mrb[1].mxu0 }
  0xf7   :  { %v2541_v61 = vadd.f32 %v2540_v60, %v2539_v58  ;;  %v2542_v62 = vpop.f32.mrb[2].mxu0  ;;  %v2561_v63 = vpop.f32.mrb[0].mxu1 }
  0xf8   :  { %v2543_v0 = vpop.f32.mrb[3].mxu0  ;;  %v2562_v1 = vpop.f32.mrb[1].mxu1 }
  0xf9   :  { %v1823_v2 = vadd.f32 %v2541_v61, %v2324_v59  ;;  %v2563_v3 = vadd.f32 %v2562_v1, %v2561_v63  ;;  %v2564_v4 = vpop.f32.mrb[2].mxu1 }
  0xfa   :  { %v2565_v5 = vpop.f32.mrb[3].mxu1 }
  0xfb   :  { %v1863_v6 = vadd.f32 %v2563_v3, %v1823_v2 }
 0x115   :  { %v2583_v41 = vpop.f32.mrb[4].mxu0 }
 0x116   :  { %v2584_v7 = vpop.f32.mrb[5].mxu0 }
 0x117   :  { %v2585_v8 = vadd.f32 %v2584_v7, %v2583_v41  ;;  %v2586_v9 = vpop.f32.mrb[6].mxu0  ;;  %v2605_v10 = vpop.f32.mrb[4].mxu1 }
 0x118   :  { %v2587_v11 = vpop.f32.mrb[7].mxu0  ;;  %v2606_v12 = vpop.f32.mrb[5].mxu1 }
 0x119   :  { %v1903_v13 = vadd.f32 %v2585_v8, %v1863_v6  ;;  %v2607_v14 = vadd.f32 %v2606_v12, %v2605_v10  ;;  %v2608_v15 = vpop.f32.mrb[6].mxu1 }
 0x11a   :  { %v2609_v16 = vpop.f32.mrb[7].mxu1 }
 0x11b   :  { %v1943_v17 = vadd.f32 %v2607_v14, %v1903_v13 }
 0x135   :  { %v2627_v18 = vpop.f32.mrb[8].mxu0 }
 0x136   :  { %v2628_v19 = vpop.f32.mrb[9].mxu0 }
 0x137   :  { %v2629_v20 = vadd.f32 %v2628_v19, %v2627_v18  ;;  %v2630_v21 = vpop.f32.mrb[10].mxu0  ;;  %v2649_v22 = vpop.f32.mrb[8].mxu1 }
 0x138   :  { %v2631_v23 = vpop.f32.mrb[11].mxu0  ;;  %v2650_v24 = vpop.f32.mrb[9].mxu1 }
 0x139   :  { %v1983_v25 = vadd.f32 %v2629_v20, %v1943_v17  ;;  %v2651_v26 = vadd.f32 %v2650_v24, %v2649_v22  ;;  %v2652_v27 = vpop.f32.mrb[10].mxu1 }
 0x13a   :  { %v2653_v28 = vpop.f32.mrb[11].mxu1 }
 0x13b   :  { %v2023_v29 = vadd.f32 %v2651_v26, %v1983_v25 }
 0x155   :  { %v2671_v30 = vpop.f32.mrb[12].mxu0 }
 0x156   :  { %v2672_v31 = vpop.f32.mrb[13].mxu0 }
 0x157   :  { %v2673_v32 = vadd.f32 %v2672_v31, %v2671_v30  ;;  %v2674_v33 = vpop.f32.mrb[14].mxu0  ;;  %v2693_v34 = vpop.f32.mrb[12].mxu1 }
 0x158   :  { %v2675_v35 = vpop.f32.mrb[15].mxu0  ;;  %v2694_v36 = vpop.f32.mrb[13].mxu1 }
 0x159   :  { %v2063_v37 = vadd.f32 %v2673_v32, %v2023_v29  ;;  %v2695_v38 = vadd.f32 %v2694_v36, %v2693_v34  ;;  %v2696_v39 = vpop.f32.mrb[14].mxu1 }
 0x15a   :  { %v2697_v40 = vpop.f32.mrb[15].mxu1 }
 0x15b   :  { %v2103_v42 = vadd.f32 %v2695_v38, %v2063_v37 }
 0x175   :  { %v2715_v43 = vpop.f32.mrb[16].mxu0 }
 0x176   :  { %v2716_v44 = vpop.f32.mrb[17].mxu0 }
 0x177   :  { %v2717_v45 = vadd.f32 %v2716_v44, %v2715_v43  ;;  %v2718_v46 = vpop.f32.mrb[18].mxu0  ;;  %v2737_v47 = vpop.f32.mrb[16].mxu1 }
 0x178   :  { %v2719_v48 = vpop.f32.mrb[19].mxu0  ;;  %v2738_v49 = vpop.f32.mrb[17].mxu1 }
 0x179   :  { %v2143_v50 = vadd.f32 %v2717_v45, %v2103_v42  ;;  %v2739_v51 = vadd.f32 %v2738_v49, %v2737_v47  ;;  %v2740_v52 = vpop.f32.mrb[18].mxu1 }
 0x17a   :  { %v2741_v53 = vpop.f32.mrb[19].mxu1 }
 0x17b   :  { %v2183_v54 = vadd.f32 %v2739_v51, %v2143_v50 }
 0x195   :  { %v2759_v55 = vpop.f32.mrb[20].mxu0 }
 0x196   :  { %v2760_v56 = vpop.f32.mrb[21].mxu0 }
 0x197   :  { %v2761_v57 = vadd.f32 %v2760_v56, %v2759_v55  ;;  %v2762_v58 = vpop.f32.mrb[22].mxu0  ;;  %v2781_v59 = vpop.f32.mrb[20].mxu1 }
 0x198   :  { %v2763_v60 = vpop.f32.mrb[23].mxu0  ;;  %v2782_v61 = vpop.f32.mrb[21].mxu1 }
 0x199   :  { %v2223_v62 = vadd.f32 %v2761_v57, %v2183_v54  ;;  %v2783_v63 = vadd.f32 %v2782_v61, %v2781_v59  ;;  %v2784_v0 = vpop.f32.mrb[22].mxu1 }
 0x19a   :  { %v2785_v1 = vpop.f32.mrb[23].mxu1 }
 0x19b   :  { %v2263_v2 = vadd.f32 %v2783_v63, %v2223_v62 }
 0x1a5   :  { %v2302_v3 = vpop.f32.mrb[24].mxu0 }
 0x1a6   :  { %v2303_v4 = vadd.f32 %v2302_v3, %v2263_v2  ;;  %v2802_v5 = vpop.f32.mrb[25].mxu0 }
 0x1a7   :  { %v2305_v6 = vpop.f32.mrb[26].mxu0 }
 0x1a8   :  { %v2803_v41 = vpop.f32.mrb[27].mxu0  ;;  %2309 = vst.msk [vmem:[#allocation2] sm:$0x3] %vm2308_vm2, %v2303_v4 }
 0x1a9   :  { %3018 = shalt.err (!%p3015_p4)
}
 0x1aa   :  { %s3019_s11 = scalar_lea.hbm %s3709_s3, 32 }
 0x1ab   :  { %p3020_p5 = scmp.ne.s32.totalorder %s3709_s3, %s3019_s11  ;;  %p3023_p6 = scmp.lt.u32.totalorder %s3019_s11, %s3709_s3 }
 0x1ad   :  { %p3025_p7 = pnand %p3023_p6, %p3020_p5 }
 0x1af   :  { %3028 = shalt.err (!%p3025_p7)
}
 0x1b0   :  { %2319 = dma.vmem_to_hbm [thread:$0]  %s2317_s1, 32, %s3709_s3, [#allocation3]  }
 0x1b1   :  { %3029 = dma.done.wait [#allocation3], 32  }
 0x1b2   :  { %3030 = vsyncadd [#allocation3], 4294967264 }
 0x1b3   :  { %2323 = vsyncpa [#allocation3], 1 }

</bundles_post_ra>
